<compile_context>
chip_gen: v7x
topology: tpu7x:2x2x1
jax: 0.10.0
libtpu: 0.0.40
codegen_flags: <defaults>
</compile_context>

<pallas_src>
import functools

import jax
import jax.numpy as jnp
import numpy as np
from jax.experimental import pallas as pl
from jax.experimental.pallas import tpu as pltpu

# Module hyper-parameters (trainable=False -> compile-time constants)
OMEGA_0 = 30.0
SIGMA_0 = 10.0
_HALF_PI = float(np.pi / 2)

IN_FEATURES = 16
OUT_FEATURES = 32
N_POINTS = 128          # number of input coordinate rows


def _wire_kernel(xr_ref, xi_ref, wt_ref, wb_ref, b_ref, out_ref):
    # Two MXU pushes: (tile_n, fin) @ (fin, 8*fout) against the prepacked weights.
    # slab lanes = [lr | lr | li | li | sr | sr | si | si], each fout wide.
    slab = (jnp.dot(xr_ref[...], wt_ref[...],
                    preferred_element_type=jnp.float32,
                    precision=jax.lax.Precision.HIGHEST)
            + jnp.dot(xi_ref[...], wb_ref[...],
                      preferred_element_type=jnp.float32,
                      precision=jax.lax.Precision.HIGHEST)
            + b_ref[...])
    w4 = slab.shape[-1] // 2          # 4*fout = 128 lanes per register
    f = w4 // 4                       # fout
    reg_a = slab[:, :w4]              # [lr | lr | li | li]   (vreg-aligned slice)
    reg_b = slab[:, w4:]              # [sr | sr | si | si]

    # XLU half-register roll (shift = half width -> direction-insensitive):
    # rot_a = [li | li | lr | lr]; reused for both the Gaussian argument and the
    # exp(-omega*Im(lin)) factor.
    rot_a = pltpu.roll(reg_a, shift=2 * f, axis=1)
    sq_b = reg_b * reg_b
    # arg = |lin|^2 + |scale_y|^2, replicated across all 128 lanes.
    arg = reg_a * reg_a + rot_a * rot_a + sq_b + pltpu.roll(sq_b, shift=2 * f, axis=1)

    # out = exp(-omega*Im(lin) - sigma^2*arg) * [cos(omega*Re(lin)) | sin(...)]
    # sin is cos shifted by -pi/2 on the second fout-wide block -> one EUP cos.
    lane = jax.lax.broadcasted_iota(jnp.int32, reg_a.shape, 1)
    phase_off = jnp.where((lane >= f) & (lane < 2 * f),
                          jnp.float32(-_HALF_PI), jnp.float32(0.0))
    common = jnp.exp(-OMEGA_0 * rot_a - (SIGMA_0 * SIGMA_0) * arg)
    # Single unmasked 128-lane store: lanes = [out_re | out_im | pad | pad].
    out_ref[...] = common * jnp.cos(OMEGA_0 * reg_a + phase_off)


def prepack_wire2d_params(wl_re, wl_im, bl_re, bl_im, ws_re, ws_im, bs_re, bs_im):
    """Pack both complex nn.Linear layers into real matrices ONCE at init.

    wl_*/ws_*: (fin, fout) real/imag of W^T.  b*: (1, fout).
    Returns (w_top, w_bot, b_big): (fin, 8*fout), (fin, 8*fout), (1, 8*fout), so that
      slab = x_re @ w_top + x_im @ w_bot + b_big
           = [lin_re | lin_re | lin_im | lin_im | sy_re | sy_re | sy_im | sy_im].
    """
    w_top = jnp.concatenate([wl_re, wl_re, wl_im, wl_im,
                             ws_re, ws_re, ws_im, ws_im], axis=-1)
    w_bot = jnp.concatenate([-wl_im, -wl_im, wl_re, wl_re,
                             -ws_im, -ws_im, ws_re, ws_re], axis=-1)
    b_big = jnp.concatenate([bl_re, bl_re, bl_im, bl_im,
                             bs_re, bs_re, bs_im, bs_im], axis=-1)
    return w_top, w_bot, b_big


@functools.partial(jax.jit, static_argnames=("tile_n",))
def wire2d_apply(x_re, x_im, w_top, w_bot, b_big, *, tile_n=None):
    """x_*: (N, fin) f32.  Prepacked params from prepack_wire2d_params.
    Returns complex64 (N, fout)."""
    n, fin = x_re.shape
    fout = b_big.shape[-1] // 8
    out_w = 4 * fout                  # 128-lane packed output [re | im | pad | pad]

    if tile_n is None:
        tile_n = min(n, 512)          # 512-row tiles ~ HBM-roofline sweet spot
    tile_n = min(tile_n, n)
    assert n % tile_n == 0, "n must be a multiple of tile_n"
    n_tiles = n // tile_n

    out_shape = jax.ShapeDtypeStruct((n, out_w), jnp.float32)

    if n_tiles == 1:
        # Whole problem is one VMEM-resident tile: grid-less call, no per-step
        # pipeline overhead or redundant double-buffering.
        out_packed = pl.pallas_call(
            _wire_kernel,
            out_shape=out_shape,
            in_specs=[pl.BlockSpec((n, fin), lambda: (0, 0)),
                      pl.BlockSpec((n, fin), lambda: (0, 0)),
                      pl.BlockSpec((fin, 8 * fout), lambda: (0, 0)),
                      pl.BlockSpec((fin, 8 * fout), lambda: (0, 0)),
                      pl.BlockSpec((1, 8 * fout), lambda: (0, 0))],
            out_specs=pl.BlockSpec((n, out_w), lambda: (0, 0)),
        )(x_re, x_im, w_top, w_bot, b_big)
    else:
        # Batched coordinate set: row grid, independent tiles -> "parallel" so Mosaic
        # can shard steps across TensorCores (v7x) with no kernel-body changes.
        out_packed = pl.pallas_call(
            _wire_kernel,
            out_shape=out_shape,
            grid=(n_tiles,),
            in_specs=[pl.BlockSpec((tile_n, fin), lambda i: (i, 0)),
                      pl.BlockSpec((tile_n, fin), lambda i: (i, 0)),
                      pl.BlockSpec((fin, 8 * fout), lambda i: (0, 0)),
                      pl.BlockSpec((fin, 8 * fout), lambda i: (0, 0)),
                      pl.BlockSpec((1, 8 * fout), lambda i: (0, 0))],
            out_specs=pl.BlockSpec((tile_n, out_w), lambda i: (i, 0)),
            compiler_params=pltpu.CompilerParams(
                dimension_semantics=("parallel",)),
        )(x_re, x_im, w_top, w_bot, b_big)

    # TODO(synk): downstream Wire/linear layers should consume the packed real slab
    # directly; complex64 is rebuilt here only to match the module's return type.
    return out_packed[:, :fout] + 1j * out_packed[:, fout:2 * fout]


def _reference(x_c, wl_c, bl_c, ws_c, bs_c):
    hi = jax.lax.Precision.HIGHEST
    lin = jnp.dot(x_c, wl_c, precision=hi) + bl_c
    scale_y = jnp.dot(x_c, ws_c, precision=hi) + bs_c
    freq = jnp.exp(1j * OMEGA_0 * lin)
    arg = jnp.abs(lin) ** 2 + jnp.abs(scale_y) ** 2
    gauss = jnp.exp(-(SIGMA_0 ** 2) * arg)
    return freq * gauss


if __name__ == "__main__":
    key = jax.random.PRNGKey(0)
    keys = jax.random.split(key, 12)
    bound = 1.0 / np.sqrt(IN_FEATURES)

    # deterministic "init": uniform(-1/sqrt(in), 1/sqrt(in)) like nn.Linear
    def unif(k, shape):
        return jax.random.uniform(k, shape, jnp.float32, -bound, bound)

    x_re = jax.random.normal(keys[0], (N_POINTS, IN_FEATURES), jnp.float32) * 0.1
    x_im = jax.random.normal(keys[1], (N_POINTS, IN_FEATURES), jnp.float32) * 0.1

    wl_re = unif(keys[2], (IN_FEATURES, OUT_FEATURES))
    wl_im = unif(keys[3], (IN_FEATURES, OUT_FEATURES))
    bl_re = unif(keys[4], (1, OUT_FEATURES))
    bl_im = unif(keys[5], (1, OUT_FEATURES))
    ws_re = unif(keys[6], (IN_FEATURES, OUT_FEATURES))
    ws_im = unif(keys[7], (IN_FEATURES, OUT_FEATURES))
    bs_re = unif(keys[8], (1, OUT_FEATURES))
    bs_im = unif(keys[9], (1, OUT_FEATURES))

    # --- pack the two complex linears ONCE (init-time, not per call) ---
    w_top, w_bot, b_big = jax.block_until_ready(prepack_wire2d_params(
        wl_re, wl_im, bl_re, bl_im, ws_re, ws_im, bs_re, bs_im))

    # pure-JAX complex reference
    x_c = x_re + 1j * x_im
    wl_c = wl_re + 1j * wl_im
    ws_c = ws_re + 1j * ws_im
    bl_c = (bl_re + 1j * bl_im)[0]
    bs_c = (bs_re + 1j * bs_im)[0]

    # 1) module-sized call: single VMEM-resident tile -> grid-less path
    out = wire2d_apply(x_re, x_im, w_top, w_bot, b_big)
    out = jax.block_until_ready(out)
    ref = _reference(x_c, wl_c, bl_c, ws_c, bs_c)
    np.testing.assert_allclose(np.asarray(out), np.asarray(ref), atol=1e-5, rtol=1e-4)

    # 2) batched coordinate set -> row grid with a "parallel" axis
    xb_re = jax.random.normal(keys[10], (512, IN_FEATURES), jnp.float32) * 0.1
    xb_im = jax.random.normal(keys[11], (512, IN_FEATURES), jnp.float32) * 0.1
    out_b = wire2d_apply(xb_re, xb_im, w_top, w_bot, b_big, tile_n=128)
    out_b = jax.block_until_ready(out_b)
    ref_b = _reference(xb_re + 1j * xb_im, wl_c, bl_c, ws_c, bs_c)
    np.testing.assert_allclose(np.asarray(out_b), np.asarray(ref_b),
                               atol=1e-5, rtol=1e-4)

    print("KERNEL_OK")
</pallas_src>

<mosaic_0001>
module attributes {stable_mosaic.version = 11 : i64} {
  func.func @_wire_kernel(%arg0: memref<128x16xf32, #tpu.memory_space<vmem>>, %arg1: memref<128x16xf32, #tpu.memory_space<vmem>>, %arg2: memref<16x256xf32, #tpu.memory_space<vmem>>, %arg3: memref<16x256xf32, #tpu.memory_space<vmem>>, %arg4: memref<1x256xf32, #tpu.memory_space<vmem>>, %arg5: memref<128x128xf32, #tpu.memory_space<vmem>>) attributes {dimension_semantics = [], scalar_prefetch = 0 : i64, scratch_operands = 0 : i64, tpu.core_type = #tpu.core_type<tc>} {
    %c0 = arith.constant 0 : index
    %c0_0 = arith.constant 0 : index
    %0 = vector.load %arg0[%c0, %c0_0] : memref<128x16xf32, #tpu.memory_space<vmem>>, vector<128x16xf32>
    %c0_1 = arith.constant 0 : index
    %c0_2 = arith.constant 0 : index
    %1 = vector.load %arg2[%c0_1, %c0_2] : memref<16x256xf32, #tpu.memory_space<vmem>>, vector<16x256xf32>
    %cst = arith.constant dense<0.000000e+00> : vector<128x256xf32>
    %2 = tpu.matmul %0, %1, %cst {dimension_numbers = #tpu.dot_dimension_numbers<[1], [0], [0], [1], [0, 0, 1, 1], [], []>, precision = #tpu.contract_precision<fp32>} : vector<128x16xf32>, vector<16x256xf32>, vector<128x256xf32> -> vector<128x256xf32>
    %c0_3 = arith.constant 0 : index
    %c0_4 = arith.constant 0 : index
    %3 = vector.load %arg1[%c0_3, %c0_4] : memref<128x16xf32, #tpu.memory_space<vmem>>, vector<128x16xf32>
    %c0_5 = arith.constant 0 : index
    %c0_6 = arith.constant 0 : index
    %4 = vector.load %arg3[%c0_5, %c0_6] : memref<16x256xf32, #tpu.memory_space<vmem>>, vector<16x256xf32>
    %cst_7 = arith.constant dense<0.000000e+00> : vector<128x256xf32>
    %5 = tpu.matmul %3, %4, %cst_7 {dimension_numbers = #tpu.dot_dimension_numbers<[1], [0], [0], [1], [0, 0, 1, 1], [], []>, precision = #tpu.contract_precision<fp32>} : vector<128x16xf32>, vector<16x256xf32>, vector<128x256xf32> -> vector<128x256xf32>
    %6 = arith.addf %2, %5 : vector<128x256xf32>
    %c0_8 = arith.constant 0 : index
    %c0_9 = arith.constant 0 : index
    %7 = vector.load %arg4[%c0_8, %c0_9] : memref<1x256xf32, #tpu.memory_space<vmem>>, vector<1x256xf32>
    %8 = vector.broadcast %7 : vector<1x256xf32> to vector<128x256xf32>
    %9 = arith.addf %6, %8 : vector<128x256xf32>
    %10 = vector.extract_strided_slice %9 {offsets = [0, 0], sizes = [128, 128], strides = [1, 1]} : vector<128x256xf32> to vector<128x128xf32>
    %11 = vector.extract_strided_slice %9 {offsets = [0, 128], sizes = [128, 128], strides = [1, 1]} : vector<128x256xf32> to vector<128x128xf32>
    %c64_i32 = arith.constant 64 : i32
    %12 = tpu.dynamic_rotate %10 by %c64_i32 dim 1 : vector<128x128xf32>, i32 -> vector<128x128xf32>
    %13 = arith.mulf %11, %11 : vector<128x128xf32>
    %14 = arith.mulf %10, %10 : vector<128x128xf32>
    %15 = arith.mulf %12, %12 : vector<128x128xf32>
    %16 = arith.addf %14, %15 : vector<128x128xf32>
    %17 = arith.addf %16, %13 : vector<128x128xf32>
    %c64_i32_10 = arith.constant 64 : i32
    %18 = tpu.dynamic_rotate %13 by %c64_i32_10 dim 1 : vector<128x128xf32>, i32 -> vector<128x128xf32>
    %19 = arith.addf %17, %18 : vector<128x128xf32>
    %20 = tpu.iota {dimensions = array<i32: 1>} : vector<128x128xi32>
    %c32_i32 = arith.constant 32 : i32
    %21 = vector.broadcast %c32_i32 : i32 to vector<128x128xi32>
    %22 = arith.cmpi sge, %20, %21 : vector<128x128xi32>
    %c64_i32_11 = arith.constant 64 : i32
    %23 = vector.broadcast %c64_i32_11 : i32 to vector<128x128xi32>
    %24 = arith.cmpi slt, %20, %23 : vector<128x128xi32>
    %25 = arith.andi %22, %24 : vector<128x128xi1>
    %cst_12 = arith.constant -1.57079637 : f32
    %cst_13 = arith.constant 0.000000e+00 : f32
    %26 = vector.broadcast %cst_12 : f32 to vector<128x128xf32>
    %27 = vector.broadcast %cst_13 : f32 to vector<128x128xf32>
    %28 = arith.select %25, %26, %27 : vector<128x128xi1>, vector<128x128xf32>
    %cst_14 = arith.constant -3.000000e+01 : f32
    %29 = vector.broadcast %cst_14 : f32 to vector<128x128xf32>
    %30 = arith.mulf %29, %12 : vector<128x128xf32>
    %cst_15 = arith.constant 1.000000e+02 : f32
    %31 = vector.broadcast %cst_15 : f32 to vector<128x128xf32>
    %32 = arith.mulf %31, %19 : vector<128x128xf32>
    %33 = arith.subf %30, %32 : vector<128x128xf32>
    %34 = math.exp %33 : vector<128x128xf32>
    %cst_16 = arith.constant 3.000000e+01 : f32
    %35 = vector.broadcast %cst_16 : f32 to vector<128x128xf32>
    %36 = arith.mulf %35, %10 : vector<128x128xf32>
    %37 = arith.addf %36, %28 : vector<128x128xf32>
    %38 = math.cos %37 : vector<128x128xf32>
    %39 = arith.mulf %34, %38 : vector<128x128xf32>
    %c0_17 = arith.constant 0 : index
    %c0_18 = arith.constant 0 : index
    %40 = vector.load %arg5[%c0_17, %c0_18] : memref<128x128xf32, #tpu.memory_space<vmem>>, vector<128x128xf32>
    tpu.vector_store %arg5[%c0_17, %c0_18], %39 {strides = array<i32>} : memref<128x128xf32, #tpu.memory_space<vmem>>, vector<128x128xf32>,
    return
  }
}

</mosaic_0001>

<bundles_post_ra>
// kernel: custom-call
= control target key start
LH: loop header
LB: loop body
LE: loop exit
PB: predicated region body
PF: predicated region fallthrough
CT: control target
= control target key end

     0   :  { %s412_s0 = inlined_call_operand.vmem [shape: f32[128,32], index: 0, kind: input, shape index: {}]   ;;  %s413_s2 = inlined_call_operand.vmem [shape: c64[128,32], index: 2, kind: output, shape index: {}]   ;;  %s414_s1 = inlined_call_operand.vmem [shape: f32[128,32], index: 1, kind: input, shape index: {}]  }
   0x1   :  { %v5_v0 = vld [vmem:[%s412_s0] sm:$0xff]  ;;  %v144_v1 = vld [vmem:[%s412_s0 + $0x8] sm:$0xff]  ;;  %v146_v2 = vld [vmem:[%s412_s0 + $0x10] sm:$0xff] }
   0x2   :  { %6 = vst [vmem:[%s413_s2] sm:$0xff] %v5_v0  ;;  %145 = vst [vmem:[%s413_s2 + $0x8] sm:$0xff] %v144_v1  ;;  %v148_v3 = vld [vmem:[%s412_s0 + $0x18] sm:$0xff]  ;;  %v150_v4 = vld [vmem:[%s412_s0 + $0x20] sm:$0xff] }
   0x3   :  { %147 = vst [vmem:[%s413_s2 + $0x10] sm:$0xff] %v146_v2  ;;  %v152_v5 = vld [vmem:[%s412_s0 + $0x28] sm:$0xff]  ;;  %149 = vst [vmem:[%s413_s2 + $0x18] sm:$0xff] %v148_v3  ;;  %v154_v6 = vld [vmem:[%s412_s0 + $0x30] sm:$0xff] }
   0x4   :  { %151 = vst [vmem:[%s413_s2 + $0x20] sm:$0xff] %v150_v4  ;;  %153 = vst [vmem:[%s413_s2 + $0x28] sm:$0xff] %v152_v5  ;;  %v156_v7 = vld [vmem:[%s412_s0 + $0x38] sm:$0xff]  ;;  %v158_v8 = vld [vmem:[%s412_s0 + $0x40] sm:$0xff] }
   0x5   :  { %155 = vst [vmem:[%s413_s2 + $0x30] sm:$0xff] %v154_v6  ;;  %157 = vst [vmem:[%s413_s2 + $0x38] sm:$0xff] %v156_v7  ;;  %v160_v9 = vld [vmem:[%s412_s0 + $0x48] sm:$0xff]  ;;  %v162_v10 = vld [vmem:[%s412_s0 + $0x50] sm:$0xff] }
   0x6   :  { %159 = vst [vmem:[%s413_s2 + $0x40] sm:$0xff] %v158_v8  ;;  %v164_v11 = vld [vmem:[%s412_s0 + $0x58] sm:$0xff]  ;;  %161 = vst [vmem:[%s413_s2 + $0x48] sm:$0xff] %v160_v9  ;;  %v166_v12 = vld [vmem:[%s412_s0 + $0x60] sm:$0xff] }
   0x7   :  { %163 = vst [vmem:[%s413_s2 + $0x50] sm:$0xff] %v162_v10  ;;  %165 = vst [vmem:[%s413_s2 + $0x58] sm:$0xff] %v164_v11  ;;  %v168_v13 = vld [vmem:[%s412_s0 + $0x68] sm:$0xff]  ;;  %v170_v14 = vld [vmem:[%s412_s0 + $0x70] sm:$0xff] }
   0x8   :  { %167 = vst [vmem:[%s413_s2 + $0x60] sm:$0xff] %v166_v12  ;;  %169 = vst [vmem:[%s413_s2 + $0x68] sm:$0xff] %v168_v13  ;;  %v172_v15 = vld [vmem:[%s412_s0 + $0x78] sm:$0xff]  ;;  %v67_v16 = vld [vmem:[%s414_s1] sm:$0xff] }
   0x9   :  { %171 = vst [vmem:[%s413_s2 + $0x70] sm:$0xff] %v170_v14  ;;  %v175_v17 = vld [vmem:[%s414_s1 + $0x8] sm:$0xff]  ;;  %173 = vst [vmem:[%s413_s2 + $0x78] sm:$0xff] %v172_v15  ;;  %v177_v18 = vld [vmem:[%s414_s1 + $0x10] sm:$0xff] }
   0xa   :  { %174 = vst [vmem:[%s413_s2 + $0x80] sm:$0xff] %v67_v16  ;;  %176 = vst [vmem:[%s413_s2 + $0x88] sm:$0xff] %v175_v17  ;;  %v179_v19 = vld [vmem:[%s414_s1 + $0x18] sm:$0xff]  ;;  %v181_v20 = vld [vmem:[%s414_s1 + $0x20] sm:$0xff] }
   0xb   :  { %178 = vst [vmem:[%s413_s2 + $0x90] sm:$0xff] %v177_v18  ;;  %180 = vst [vmem:[%s413_s2 + $0x98] sm:$0xff] %v179_v19  ;;  %v183_v21 = vld [vmem:[%s414_s1 + $0x28] sm:$0xff]  ;;  %v185_v22 = vld [vmem:[%s414_s1 + $0x30] sm:$0xff] }
   0xc   :  { %182 = vst [vmem:[%s413_s2 + $0xa0] sm:$0xff] %v181_v20  ;;  %v187_v23 = vld [vmem:[%s414_s1 + $0x38] sm:$0xff]  ;;  %184 = vst [vmem:[%s413_s2 + $0xa8] sm:$0xff] %v183_v21  ;;  %v189_v24 = vld [vmem:[%s414_s1 + $0x40] sm:$0xff] }
   0xd   :  { %186 = vst [vmem:[%s413_s2 + $0xb0] sm:$0xff] %v185_v22  ;;  %188 = vst [vmem:[%s413_s2 + $0xb8] sm:$0xff] %v187_v23  ;;  %v191_v25 = vld [vmem:[%s414_s1 + $0x48] sm:$0xff]  ;;  %v193_v26 = vld [vmem:[%s414_s1 + $0x50] sm:$0xff] }
   0xe   :  { %190 = vst [vmem:[%s413_s2 + $0xc0] sm:$0xff] %v189_v24  ;;  %192 = vst [vmem:[%s413_s2 + $0xc8] sm:$0xff] %v191_v25  ;;  %v195_v27 = vld [vmem:[%s414_s1 + $0x58] sm:$0xff]  ;;  %v197_v28 = vld [vmem:[%s414_s1 + $0x60] sm:$0xff] }
   0xf   :  { %194 = vst [vmem:[%s413_s2 + $0xd0] sm:$0xff] %v193_v26  ;;  %v199_v29 = vld [vmem:[%s414_s1 + $0x68] sm:$0xff]  ;;  %196 = vst [vmem:[%s413_s2 + $0xd8] sm:$0xff] %v195_v27  ;;  %v201_v30 = vld [vmem:[%s414_s1 + $0x70] sm:$0xff] }
  0x10   :  { %198 = vst [vmem:[%s413_s2 + $0xe0] sm:$0xff] %v197_v28  ;;  %200 = vst [vmem:[%s413_s2 + $0xe8] sm:$0xff] %v199_v29  ;;  %v203_v31 = vld [vmem:[%s414_s1 + $0x78] sm:$0xff] }
  0x11   :  { %202 = vst [vmem:[%s413_s2 + $0xf0] sm:$0xff] %v201_v30  ;;  %204 = vst [vmem:[%s413_s2 + $0xf8] sm:$0xff] %v203_v31 }

// kernel: wire2d_apply.1
= control target key start
LH: loop header
LB: loop body
LE: loop exit
PB: predicated region body
PF: predicated region fallthrough
CT: control target
= control target key end

     0   :  { %v8277_v3 = vmov 0.0   ;;  %vm60_vm0 = vcmask 130048   ;;  %s8214_s3 = inlined_call_operand.vmem [shape: f32[16,256], index: 3, kind: input, shape index: {}]   ;;  %s8215_s2 = inlined_call_operand.vmem [shape: f32[16,256], index: 2, kind: input, shape index: {}]   ;;  %s8216_s1 = inlined_call_operand.vmem [shape: f32[128,16], index: 1, kind: input, shape index: {}]   ;;  %s8217_s0 = inlined_call_operand.vmem [shape: f32[128,16], index: 0, kind: input, shape index: {}]   ;;  %s8218_s4 = inlined_call_operand.vmem [shape: f32[1,256], index: 4, kind: input, shape index: {}]   ;;  %s8219_s5 = inlined_call_operand.vmem [shape: f32[128,128], index: 5, kind: output, shape index: {}]  }
   0x1   :  { %v57_v0 = vld [vmem:[%s8214_s3 + $0x8] sm:$0xff]  ;;  %v59_v1 = vld [vmem:[%s8214_s3 + $0x18] sm:$0xff]  ;;  %177 = vmatprep.mubr.f32.mxu1 %v8277_v3  ;;  %1451 = vmatprep.mubr.f32.mxu0 %v8277_v3  ;;  %v56_v8 = vld [vmem:[%s8214_s3] sm:$0xff] }
   0x2   :  { %v37_v2 = vld [vmem:[%s8215_s2 + $0x8] sm:$0xff]  ;;  %v109_v4 = vand.u32 4294901760, %v57_v0  ;;  %v113_v5 = vand.u32 4294901760, %v59_v1  ;;  %v39_v6 = vld [vmem:[%s8215_s2 + $0x18] sm:$0xff]  ;;  %v58_v9 = vld [vmem:[%s8214_s3 + $0x10] sm:$0xff]  ;;  %v111_v11 = vand.u32 4294901760, %v56_v8 }
   0x3   :  { %v1383_v7 = vand.u32 4294901760, %v37_v2  ;;  %v1387_v10 = vand.u32 4294901760, %v39_v6  ;;  %v115_v12 = vand.u32 4294901760, %v58_v9  ;;  %v36_v13 = vld [vmem:[%s8215_s2] sm:$0xff]  ;;  %v38_v14 = vld [vmem:[%s8215_s2 + $0x10] sm:$0xff]  ;;  %v41_v53 = vld [vmem:[%s8216_s1 + $0x8] sm:$0xff] }
   0x4   :  { %v40_v15 = vld [vmem:[%s8216_s1] sm:$0xff]  ;;  %v5314_v16 = vpack.c.bf16 %v113_v5, %v109_v4  ;;  %v5316_v17 = vsub.f32 %v57_v0, %v109_v4  ;;  %v5318_v18 = vsub.f32 %v59_v1, %v113_v5  ;;  %v5331_v24 = vsub.f32 %v56_v8, %v111_v11  ;;  %v21_v62 = vld [vmem:[%s8217_s0 + $0x8] sm:$0xff]  ;;  %v42_v63 = vld [vmem:[%s8216_s1 + $0x10] sm:$0xff] }
   0x5   :  { %v5320_v19 = vsub.f32 %v37_v2, %v1383_v7  ;;  %v20_v20 = vld [vmem:[%s8217_s0] sm:$0xff]  ;;  %v5325_v21 = vpack.c.bf16 %v1387_v10, %v1383_v7  ;;  %v5327_v22 = vsub.f32 %v39_v6, %v1387_v10  ;;  %v5329_v23 = vpack.c.bf16 %v115_v12, %v111_v11  ;;  %v22_v5 = vld [vmem:[%s8217_s0 + $0x10] sm:$0xff]  ;;  %v43_v10 = vld [vmem:[%s8216_s1 + $0x18] sm:$0xff] }
   0x6   :  { %4680 = vmatprep.subr.bf16.mxu1 %v5314_v16  ;;  %v5334_v25 = vsub.f32 %v58_v9, %v115_v12  ;;  %v1385_v26 = vand.u32 4294901760, %v36_v13  ;;  %v1389_v27 = vand.u32 4294901760, %v38_v14  ;;  %v62_v28 = vsel %vm60_vm0, %v40_v15, 0  ;;  %v23_v11 = vld [vmem:[%s8217_s0 + $0x18] sm:$0xff] }
   0x7   :  { %8445 = vst [vmem:[#allocation2_spill] sm:$0xff] %v5329_v23  ;;  %4704 = vmatprep.subr.bf16.mxu0 %v5325_v21  ;;  %4682 = vmatpush1.bf16.msra.mxu1 %v5329_v23  ;;  %v5339_v29 = vand.u32 4294901760, %v62_v28  ;;  %v1336_v30 = vsel %vm60_vm0, %v20_v20, 0  ;;  %v8240_v31 = vand.u32 4294901760, %v5316_v17  ;;  %v8238_v32 = vand.u32 4294901760, %v5318_v18 }
   0x8   :  { %8446 = vst [vmem:[#allocation3_spill] sm:$0xff] %v5334_v25  ;;  %v5344_v33 = vpack.c.bf16 %v1389_v27, %v1385_v26  ;;  %v5346_v34 = vsub.f32 %v36_v13, %v1385_v26  ;;  %v5348_v35 = vsub.f32 %v38_v14, %v1389_v27  ;;  %v5350_v36 = vand.u32 4294901760, %v1336_v30 }
   0x9   :  { %v5353_v37 = vsub.f32 %v62_v28, %v5339_v29  ;;  %v357_v38 = vsub.f32 %v5316_v17, %v8240_v31  ;;  %v369_v39 = vsub.f32 %v5318_v18, %v8238_v32  ;;  %v8237_v40 = vand.u32 4294901760, %v5320_v19 }
   0xa   :  { %8447 = vst [vmem:[#allocation4_spill] sm:$0xff] %v5344_v33  ;;  %8448 = vst [vmem:[#allocation5_spill] sm:$0xff] %v5346_v34  ;;  %4706 = vmatpush1.bf16.msra.mxu0 %v5344_v33  ;;  %v5364_v41 = vsub.f32 %v1336_v30, %v5350_v36  ;;  %v8236_v42 = vand.u32 4294901760, %v5327_v22  ;;  %v8234_v43 = vand.u32 4294901760, %v5331_v24  ;;  %v8232_v44 = vand.u32 4294901760, %v5334_v25  ;;  %v44_v30 = vld [vmem:[%s8216_s1 + $0x20] sm:$0xff] }
   0xb   :  { %8449 = vst [vmem:[#allocation6_spill] sm:$0xff] %v5348_v35  ;;  %v8229_v45 = vand.u32 4294901760, %v5353_v37  ;;  %v358_v46 = vand.u32 4294901760, %v357_v38  ;;  %v370_v47 = vand.u32 4294901760, %v369_v39  ;;  %v1631_v48 = vsub.f32 %v5320_v19, %v8237_v40 }
   0xc   :  { %8450 = vst [vmem:[#allocation7_spill] sm:$0xff] %v5364_v41  ;;  %v8227_v49 = vand.u32 4294901760, %v5364_v41  ;;  %v1643_v50 = vsub.f32 %v5327_v22, %v8236_v42  ;;  %v363_v51 = vsub.f32 %v5331_v24, %v8234_v43  ;;  %v375_v52 = vsub.f32 %v5334_v25, %v8232_v44  ;;  %v30_v42 = vld [vmem:[%s8217_s0 + $0x50] sm:$0xff] }
   0xd   :  { %v181_v54 = vsub.f32 %v5353_v37, %v8229_v45  ;;  %v4683_v55 = vpack.c.bf16 %v370_v47, %v358_v46  ;;  %v1632_v56 = vand.u32 4294901760, %v1631_v48  ;;  %v8231_v57 = vand.u32 4294901760, %v5346_v34 }
   0xe   :  { %v1455_v58 = vsub.f32 %v5364_v41, %v8227_v49  ;;  %v1644_v59 = vand.u32 4294901760, %v1643_v50  ;;  %v364_v60 = vand.u32 4294901760, %v363_v51  ;;  %v376_v61 = vand.u32 4294901760, %v375_v52 }
   0xf   :  { %v182_v0 = vand.u32 4294901760, %v181_v54  ;;  %4684 = vmatprep.subr.bf16.mxu1 %v4683_v55  ;;  %v1637_v1 = vsub.f32 %v5346_v34, %v8231_v57  ;;  %v8230_v2 = vand.u32 4294901760, %v5348_v35  ;;  %v65_v4 = vsel %vm60_vm0, %v41_v53, 0  ;;  %v24_v53 = vld [vmem:[%s8217_s0 + $0x20] sm:$0xff] }
  0x10   :  { %v1456_v6 = vand.u32 4294901760, %v1455_v58  ;;  %v4707_v7 = vpack.c.bf16 %v1644_v59, %v1632_v56  ;;  %v4685_v8 = vpack.c.bf16 %v376_v61, %v364_v60  ;;  %v5407_v9 = vand.u32 4294901760, %v65_v4 }
  0x11   :  { %183 = vmatmul.mubr.f32.vlgmr.msra.gmra.mrb[0].mxu1 %v182_v0  ;;  %v1638_v12 = vand.u32 4294901760, %v1637_v1  ;;  %v1649_v13 = vsub.f32 %v5348_v35, %v8230_v2  ;;  %v1339_v14 = vsel %vm60_vm0, %v21_v62, 0  ;;  %v68_v15 = vsel %vm60_vm0, %v42_v63, 0 }
  0x12   :  { %1457 = vmatmul.mubr.f32.vlgmr.msra.gmra.mrb[0].mxu0 %v1456_v6  ;;  %4708 = vmatprep.subr.bf16.mxu0 %v4707_v7  ;;  %v5421_v20 = vsub.f32 %v65_v4, %v5407_v9  ;;  %v5423_v26 = vand.u32 4294901760, %v1339_v14  ;;  %v5425_v27 = vand.u32 4294901760, %v68_v15  ;;  %v1342_v28 = vsel %vm60_vm0, %v22_v5, 0  ;;  %v45_v5 = vld [vmem:[%s8216_s1 + $0x28] sm:$0xff] }
  0x13   :  { %4686 = vmatpush1.bf16.msra.mxu1 %v4685_v8  ;;  %v1650_v38 = vand.u32 4294901760, %v1649_v13  ;;  %188 = vmatprep.mubr.f32.mxu1 %v8277_v3  ;;  %v5432_v39 = vand.u32 4294901760, %v1342_v28  ;;  %v71_v46 = vsel %vm60_vm0, %v43_v10, 0  ;;  %v1345_v47 = vsel %vm60_vm0, %v23_v11, 0 }
  0x14   :  { %8451 = vst [vmem:[#allocation8_spill] sm:$0xff] %v5421_v20  ;;  %1462 = vmatprep.mubr.f32.mxu0 %v8277_v3  ;;  %v8226_v48 = vand.u32 4294901760, %v5421_v20  ;;  %v5439_v50 = vsub.f32 %v1339_v14, %v5423_v26  ;;  %v5442_v51 = vsub.f32 %v68_v15, %v5425_v27  ;;  %v5444_v52 = vand.u32 4294901760, %v71_v46  ;;  %v25_v15 = vld [vmem:[%s8217_s0 + $0x28] sm:$0xff] }
  0x15   :  { %v4709_v54 = vpack.c.bf16 %v1650_v38, %v1638_v12  ;;  %v5450_v55 = vsub.f32 %v1342_v28, %v5432_v39  ;;  %v5452_v56 = vand.u32 4294901760, %v1345_v47  ;;  %v74_v58 = vsel %vm60_vm0, %v44_v30, 0  ;;  %v46_v28 = vld [vmem:[%s8216_s1 + $0x30] sm:$0xff] }
  0x16   :  { %8452 = vst [vmem:[#allocation9_spill] sm:$0xff] %v5439_v50  ;;  %8453 = vst [vmem:[#allocation10_spill] sm:$0xff] %v5442_v51  ;;  %v192_v59 = vsub.f32 %v5421_v20, %v8226_v48  ;;  %v8225_v60 = vand.u32 4294901760, %v5439_v50  ;;  %v8223_v61 = vand.u32 4294901760, %v5442_v51  ;;  %v5461_v62 = vsub.f32 %v71_v46, %v5444_v52 }
  0x17   :  { %8454 = vst [vmem:[#allocation11_spill] sm:$0xff] %v5450_v55  ;;  %4710 = vmatpush1.bf16.msra.mxu0 %v4709_v54  ;;  %v8222_v63 = vand.u32 4294901760, %v5450_v55  ;;  %v5465_v0 = vsub.f32 %v1345_v47, %v5452_v56  ;;  %v5467_v1 = vand.u32 4294901760, %v74_v58  ;;  %v1348_v4 = vsel %vm60_vm0, %v24_v53, 0 }
  0x18   :  { %8455 = vst [vmem:[#allocation12_spill] sm:$0xff] %v5461_v62  ;;  %v193_v6 = vand.u32 4294901760, %v192_v59  ;;  %v1466_v7 = vsub.f32 %v5439_v50, %v8225_v60  ;;  %v203_v8 = vsub.f32 %v5442_v51, %v8223_v61  ;;  %v8221_v10 = vand.u32 4294901760, %v5461_v62  ;;  %v26_v59 = vld [vmem:[%s8217_s0 + $0x30] sm:$0xff] }
  0x19   :  { %8456 = vst [vmem:[#allocation13_spill] sm:$0xff] %v5465_v0  ;;  %v1477_v11 = vsub.f32 %v5450_v55, %v8222_v63  ;;  %v8220_v12 = vand.u32 4294901760, %v5465_v0  ;;  %v5485_v13 = vsub.f32 %v74_v58, %v5467_v1  ;;  %v5487_v14 = vand.u32 4294901760, %v1348_v4 }
  0x1a   :  { %194 = vmatmul.mubr.f32.gmra.mrb[2].mxu1 %v193_v6  ;;  %v1467_v30 = vand.u32 4294901760, %v1466_v7  ;;  %v204_v38 = vand.u32 4294901760, %v203_v8  ;;  %v214_v46 = vsub.f32 %v5461_v62, %v8221_v10  ;;  %v77_v47 = vsel %vm60_vm0, %v45_v5, 0  ;;  %v47_v6 = vld [vmem:[%s8216_s1 + $0x38] sm:$0xff] }
  0x1b   :  { %8457 = vst [vmem:[#allocation14_spill] sm:$0xff] %v5485_v13  ;;  %199 = vmatprep.mubr.f32.mxu1 %v8277_v3  ;;  %v1488_v53 = vsub.f32 %v5465_v0, %v8220_v12  ;;  %v8224_v54 = vand.u32 4294901760, %v5485_v13  ;;  %v5505_v58 = vsub.f32 %v1348_v4, %v5487_v14  ;;  %v1478_v5 = vand.u32 4294901760, %v1477_v11  ;;  %v27_v11 = vld [vmem:[%s8217_s0 + $0x38] sm:$0xff] }
  0x1c   :  { %1468 = vmatmul.mubr.f32.gmra.mrb[2].mxu0 %v1467_v30  ;;  %v5513_v7 = vand.u32 4294901760, %v77_v47  ;;  %v1351_v8 = vsel %vm60_vm0, %v25_v15, 0  ;;  %v80_v12 = vsel %vm60_vm0, %v46_v28, 0  ;;  %v215_v4 = vand.u32 4294901760, %v214_v46 }
  0x1d   :  { %8458 = vst [vmem:[#allocation15_spill] sm:$0xff] %v5505_v58  ;;  %1473 = vmatprep.mubr.f32.mxu0 %v8277_v3  ;;  %v225_v10 = vsub.f32 %v5485_v13, %v8224_v54  ;;  %v8228_v63 = vand.u32 4294901760, %v5505_v58  ;;  %v5522_v61 = vand.u32 4294901760, %v1351_v8  ;;  %v5530_v28 = vand.u32 4294901760, %v80_v12 }
  0x1e   :  { %205 = vmatmul.mubr.f32.gmra.mrb[4].mxu1 %v204_v38  ;;  %v5528_v15 = vsub.f32 %v77_v47, %v5513_v7  ;;  %v1354_v30 = vsel %vm60_vm0, %v26_v59, 0  ;;  %v83_v46 = vsel %vm60_vm0, %v47_v6, 0  ;;  %v1489_v54 = vand.u32 4294901760, %v1488_v53  ;;  %v48_v47 = vld [vmem:[%s8216_s1 + $0x40] sm:$0xff] }
  0x1f   :  { %210 = vmatprep.mubr.f32.mxu1 %v8277_v3  ;;  %v1499_v60 = vsub.f32 %v5505_v58, %v8228_v63  ;;  %v5539_v48 = vsub.f32 %v1351_v8, %v5522_v61  ;;  %v5541_v38 = vand.u32 4294901760, %v1354_v30  ;;  %v5548_v6 = vsub.f32 %v80_v12, %v5530_v28 }
  0x20   :  { %8459 = vst [vmem:[#allocation16_spill] sm:$0xff] %v5528_v15  ;;  %1479 = vmatmul.mubr.f32.gmra.mrb[4].mxu0 %v1478_v5  ;;  %v8233_v59 = vand.u32 4294901760, %v5528_v15  ;;  %v5550_v53 = vand.u32 4294901760, %v83_v46  ;;  %v1357_v49 = vsel %vm60_vm0, %v27_v11, 0  ;;  %v226_v8 = vand.u32 4294901760, %v225_v10  ;;  %v28_v5 = vld [vmem:[%s8217_s0 + $0x40] sm:$0xff] }
  0x21   :  { %8460 = vst [vmem:[#allocation17_spill] sm:$0xff] %v5539_v48  ;;  %8461 = vst [vmem:[#allocation18_spill] sm:$0xff] %v5548_v6  ;;  %1484 = vmatprep.mubr.f32.mxu0 %v8277_v3  ;;  %v8235_v63 = vand.u32 4294901760, %v5539_v48  ;;  %v5556_v45 = vsub.f32 %v1354_v30, %v5541_v38  ;;  %v5558_v2 = vand.u32 4294901760, %v1357_v49  ;;  %v8239_v11 = vand.u32 4294901760, %v5548_v6 }
  0x22   :  { %216 = vmatmul.mubr.f32.gmra.mrb[6].mxu1 %v215_v4  ;;  %v236_v12 = vsub.f32 %v5528_v15, %v8233_v59  ;;  %v5568_v10 = vsub.f32 %v83_v46, %v5550_v53  ;;  %v86_v57 = vsel %vm60_vm0, %v48_v47, 0  ;;  %v49_v59 = vld [vmem:[%s8216_s1 + $0x48] sm:$0xff]  ;;  %v1500_v43 = vand.u32 4294901760, %v1499_v60 }
  0x23   :  { %8462 = vst [vmem:[#allocation19_spill] sm:$0xff] %v5556_v45  ;;  %221 = vmatprep.mubr.f32.mxu1 %v8277_v3  ;;  %v1510_v30 = vsub.f32 %v5539_v48, %v8235_v63  ;;  %v8241_v44 = vand.u32 4294901760, %v5556_v45  ;;  %v5576_v4 = vand.u32 4294901760, %v86_v57  ;;  %v5582_v46 = vsub.f32 %v1357_v49, %v5558_v2  ;;  %v29_v60 = vld [vmem:[%s8217_s0 + $0x48] sm:$0xff]  ;;  %v50_v49 = vld [vmem:[%s8216_s1 + $0x50] sm:$0xff] }
  0x24   :  { %8463 = vst [vmem:[#allocation20_spill] sm:$0xff] %v5568_v10  ;;  %1490 = vmatmul.mubr.f32.gmra.mrb[6].mxu0 %v1489_v54  ;;  %v1360_v47 = vsel %vm60_vm0, %v28_v5, 0  ;;  %v247_v63 = vsub.f32 %v5548_v6, %v8239_v11  ;;  %v237_v54 = vand.u32 4294901760, %v236_v12  ;;  %v89_v32 = vsel %vm60_vm0, %v49_v59, 0 }
  0x25   :  { %8464 = vst [vmem:[#allocation21_spill] sm:$0xff] %v5576_v4  ;;  %8465 = vst [vmem:[#allocation22_spill] sm:$0xff] %v5582_v46  ;;  %1495 = vmatprep.mubr.f32.mxu0 %v8277_v3  ;;  %v5591_v40 = vsub.f32 %v86_v57, %v5576_v4  ;;  %v5599_v5 = vand.u32 4294901760, %v1360_v47  ;;  %v1511_v11 = vand.u32 4294901760, %v1510_v30  ;;  %v1521_v57 = vsub.f32 %v5556_v45, %v8241_v44 }
  0x26   :  { %227 = vmatmul.mubr.f32.gmra.mrb[8].mxu1 %v226_v8  ;;  %v5606_v31 = vand.u32 4294901760, %v89_v32  ;;  %v51_v8 = vld [vmem:[%s8216_s1 + $0x58] sm:$0xff]  ;;  %v8256_v59 = vand.u32 4294901760, %v5582_v46  ;;  %v1363_v30 = vsel %vm60_vm0, %v29_v60, 0  ;;  %v92_v44 = vsel %vm60_vm0, %v50_v49, 0 }
  0x27   :  { %8466 = vst [vmem:[#allocation23_spill] sm:$0xff] %v5591_v40  ;;  %8467 = vst [vmem:[#allocation24_spill] sm:$0xff] %v5599_v5  ;;  %232 = vmatprep.mubr.f32.mxu1 %v8277_v3  ;;  %v5616_v12 = vsub.f32 %v1360_v47, %v5599_v5  ;;  %v248_v45 = vand.u32 4294901760, %v247_v63  ;;  %v8470_v6 = vand.u32 4294901760, %v5568_v10  ;;  %v5625_v58 = vand.u32 4294901760, %v1363_v30 }
  0x28   :  { %8468 = vst [vmem:[#allocation25_spill] sm:$0xff] %v5606_v31  ;;  %1501 = vmatmul.mubr.f32.gmra.mrb[8].mxu0 %v1500_v43  ;;  %v31_v43 = vld [vmem:[%s8217_s0 + $0x58] sm:$0xff]  ;;  %v5631_v47 = vsub.f32 %v89_v32, %v5606_v31  ;;  %v5633_v60 = vand.u32 4294901760, %v92_v44  ;;  %v1366_v63 = vsel %vm60_vm0, %v30_v42, 0  ;;  %v95_v49 = vsel %vm60_vm0, %v51_v8, 0  ;;  %v52_v42 = vld [vmem:[%s8216_s1 + $0x60] sm:$0xff] }
  0x29   :  { %8469 = vst [vmem:[#allocation26_spill] sm:$0xff] %v5616_v12  ;;  %1506 = vmatprep.mubr.f32.mxu0 %v8277_v3  ;;  %v258_v48 = vsub.f32 %v5568_v10, %v8470_v6  ;;  %8471 = vst [vmem:[#allocation27_spill] sm:$0xff] %v5625_v58  ;;  %v1522_v6 = vand.u32 4294901760, %v1521_v57  ;;  %v5638_v15 = vand.u32 4294901760, %v1366_v63  ;;  %v1532_v10 = vsub.f32 %v5582_v46, %v8256_v59 }
  0x2a   :  { %238 = vmatmul.mubr.f32.gmra.mrb[10].mxu1 %v237_v54  ;;  %8472 = vst [vmem:[#allocation28_spill] sm:$0xff] %v5631_v47  ;;  %8473 = vst [vmem:[#allocation29_spill] sm:$0xff] %v5633_v60  ;;  %v5645_v32 = vsub.f32 %v1363_v30, %v5625_v58  ;;  %v1369_v13 = vsel %vm60_vm0, %v31_v43, 0  ;;  %v5653_v57 = vsub.f32 %v92_v44, %v5633_v60  ;;  %v8478_v59 = vand.u32 4294901760, %v5591_v40  ;;  %v32_v43 = vld [vmem:[%s8217_s0 + $0x60] sm:$0xff] }
  0x2b   :  { %243 = vmatprep.mubr.f32.mxu1 %v8277_v3  ;;  %8474 = vst [vmem:[#allocation30_spill] sm:$0xff] %v5638_v15  ;;  %v259_v8 = vand.u32 4294901760, %v258_v48  ;;  %v5666_v46 = vsub.f32 %v1366_v63, %v5638_v15  ;;  %v5668_v44 = vand.u32 4294901760, %v1369_v13  ;;  %v1533_v48 = vand.u32 4294901760, %v1532_v10  ;;  %v54_v63 = vld [vmem:[%s8216_s1 + $0x70] sm:$0xff] }
  0x2c   :  { %1512 = vmatmul.mubr.f32.gmra.mrb[10].mxu0 %v1511_v11  ;;  %8475 = vst [vmem:[#allocation31_spill] sm:$0xff] %v5645_v32  ;;  %8476 = vst [vmem:[#allocation32_spill] sm:$0xff] %v5653_v57  ;;  %v5655_v11 = vand.u32 4294901760, %v95_v49  ;;  %v269_v30 = vsub.f32 %v5591_v40, %v8478_v59  ;;  %v8480_v0 = vand.u32 4294901760, %v5616_v12  ;;  %v53_v40 = vld [vmem:[%s8216_s1 + $0x68] sm:$0xff]  ;;  %v8489_v51 = vmov 0.0  }
  0x2d   :  { %1517 = vmatprep.mubr.f32.mxu0 %v8277_v3  ;;  %8479 = vst [vmem:[#allocation34_spill] sm:$0xff] %v5668_v44 }
  0x2e   :  { %8477 = vst [vmem:[#allocation33_spill] sm:$0xff] %v5655_v11  ;;  %249 = vmatmul.mubr.f32.gmra.mrb[12].mxu1 %v248_v45  ;;  %v98_v45 = vsel %vm60_vm0, %v52_v42, 0  ;;  %v1543_v59 = vsub.f32 %v5616_v12, %v8480_v0  ;;  %v5681_v62 = vsub.f32 %v95_v49, %v5655_v11  ;;  %v270_v10 = vand.u32 4294901760, %v269_v30  ;;  %v33_v12 = vld [vmem:[%s8217_s0 + $0x68] sm:$0xff]  ;;  %v55_v30 = vld [vmem:[%s8216_s1 + $0x78] sm:$0xff] }
  0x2f   :  { %254 = vmatprep.mubr.f32.mxu1 %v8277_v3  ;;  %v8482_v42 = vand.u32 4294901760, %v5631_v47  ;;  %v5687_v54 = vand.u32 4294901760, %v98_v45  ;;  %v5695_v49 = vsub.f32 %v1369_v13, %v5668_v44 }
  0x30   :  { %1523 = vmatmul.mubr.f32.gmra.mrb[12].mxu0 %v1522_v6  ;;  %8481 = vst [vmem:[#allocation35_spill] sm:$0xff] %v5681_v62  ;;  %v1372_v6 = vsel %vm60_vm0, %v32_v43, 0  ;;  %v1544_v43 = vand.u32 4294901760, %v1543_v59  ;;  %v35_v59 = vld [vmem:[%s8217_s0 + $0x78] sm:$0xff]  ;;  %v8492_v23 = vand.u32 4294901760, %v5681_v62 }
  0x31   :  { %1528 = vmatprep.mubr.f32.mxu0 %v8277_v3  ;;  %v280_v0 = vsub.f32 %v5631_v47, %v8482_v42  ;;  %8483 = vst [vmem:[#allocation36_spill] sm:$0xff] %v5687_v54  ;;  %8484 = vst [vmem:[#allocation37_spill] sm:$0xff] %v5695_v49  ;;  %v8485_v42 = vand.u32 4294901760, %v5645_v32  ;;  %v5704_v55 = vand.u32 4294901760, %v1372_v6  ;;  %v1381_v41 = vsel %vm60_vm0, %v35_v59, 0 }
  0x32   :  { %260 = vmatmul.mubr.f32.gmra.mrb[14].mxu1 %v259_v8  ;;  %v101_v8 = vsel %vm60_vm0, %v53_v40, 0  ;;  %v8487_v40 = vand.u32 4294901760, %v5653_v57  ;;  %v8494_v59 = vand.u32 4294901760, %v5695_v49 }
  0x33   :  { %265 = vmatprep.mubr.f32.mxu1 %v8277_v3  ;;  %v1554_v47 = vsub.f32 %v5645_v32, %v8485_v42  ;;  %8486 = vst [vmem:[#allocation38_spill] sm:$0xff] %v5704_v55  ;;  %v281_v42 = vand.u32 4294901760, %v280_v0  ;;  %v5719_v32 = vsub.f32 %v98_v45, %v5687_v54  ;;  %v5721_v50 = vand.u32 4294901760, %v101_v8 }
  0x34   :  { %1534 = vmatmul.mubr.f32.gmra.mrb[14].mxu0 %v1533_v48  ;;  %v291_v13 = vsub.f32 %v5653_v57, %v8487_v40  ;;  %v1375_v48 = vsel %vm60_vm0, %v33_v12, 0  ;;  %v107_v40 = vsel %vm60_vm0, %v55_v30, 0  ;;  %v8490_v12 = vand.u32 4294901760, %v5666_v46 }
  0x35   :  { %1539 = vmatprep.mubr.f32.mxu0 %v8277_v3  ;;  %8488 = vst [vmem:[#allocation39_spill] sm:$0xff] %v5721_v50  ;;  %v34_v3 = vld [vmem:[%s8217_s0 + $0x70] sm:$0xff]  ;;  %v104_v0 = vsel %vm60_vm0, %v54_v63, 0  ;;  %v1555_v45 = vand.u32 4294901760, %v1554_v47  ;;  %v5734_v20 = vsub.f32 %v1372_v6, %v5704_v55  ;;  %v5736_v33 = vand.u32 4294901760, %v1375_v48 }
  0x36   :  { %271 = vmatmul.mubr.f32.gmra.mrb[16].mxu1 %v270_v10  ;;  %v1565_v57 = vsub.f32 %v5666_v46, %v8490_v12  ;;  %v292_v30 = vand.u32 4294901760, %v291_v13  ;;  %v302_v12 = vsub.f32 %v5681_v62, %v8492_v23  ;;  %v1378_v10 = vsel %vm60_vm0, %v34_v3, 0 }
  0x37   :  { %276 = vmatprep.mubr.f32.mxu1 %v8489_v51  ;;  %8491 = vst [vmem:[#allocation40_spill] sm:$0xff] %v5736_v33  ;;  %v5746_v47 = vsub.f32 %v101_v8, %v5721_v50  ;;  %v5748_v6 = vand.u32 4294901760, %v104_v0  ;;  %v1576_v23 = vsub.f32 %v5695_v49, %v8494_v59  ;;  %v4711_v3 = vpack.c.bf16 %v5327_v22, %v5320_v19 }
  0x38   :  { %1545 = vmatmul.mubr.f32.gmra.mrb[16].mxu0 %v1544_v43  ;;  %v4687_v43 = vpack.c.bf16 %v5318_v18, %v5316_v17  ;;  %v1566_v13 = vand.u32 4294901760, %v1565_v57  ;;  %v5760_v8 = vsub.f32 %v1375_v48, %v5736_v33  ;;  %v5762_v63 = vand.u32 4294901760, %v1378_v10 }
  0x39   :  { %1550 = vmatprep.mubr.f32.mxu0 %v8489_v51  ;;  %8493 = vst [vmem:[#allocation41_spill] sm:$0xff] %v5748_v6  ;;  %v4689_v62 = vpack.c.bf16 %v5334_v25, %v5331_v24  ;;  %v303_v57 = vand.u32 4294901760, %v302_v12  ;;  %4712 = vmatprep.subr.bf16.mxu0 %v4711_v3  ;;  %v4713_v59 = vpack.c.bf16 %v5348_v35, %v5346_v34  ;;  %v8296_v48 = vand.u32 4294901760, %v5746_v47 }
  0x3a   :  { %282 = vmatmul.mubr.f32.gmra.mrb[18].mxu1 %v281_v42  ;;  %8495 = vst [vmem:[#allocation42_spill] sm:$0xff] %v5762_v63  ;;  %4688 = vmatprep.subr.bf16.mxu1 %v4687_v43  ;;  %v5774_v49 = vsub.f32 %v104_v0, %v5748_v6  ;;  %v5776_v43 = vand.u32 4294901760, %v107_v40  ;;  %v1577_v25 = vand.u32 4294901760, %v1576_v23  ;;  %v8498_v12 = vand.u32 4294901760, %v5734_v20 }
  0x3b   :  { %287 = vmatprep.mubr.f32.mxu1 %v8489_v51  ;;  %v5784_v35 = vsub.f32 %v1378_v10, %v5762_v63  ;;  %v324_v23 = vsub.f32 %v5746_v47, %v8296_v48 }
  0x3c   :  { %1556 = vmatmul.mubr.f32.gmra.mrb[18].mxu0 %v1555_v45  ;;  %v8496_v45 = vand.u32 4294901760, %v5719_v32  ;;  %8497 = vst [vmem:[#allocation43_spill] sm:$0xff] %v5776_v43  ;;  %v1587_v3 = vsub.f32 %v5734_v20, %v8498_v12  ;;  %v5794_v34 = vsub.f32 %v107_v40, %v5776_v43 }
  0x3d   :  { %1561 = vmatprep.mubr.f32.mxu0 %v8489_v51  ;;  %v325_v48 = vand.u32 4294901760, %v324_v23 }
  0x3e   :  { %293 = vmatmul.mubr.f32.gmra.mrb[20].mxu1 %v292_v30  ;;  %v313_v42 = vsub.f32 %v5719_v32, %v8496_v45  ;;  %v8297_v30 = vand.u32 4294901760, %v5760_v8  ;;  %v5786_v45 = vand.u32 4294901760, %v1381_v41  ;;  %v1588_v10 = vand.u32 4294901760, %v1587_v3 }
  0x3f   :  { %298 = vmatprep.mubr.f32.mxu1 %v8489_v51 }
  0x40   :  { %1567 = vmatmul.mubr.f32.gmra.mrb[20].mxu0 %v1566_v13  ;;  %8499 = vst [vmem:[#allocation44_spill] sm:$0xff] %v5786_v45  ;;  %v314_v0 = vand.u32 4294901760, %v313_v42  ;;  %v8298_v13 = vand.u32 4294901760, %v5774_v49  ;;  %v1598_v12 = vsub.f32 %v5760_v8, %v8297_v30  ;;  %v5802_v42 = vsub.f32 %v1381_v41, %v5786_v45 }
  0x41   :  { %1572 = vmatprep.mubr.f32.mxu0 %v8489_v51 }
  0x42   :  { %304 = vmatmul.mubr.f32.gmra.mrb[22].mxu1 %v303_v57  ;;  %v8301_v57 = vand.u32 4294901760, %v5784_v35  ;;  %v335_v40 = vsub.f32 %v5774_v49, %v8298_v13  ;;  %v1599_v3 = vand.u32 4294901760, %v1598_v12  ;;  %v8299_v41 = vand.u32 4294901760, %v5802_v42 }
  0x43   :  { %309 = vmatprep.mubr.f32.mxu1 %v8489_v51 }
  0x44   :  { %1578 = vmatmul.mubr.f32.gmra.mrb[22].mxu0 %v1577_v25  ;;  %v8300_v25 = vand.u32 4294901760, %v5794_v34  ;;  %v1609_v30 = vsub.f32 %v5784_v35, %v8301_v57  ;;  %v8521_v57 = vld [vmem:[#allocation23_spill] sm:$0xff] }
  0x45   :  { %1583 = vmatprep.mubr.f32.mxu0 %v8489_v51 }
  0x46   :  { %315 = vmatmul.mubr.f32.gmra.mrb[24].mxu1 %v314_v0  ;;  %v336_v0 = vand.u32 4294901760, %v335_v40  ;;  %v346_v23 = vsub.f32 %v5794_v34, %v8300_v25  ;;  %v1610_v13 = vand.u32 4294901760, %v1609_v30  ;;  %v8503_v40 = vand.u32 4294901760, %v5327_v22  ;;  %v8509_v22 = vld [vmem:[#allocation10_spill] sm:$0xff] }
  0x47   :  { %320 = vmatprep.mubr.f32.mxu1 %v8489_v51  ;;  %v8520_v25 = vld [vmem:[#allocation22_spill] sm:$0xff] }
  0x48   :  { %1589 = vmatmul.mubr.f32.gmra.mrb[24].mxu0 %v1588_v10  ;;  %v1620_v10 = vsub.f32 %v5802_v42, %v8299_v41  ;;  %v347_v12 = vand.u32 4294901760, %v346_v23  ;;  %v8505_v23 = vld [vmem:[#allocation7_spill] sm:$0xff]  ;;  %v8519_v41 = vld [vmem:[#allocation20_spill] sm:$0xff] }
  0x49   :  { %1594 = vmatprep.mubr.f32.mxu0 %v8489_v51 }
  0x4a   :  { %326 = vmatmul.mubr.f32.gmra.mrb[26].mxu1 %v325_v48  ;;  %v1621_v48 = vand.u32 4294901760, %v1620_v10  ;;  %v8510_v10 = vld [vmem:[#allocation11_spill] sm:$0xff] }
  0x4b   :  { %331 = vmatprep.mubr.f32.mxu1 %v8489_v51 }
  0x4c   :  { %1600 = vmatmul.mubr.f32.gmra.mrb[26].mxu0 %v1599_v3 }
  0x4d   :  { %1605 = vmatprep.mubr.f32.mxu0 %v8489_v51 }
  0x4e   :  { %337 = vmatmul.mubr.f32.gmra.mrb[28].mxu1 %v336_v0  ;;  %v8504_v0 = vld [vmem:[#allocation2_spill] sm:$0xff] }
  0x4f   :  { %342 = vmatprep.mubr.f32.mxu1 %v8489_v51 }
  0x50   :  { %1611 = vmatmul.mubr.f32.gmra.mrb[28].mxu0 %v1610_v13  ;;  %v8502_v13 = vand.u32 4294901760, %v5320_v19  ;;  %v8508_v19 = vld [vmem:[#allocation9_spill] sm:$0xff] }
  0x51   :  { %1616 = vmatprep.mubr.f32.mxu0 %v8489_v51 }
  0x52   :  { %348 = vmatmul.mubr.f32.gmra.mrb[30].mxu1 %v347_v12  ;;  %v4719_v3 = vpack.c.bf16 %v8503_v40, %v8502_v13  ;;  %v8511_v12 = vld [vmem:[#allocation12_spill] sm:$0xff]  ;;  %v8516_v13 = vld [vmem:[#allocation17_spill] sm:$0xff]  ;;  %v8517_v40 = vld [vmem:[#allocation18_spill] sm:$0xff] }
  0x53   :  { %438 = vmatprep.mubr.f32.mxu1 %v8489_v51 }
  0x54   :  { %1622 = vmatmul.mubr.f32.gmra.mrb[30].mxu0 %v1621_v48  ;;  %v8512_v48 = vld [vmem:[#allocation13_spill] sm:$0xff] }
  0x55   :  { %1712 = vmatprep.mubr.f32.mxu0 %v8489_v51 }
  0x56   :  { %440 = vmatmul.mubr.f32.vlgmr.msra.gmra.mrb[0].mxu1 %v5339_v29 }
  0x57   :  { %4690 = vmatpush1.bf16.msra.mxu1 %v4689_v62  ;;  %445 = vmatprep.mubr.f32.mxu1 %v8489_v51  ;;  %v8500_v62 = vand.u32 4294901760, %v5316_v17  ;;  %v8506_v17 = vld [vmem:[#allocation4_spill] sm:$0xff] }
  0x58   :  { %1714 = vmatmul.mubr.f32.vlgmr.msra.gmra.mrb[0].mxu0 %v5350_v36  ;;  %4692 = vmatprep.subr.bf16.mxu1 %v5314_v16 }
  0x59   :  { %4714 = vmatpush1.bf16.msra.mxu0 %v4713_v59  ;;  %1719 = vmatprep.mubr.f32.mxu0 %v8489_v51  ;;  %v8501_v59 = vand.u32 4294901760, %v5318_v18  ;;  %v8507_v18 = vld [vmem:[#allocation8_spill] sm:$0xff] }
  0x5a   :  { %447 = vmatmul.mubr.f32.gmra.mrb[2].mxu1 %v5407_v9  ;;  %4716 = vmatprep.subr.bf16.mxu0 %v5325_v21 }
  0x5b   :  { %452 = vmatprep.mubr.f32.mxu1 %v8489_v51  ;;  %v4695_v30 = vpack.c.bf16 %v8501_v59, %v8500_v62  ;;  %v8513_v62 = vld [vmem:[#allocation14_spill] sm:$0xff]  ;;  %v8514_v59 = vld [vmem:[#allocation15_spill] sm:$0xff] }
  0x5c   :  { %1721 = vmatmul.mubr.f32.gmra.mrb[2].mxu0 %v5423_v26 }
  0x5d   :  { %1726 = vmatprep.mubr.f32.mxu0 %v8489_v51 }
  0x5e   :  { %454 = vmatmul.mubr.f32.gmra.mrb[4].mxu1 %v5425_v27 }
  0x5f   :  { %459 = vmatprep.mubr.f32.mxu1 %v8489_v51 }
  0x60   :  { %1728 = vmatmul.mubr.f32.gmra.mrb[4].mxu0 %v5432_v39 }
  0x61   :  { %1733 = vmatprep.mubr.f32.mxu0 %v8489_v51 }
  0x62   :  { %461 = vmatmul.mubr.f32.gmra.mrb[6].mxu1 %v5444_v52 }
  0x63   :  { %466 = vmatprep.mubr.f32.mxu1 %v8489_v51 }
  0x64   :  { %1735 = vmatmul.mubr.f32.gmra.mrb[6].mxu0 %v5452_v56 }
  0x65   :  { %1740 = vmatprep.mubr.f32.mxu0 %v8489_v51 }
  0x66   :  { %468 = vmatmul.mubr.f32.gmra.mrb[8].mxu1 %v5467_v1 }
  0x67   :  { %473 = vmatprep.mubr.f32.mxu1 %v8489_v51 }
  0x68   :  { %1742 = vmatmul.mubr.f32.gmra.mrb[8].mxu0 %v5487_v14 }
  0x69   :  { %1747 = vmatprep.mubr.f32.mxu0 %v8489_v51 }
  0x6a   :  { %475 = vmatmul.mubr.f32.gmra.mrb[10].mxu1 %v5513_v7 }
  0x6b   :  { %480 = vmatprep.mubr.f32.mxu1 %v8489_v51 }
  0x6c   :  { %1749 = vmatmul.mubr.f32.gmra.mrb[10].mxu0 %v5522_v61 }
  0x6d   :  { %1754 = vmatprep.mubr.f32.mxu0 %v8489_v51 }
  0x6e   :  { %482 = vmatmul.mubr.f32.gmra.mrb[12].mxu1 %v5530_v28 }
  0x6f   :  { %487 = vmatprep.mubr.f32.mxu1 %v8489_v51 }
  0x70   :  { %1756 = vmatmul.mubr.f32.gmra.mrb[12].mxu0 %v5541_v38 }
  0x71   :  { %1761 = vmatprep.mubr.f32.mxu0 %v8489_v51 }
  0x72   :  { %489 = vmatmul.mubr.f32.gmra.mrb[14].mxu1 %v5550_v53 }
  0x73   :  { %494 = vmatprep.mubr.f32.mxu1 %v8489_v51 }
  0x74   :  { %1763 = vmatmul.mubr.f32.gmra.mrb[14].mxu0 %v5558_v2 }
  0x75   :  { %1768 = vmatprep.mubr.f32.mxu0 %v8489_v51 }
  0x76   :  { %496 = vmatmul.mubr.f32.gmra.mrb[16].mxu1 %v5576_v4  ;;  %v8535_v4 = vand.u32 4294901760, %v5353_v37 }
  0x77   :  { %501 = vmatprep.mubr.f32.mxu1 %v8489_v51 }
  0x78   :  { %1770 = vmatmul.mubr.f32.gmra.mrb[16].mxu0 %v5599_v5 }
  0x79   :  { %1775 = vmatprep.mubr.f32.mxu0 %v8489_v51 }
  0x7a   :  { %503 = vmatmul.mubr.f32.gmra.mrb[18].mxu1 %v5606_v31 }
  0x7b   :  { %508 = vmatprep.mubr.f32.mxu1 %v8489_v51 }
  0x7c   :  { %1777 = vmatmul.mubr.f32.gmra.mrb[18].mxu0 %v5625_v58  ;;  %v8533_v58 = vld [vmem:[#allocation6_spill] sm:$0xff] }
  0x7d   :  { %1782 = vmatprep.mubr.f32.mxu0 %v8489_v51  ;;  %v8534_v31 = vand.u32 4294901760, %v8533_v58  ;;  %v8541_v58 = vand.u32 4294901760, %v8511_v12 }
  0x7e   :  { %510 = vmatmul.mubr.f32.gmra.mrb[20].mxu1 %v5633_v60 }
  0x7f   :  { %515 = vmatprep.mubr.f32.mxu1 %v8489_v51 }
  0x80   :  { %1784 = vmatmul.mubr.f32.gmra.mrb[20].mxu0 %v5638_v15  ;;  %v8531_v15 = vld [vmem:[#allocation5_spill] sm:$0xff] }
  0x81   :  { %1789 = vmatprep.mubr.f32.mxu0 %v8489_v51  ;;  %v8532_v60 = vand.u32 4294901760, %v8531_v15  ;;  %v8543_v15 = vand.u32 4294901760, %v8513_v62 }
  0x82   :  { %517 = vmatmul.mubr.f32.gmra.mrb[22].mxu1 %v5655_v11 }
  0x83   :  { %522 = vmatprep.mubr.f32.mxu1 %v8489_v51  ;;  %v4721_v5 = vpack.c.bf16 %v8534_v31, %v8532_v60  ;;  %v8538_v31 = vand.u32 4294901760, %v8508_v19  ;;  %v8546_v60 = vand.u32 4294901760, %v8516_v13 }
  0x84   :  { %1791 = vmatmul.mubr.f32.gmra.mrb[22].mxu0 %v5668_v44 }
  0x85   :  { %1796 = vmatprep.mubr.f32.mxu0 %v8489_v51 }
  0x86   :  { %524 = vmatmul.mubr.f32.gmra.mrb[24].mxu1 %v5687_v54  ;;  %v8529_v54 = vld [vmem:[#allocation3_spill] sm:$0xff] }
  0x87   :  { %529 = vmatprep.mubr.f32.mxu1 %v8489_v51  ;;  %v8530_v44 = vand.u32 4294901760, %v8529_v54  ;;  %v8547_v54 = vand.u32 4294901760, %v8517_v40 }
  0x88   :  { %1798 = vmatmul.mubr.f32.gmra.mrb[24].mxu0 %v5704_v55  ;;  %v8528_v55 = vand.u32 4294901760, %v5331_v24  ;;  %v8536_v24 = vand.u32 4294901760, %v8505_v23 }
  0x89   :  { %1803 = vmatprep.mubr.f32.mxu0 %v8489_v51 }
  0x8a   :  { %531 = vmatmul.mubr.f32.gmra.mrb[26].mxu1 %v5721_v50  ;;  %v8527_v50 = vld [vmem:[#allocation37_spill] sm:$0xff]  ;;  %v4697_v11 = vpack.c.bf16 %v8530_v44, %v8528_v55  ;;  %v8537_v55 = vand.u32 4294901760, %v8507_v18  ;;  %v8549_v44 = vand.u32 4294901760, %v8519_v41 }
  0x8b   :  { %536 = vmatprep.mubr.f32.mxu1 %v8489_v51 }
  0x8c   :  { %1805 = vmatmul.mubr.f32.gmra.mrb[26].mxu0 %v5736_v33  ;;  %v8526_v33 = vld [vmem:[#allocation35_spill] sm:$0xff] }
  0x8d   :  { %1810 = vmatprep.mubr.f32.mxu0 %v8489_v51 }
  0x8e   :  { %538 = vmatmul.mubr.f32.gmra.mrb[28].mxu1 %v5748_v6  ;;  %v8525_v6 = vld [vmem:[#allocation32_spill] sm:$0xff] }
  0x8f   :  { %543 = vmatprep.mubr.f32.mxu1 %v8489_v51 }
  0x90   :  { %1812 = vmatmul.mubr.f32.gmra.mrb[28].mxu0 %v5762_v63  ;;  %v8524_v63 = vld [vmem:[#allocation31_spill] sm:$0xff] }
  0x91   :  { %1817 = vmatprep.mubr.f32.mxu0 %v8489_v51 }
  0x92   :  { %545 = vmatmul.mubr.f32.gmra.mrb[30].mxu1 %v5776_v43  ;;  %v8523_v43 = vld [vmem:[#allocation28_spill] sm:$0xff] }
  0x93   :  { %623 = vmatprep.mubr.f32.mxu1 %v8489_v51 }
  0x94   :  { %1819 = vmatmul.mubr.f32.gmra.mrb[30].mxu0 %v5786_v45  ;;  %v8522_v45 = vld [vmem:[#allocation26_spill] sm:$0xff] }
  0x95   :  { %1897 = vmatprep.mubr.f32.mxu0 %v8489_v51 }
  0x96   :  { %626 = vmatmul.mubr.f32.vlgmr.msra.gmra.mrb[0].mxu1 %v5353_v37  ;;  %v8539_v37 = vand.u32 4294901760, %v8509_v22 }
  0x97   :  { %4694 = vmatpush1.bf16.msra.mxu1 %v8504_v0  ;;  %631 = vmatprep.mubr.f32.mxu1 %v8489_v51 }
  0x98   :  { %1900 = vmatmul.mubr.f32.vlgmr.msra.gmra.mrb[0].mxu0 %v8505_v23  ;;  %4696 = vmatprep.subr.bf16.mxu1 %v4695_v30  ;;  %v8515_v30 = vld [vmem:[#allocation16_spill] sm:$0xff]  ;;  %v8550_v23 = vand.u32 4294901760, %v8520_v25 }
  0x99   :  { %4718 = vmatpush1.bf16.msra.mxu0 %v8506_v17  ;;  %1905 = vmatprep.mubr.f32.mxu0 %v8489_v51 }
  0x9a   :  { %634 = vmatmul.mubr.f32.gmra.mrb[2].mxu1 %v8507_v18  ;;  %4720 = vmatprep.subr.bf16.mxu0 %v4719_v3  ;;  %v8518_v3 = vld [vmem:[#allocation19_spill] sm:$0xff]  ;;  %v8551_v18 = vand.u32 4294901760, %v8521_v57 }
  0x9b   :  { %639 = vmatprep.mubr.f32.mxu1 %v8489_v51 }
  0x9c   :  { %1908 = vmatmul.mubr.f32.gmra.mrb[2].mxu0 %v8508_v19  ;;  %v8552_v19 = vand.u32 4294901760, %v8522_v45 }
  0x9d   :  { %1913 = vmatprep.mubr.f32.mxu0 %v8489_v51 }
  0x9e   :  { %642 = vmatmul.mubr.f32.gmra.mrb[4].mxu1 %v8509_v22  ;;  %v8573_v22 = vld [vmem:[#allocation33_spill] sm:$0xff] }
  0x9f   :  { %647 = vmatprep.mubr.f32.mxu1 %v8489_v51 }
  0xa0   :  { %1916 = vmatmul.mubr.f32.gmra.mrb[4].mxu0 %v8510_v10 }
  0xa1   :  { %1921 = vmatprep.mubr.f32.mxu0 %v8489_v51 }
  0xa2   :  { %650 = vmatmul.mubr.f32.gmra.mrb[6].mxu1 %v8511_v12  ;;  %v8575_v12 = vld [vmem:[#allocation36_spill] sm:$0xff] }
  0xa3   :  { %655 = vmatprep.mubr.f32.mxu1 %v8489_v51 }
  0xa4   :  { %1924 = vmatmul.mubr.f32.gmra.mrb[6].mxu0 %v8512_v48 }
  0xa5   :  { %1929 = vmatprep.mubr.f32.mxu0 %v8489_v51 }
  0xa6   :  { %658 = vmatmul.mubr.f32.gmra.mrb[8].mxu1 %v8513_v62  ;;  %v8577_v62 = vld [vmem:[#allocation39_spill] sm:$0xff] }
  0xa7   :  { %663 = vmatprep.mubr.f32.mxu1 %v8489_v51 }
  0xa8   :  { %1932 = vmatmul.mubr.f32.gmra.mrb[8].mxu0 %v8514_v59 }
  0xa9   :  { %1937 = vmatprep.mubr.f32.mxu0 %v8489_v51 }
  0xaa   :  { %666 = vmatmul.mubr.f32.gmra.mrb[10].mxu1 %v8515_v30 }
  0xab   :  { %671 = vmatprep.mubr.f32.mxu1 %v8489_v51 }
  0xac   :  { %1940 = vmatmul.mubr.f32.gmra.mrb[10].mxu0 %v8516_v13  ;;  %v8580_v13 = vld [vmem:[#allocation42_spill] sm:$0xff] }
  0xad   :  { %1945 = vmatprep.mubr.f32.mxu0 %v8489_v51 }
  0xae   :  { %674 = vmatmul.mubr.f32.gmra.mrb[12].mxu1 %v8517_v40  ;;  %v8581_v40 = vld [vmem:[#allocation43_spill] sm:$0xff] }
  0xaf   :  { %679 = vmatprep.mubr.f32.mxu1 %v8489_v51 }
  0xb0   :  { %1948 = vmatmul.mubr.f32.gmra.mrb[12].mxu0 %v8518_v3 }
  0xb1   :  { %1953 = vmatprep.mubr.f32.mxu0 %v8489_v51 }
  0xb2   :  { %682 = vmatmul.mubr.f32.gmra.mrb[14].mxu1 %v8519_v41  ;;  %v8553_v41 = vand.u32 4294901760, %v8523_v43 }
  0xb3   :  { %687 = vmatprep.mubr.f32.mxu1 %v8489_v51 }
  0xb4   :  { %1956 = vmatmul.mubr.f32.gmra.mrb[14].mxu0 %v8520_v25  ;;  %v8554_v25 = vand.u32 4294901760, %v8524_v63 }
  0xb5   :  { %1961 = vmatprep.mubr.f32.mxu0 %v8489_v51 }
  0xb6   :  { %690 = vmatmul.mubr.f32.gmra.mrb[16].mxu1 %v8521_v57  ;;  %v8555_v57 = vand.u32 4294901760, %v8525_v6 }
  0xb7   :  { %695 = vmatprep.mubr.f32.mxu1 %v8489_v51 }
  0xb8   :  { %1964 = vmatmul.mubr.f32.gmra.mrb[16].mxu0 %v8522_v45  ;;  %v8556_v45 = vand.u32 4294901760, %v5666_v46 }
  0xb9   :  { %1969 = vmatprep.mubr.f32.mxu0 %v8489_v51 }
  0xba   :  { %698 = vmatmul.mubr.f32.gmra.mrb[18].mxu1 %v8523_v43  ;;  %v8557_v43 = vand.u32 4294901760, %v8526_v33 }
  0xbb   :  { %703 = vmatprep.mubr.f32.mxu1 %v8489_v51 }
  0xbc   :  { %1972 = vmatmul.mubr.f32.gmra.mrb[18].mxu0 %v8524_v63  ;;  %v8558_v63 = vand.u32 4294901760, %v8527_v50 }
  0xbd   :  { %1977 = vmatprep.mubr.f32.mxu0 %v8489_v51 }
  0xbe   :  { %706 = vmatmul.mubr.f32.gmra.mrb[20].mxu1 %v8525_v6  ;;  %v8559_v6 = vand.u32 4294901760, %v5719_v32 }
  0xbf   :  { %711 = vmatprep.mubr.f32.mxu1 %v8489_v51 }
  0xc0   :  { %1980 = vmatmul.mubr.f32.gmra.mrb[20].mxu0 %v5666_v46  ;;  %v8560_v46 = vand.u32 4294901760, %v5734_v20 }
  0xc1   :  { %1985 = vmatprep.mubr.f32.mxu0 %v8489_v51 }
  0xc2   :  { %714 = vmatmul.mubr.f32.gmra.mrb[22].mxu1 %v8526_v33  ;;  %v8561_v33 = vand.u32 4294901760, %v5746_v47 }
  0xc3   :  { %719 = vmatprep.mubr.f32.mxu1 %v8489_v51 }
  0xc4   :  { %1988 = vmatmul.mubr.f32.gmra.mrb[22].mxu0 %v8527_v50  ;;  %v8562_v50 = vand.u32 4294901760, %v5760_v8 }
  0xc5   :  { %1993 = vmatprep.mubr.f32.mxu0 %v8489_v51 }
  0xc6   :  { %722 = vmatmul.mubr.f32.gmra.mrb[24].mxu1 %v5719_v32  ;;  %v8563_v32 = vand.u32 4294901760, %v5774_v49 }
  0xc7   :  { %727 = vmatprep.mubr.f32.mxu1 %v8489_v51 }
  0xc8   :  { %1996 = vmatmul.mubr.f32.gmra.mrb[24].mxu0 %v5734_v20  ;;  %v8564_v20 = vand.u32 4294901760, %v5784_v35 }
  0xc9   :  { %2001 = vmatprep.mubr.f32.mxu0 %v8489_v51 }
  0xca   :  { %730 = vmatmul.mubr.f32.gmra.mrb[26].mxu1 %v5746_v47  ;;  %v8565_v47 = vand.u32 4294901760, %v5794_v34 }
  0xcb   :  { %735 = vmatprep.mubr.f32.mxu1 %v8489_v51 }
  0xcc   :  { %2004 = vmatmul.mubr.f32.gmra.mrb[26].mxu0 %v5760_v8  ;;  %v8566_v8 = vand.u32 4294901760, %v5802_v42 }
  0xcd   :  { %2009 = vmatprep.mubr.f32.mxu0 %v8489_v51 }
  0xce   :  { %738 = vmatmul.mubr.f32.gmra.mrb[28].mxu1 %v5774_v49  ;;  %v8569_v49 = vld [vmem:[#allocation25_spill] sm:$0xff] }
  0xcf   :  { %743 = vmatprep.mubr.f32.mxu1 %v8489_v51 }
  0xd0   :  { %2012 = vmatmul.mubr.f32.gmra.mrb[28].mxu0 %v5784_v35  ;;  %v8568_v35 = vld [vmem:[#allocation24_spill] sm:$0xff] }
  0xd1   :  { %2017 = vmatprep.mubr.f32.mxu0 %v8489_v51 }
  0xd2   :  { %746 = vmatmul.mubr.f32.gmra.mrb[30].mxu1 %v5794_v34  ;;  %v8567_v34 = vld [vmem:[#allocation21_spill] sm:$0xff] }
  0xd3   :  { %820 = vmatprep.mubr.f32.mxu1 %v8489_v51 }
  0xd4   :  { %2020 = vmatmul.mubr.f32.gmra.mrb[30].mxu0 %v5802_v42  ;;  %v8570_v42 = vld [vmem:[#allocation27_spill] sm:$0xff] }
  0xd5   :  { %2094 = vmatprep.mubr.f32.mxu0 %v8489_v51 }
  0xd6   :  { %824 = vmatmul.mubr.f32.vlgmr.msra.gmra.mrb[0].mxu1 %v8535_v4  ;;  %v8544_v4 = vand.u32 4294901760, %v8514_v59  ;;  %v8578_v59 = vld [vmem:[#allocation40_spill] sm:$0xff] }
  0xd7   :  { %4698 = vmatpush1.bf16.msra.mxu1 %v4697_v11  ;;  %829 = vmatprep.mubr.f32.mxu1 %v8489_v51  ;;  %v8548_v11 = vand.u32 4294901760, %v8518_v3  ;;  %v8582_v3 = vld [vmem:[#allocation44_spill] sm:$0xff] }
  0xd8   :  { %2098 = vmatmul.mubr.f32.vlgmr.msra.gmra.mrb[0].mxu0 %v8536_v24  ;;  %4700 = vmatprep.subr.bf16.mxu1 %v5314_v16  ;;  %v8540_v16 = vand.u32 4294901760, %v8510_v10  ;;  %v8574_v10 = vld [vmem:[#allocation34_spill] sm:$0xff] }
  0xd9   :  { %4722 = vmatpush1.bf16.msra.mxu0 %v4721_v5  ;;  %2103 = vmatprep.mubr.f32.mxu0 %v8489_v51  ;;  %v8545_v5 = vand.u32 4294901760, %v8515_v30  ;;  %v8579_v30 = vld [vmem:[#allocation41_spill] sm:$0xff] }
  0xda   :  { %833 = vmatmul.mubr.f32.gmra.mrb[2].mxu1 %v8537_v55  ;;  %4724 = vmatprep.subr.bf16.mxu0 %v5325_v21  ;;  %v8542_v21 = vand.u32 4294901760, %v8512_v48  ;;  %v8576_v48 = vld [vmem:[#allocation38_spill] sm:$0xff] }
  0xdb   :  { %838 = vmatprep.mubr.f32.mxu1 %v8489_v51 }
  0xdc   :  { %2107 = vmatmul.mubr.f32.gmra.mrb[2].mxu0 %v8538_v31 }
  0xdd   :  { %2112 = vmatprep.mubr.f32.mxu0 %v8489_v51 }
  0xde   :  { %842 = vmatmul.mubr.f32.gmra.mrb[4].mxu1 %v8539_v37 }
  0xdf   :  { %847 = vmatprep.mubr.f32.mxu1 %v8489_v51 }
  0xe0   :  { %2116 = vmatmul.mubr.f32.gmra.mrb[4].mxu0 %v8540_v16 }
  0xe1   :  { %2121 = vmatprep.mubr.f32.mxu0 %v8489_v51 }
  0xe2   :  { %851 = vmatmul.mubr.f32.gmra.mrb[6].mxu1 %v8541_v58 }
  0xe3   :  { %856 = vmatprep.mubr.f32.mxu1 %v8489_v51 }
  0xe4   :  { %2125 = vmatmul.mubr.f32.gmra.mrb[6].mxu0 %v8542_v21 }
  0xe5   :  { %2130 = vmatprep.mubr.f32.mxu0 %v8489_v51 }
  0xe6   :  { %860 = vmatmul.mubr.f32.gmra.mrb[8].mxu1 %v8543_v15 }
  0xe7   :  { %865 = vmatprep.mubr.f32.mxu1 %v8489_v51 }
  0xe8   :  { %2134 = vmatmul.mubr.f32.gmra.mrb[8].mxu0 %v8544_v4 }
  0xe9   :  { %2139 = vmatprep.mubr.f32.mxu0 %v8489_v51 }
  0xea   :  { %869 = vmatmul.mubr.f32.gmra.mrb[10].mxu1 %v8545_v5 }
  0xeb   :  { %874 = vmatprep.mubr.f32.mxu1 %v8489_v51 }
  0xec   :  { %2143 = vmatmul.mubr.f32.gmra.mrb[10].mxu0 %v8546_v60 }
  0xed   :  { %2148 = vmatprep.mubr.f32.mxu0 %v8489_v51 }
  0xee   :  { %878 = vmatmul.mubr.f32.gmra.mrb[12].mxu1 %v8547_v54 }
  0xef   :  { %883 = vmatprep.mubr.f32.mxu1 %v8489_v51 }
  0xf0   :  { %2152 = vmatmul.mubr.f32.gmra.mrb[12].mxu0 %v8548_v11 }
  0xf1   :  { %2157 = vmatprep.mubr.f32.mxu0 %v8489_v51 }
  0xf2   :  { %887 = vmatmul.mubr.f32.gmra.mrb[14].mxu1 %v8549_v44 }
  0xf3   :  { %892 = vmatprep.mubr.f32.mxu1 %v8489_v51 }
  0xf4   :  { %2161 = vmatmul.mubr.f32.gmra.mrb[14].mxu0 %v8550_v23 }
  0xf5   :  { %2166 = vmatprep.mubr.f32.mxu0 %v8489_v51 }
  0xf6   :  { %896 = vmatmul.mubr.f32.gmra.mrb[16].mxu1 %v8551_v18 }
  0xf7   :  { %901 = vmatprep.mubr.f32.mxu1 %v8489_v51 }
  0xf8   :  { %2170 = vmatmul.mubr.f32.gmra.mrb[16].mxu0 %v8552_v19 }
  0xf9   :  { %2175 = vmatprep.mubr.f32.mxu0 %v8489_v51 }
  0xfa   :  { %905 = vmatmul.mubr.f32.gmra.mrb[18].mxu1 %v8553_v41 }
  0xfb   :  { %910 = vmatprep.mubr.f32.mxu1 %v8489_v51 }
  0xfc   :  { %2179 = vmatmul.mubr.f32.gmra.mrb[18].mxu0 %v8554_v25 }
  0xfd   :  { %2184 = vmatprep.mubr.f32.mxu0 %v8489_v51 }
  0xfe   :  { %914 = vmatmul.mubr.f32.gmra.mrb[20].mxu1 %v8555_v57 }
  0xff   :  { %919 = vmatprep.mubr.f32.mxu1 %v8489_v51 }
 0x100   :  { %2188 = vmatmul.mubr.f32.gmra.mrb[20].mxu0 %v8556_v45 }
 0x101   :  { %2193 = vmatprep.mubr.f32.mxu0 %v8489_v51 }
 0x102   :  { %923 = vmatmul.mubr.f32.gmra.mrb[22].mxu1 %v8557_v43 }
 0x103   :  { %928 = vmatprep.mubr.f32.mxu1 %v8489_v51 }
 0x104   :  { %2197 = vmatmul.mubr.f32.gmra.mrb[22].mxu0 %v8558_v63 }
 0x105   :  { %2202 = vmatprep.mubr.f32.mxu0 %v8489_v51 }
 0x106   :  { %932 = vmatmul.mubr.f32.gmra.mrb[24].mxu1 %v8559_v6 }
 0x107   :  { %937 = vmatprep.mubr.f32.mxu1 %v8489_v51 }
 0x108   :  { %2206 = vmatmul.mubr.f32.gmra.mrb[24].mxu0 %v8560_v46 }
 0x109   :  { %2211 = vmatprep.mubr.f32.mxu0 %v8489_v51 }
 0x10a   :  { %941 = vmatmul.mubr.f32.gmra.mrb[26].mxu1 %v8561_v33 }
 0x10b   :  { %946 = vmatprep.mubr.f32.mxu1 %v8489_v51 }
 0x10c   :  { %2215 = vmatmul.mubr.f32.gmra.mrb[26].mxu0 %v8562_v50 }
 0x10d   :  { %2220 = vmatprep.mubr.f32.mxu0 %v8489_v51 }
 0x10e   :  { %950 = vmatmul.mubr.f32.gmra.mrb[28].mxu1 %v8563_v32 }
 0x10f   :  { %955 = vmatprep.mubr.f32.mxu1 %v8489_v51 }
 0x110   :  { %2224 = vmatmul.mubr.f32.gmra.mrb[28].mxu0 %v8564_v20 }
 0x111   :  { %2229 = vmatprep.mubr.f32.mxu0 %v8489_v51 }
 0x112   :  { %959 = vmatmul.mubr.f32.gmra.mrb[30].mxu1 %v8565_v47 }
 0x113   :  { %1041 = vmatprep.mubr.f32.mxu1 %v8489_v51 }
 0x114   :  { %2233 = vmatmul.mubr.f32.gmra.mrb[30].mxu0 %v8566_v8 }
 0x115   :  { %2315 = vmatprep.mubr.f32.mxu0 %v8489_v51 }
 0x116   :  { %1043 = vmatmul.mubr.f32.vlgmr.msra.gmra.mrb[0].mxu1 %v5339_v29 }
 0x117   :  { %4702 = vmatpush1.bf16.msra.mxu1 %v8504_v0  ;;  %1048 = vmatprep.mubr.f32.mxu1 %v8489_v51  ;;  %v8571_v0 = vld [vmem:[#allocation29_spill] sm:$0xff] }
 0x118   :  { %2317 = vmatmul.mubr.f32.vlgmr.msra.gmra.mrb[0].mxu0 %v5350_v36 }
 0x119   :  { %4726 = vmatpush1.bf16.msra.mxu0 %v8506_v17  ;;  %2322 = vmatprep.mubr.f32.mxu0 %v8489_v51  ;;  %v8572_v17 = vld [vmem:[#allocation30_spill] sm:$0xff] }
 0x11a   :  { %1050 = vmatmul.mubr.f32.gmra.mrb[2].mxu1 %v5407_v9 }
 0x11b   :  { %1055 = vmatprep.mubr.f32.mxu1 %v8489_v51 }
 0x11c   :  { %2324 = vmatmul.mubr.f32.gmra.mrb[2].mxu0 %v5423_v26 }
 0x11d   :  { %2329 = vmatprep.mubr.f32.mxu0 %v8489_v51 }
 0x11e   :  { %1057 = vmatmul.mubr.f32.gmra.mrb[4].mxu1 %v5425_v27 }
 0x11f   :  { %1062 = vmatprep.mubr.f32.mxu1 %v8489_v51 }
 0x120   :  { %2331 = vmatmul.mubr.f32.gmra.mrb[4].mxu0 %v5432_v39 }
 0x121   :  { %2336 = vmatprep.mubr.f32.mxu0 %v8489_v51 }
 0x122   :  { %1064 = vmatmul.mubr.f32.gmra.mrb[6].mxu1 %v5444_v52 }
 0x123   :  { %1069 = vmatprep.mubr.f32.mxu1 %v8489_v51 }
 0x124   :  { %2338 = vmatmul.mubr.f32.gmra.mrb[6].mxu0 %v5452_v56 }
 0x125   :  { %2343 = vmatprep.mubr.f32.mxu0 %v8489_v51 }
 0x126   :  { %1071 = vmatmul.mubr.f32.gmra.mrb[8].mxu1 %v5467_v1 }
 0x127   :  { %1076 = vmatprep.mubr.f32.mxu1 %v8489_v51 }
 0x128   :  { %2345 = vmatmul.mubr.f32.gmra.mrb[8].mxu0 %v5487_v14 }
 0x129   :  { %2350 = vmatprep.mubr.f32.mxu0 %v8489_v51 }
 0x12a   :  { %1078 = vmatmul.mubr.f32.gmra.mrb[10].mxu1 %v5513_v7 }
 0x12b   :  { %1083 = vmatprep.mubr.f32.mxu1 %v8489_v51 }
 0x12c   :  { %2352 = vmatmul.mubr.f32.gmra.mrb[10].mxu0 %v5522_v61 }
 0x12d   :  { %2357 = vmatprep.mubr.f32.mxu0 %v8489_v51 }
 0x12e   :  { %1085 = vmatmul.mubr.f32.gmra.mrb[12].mxu1 %v5530_v28 }
 0x12f   :  { %1090 = vmatprep.mubr.f32.mxu1 %v8489_v51 }
 0x130   :  { %2359 = vmatmul.mubr.f32.gmra.mrb[12].mxu0 %v5541_v38 }
 0x131   :  { %2364 = vmatprep.mubr.f32.mxu0 %v8489_v51 }
 0x132   :  { %1092 = vmatmul.mubr.f32.gmra.mrb[14].mxu1 %v5550_v53 }
 0x133   :  { %1097 = vmatprep.mubr.f32.mxu1 %v8489_v51 }
 0x134   :  { %2366 = vmatmul.mubr.f32.gmra.mrb[14].mxu0 %v5558_v2 }
 0x135   :  { %2371 = vmatprep.mubr.f32.mxu0 %v8489_v51 }
 0x136   :  { %1099 = vmatmul.mubr.f32.gmra.mrb[16].mxu1 %v8567_v34 }
 0x137   :  { %1104 = vmatprep.mubr.f32.mxu1 %v8489_v51 }
 0x138   :  { %2373 = vmatmul.mubr.f32.gmra.mrb[16].mxu0 %v8568_v35 }
 0x139   :  { %2378 = vmatprep.mubr.f32.mxu0 %v8489_v51 }
 0x13a   :  { %1106 = vmatmul.mubr.f32.gmra.mrb[18].mxu1 %v8569_v49 }
 0x13b   :  { %1111 = vmatprep.mubr.f32.mxu1 %v8489_v51 }
 0x13c   :  { %2380 = vmatmul.mubr.f32.gmra.mrb[18].mxu0 %v8570_v42 }
 0x13d   :  { %2385 = vmatprep.mubr.f32.mxu0 %v8489_v51 }
 0x13e   :  { %1113 = vmatmul.mubr.f32.gmra.mrb[20].mxu1 %v8571_v0 }
 0x13f   :  { %1118 = vmatprep.mubr.f32.mxu1 %v8489_v51 }
 0x140   :  { %2387 = vmatmul.mubr.f32.gmra.mrb[20].mxu0 %v8572_v17 }
 0x141   :  { %2392 = vmatprep.mubr.f32.mxu0 %v8489_v51 }
 0x142   :  { %1120 = vmatmul.mubr.f32.gmra.mrb[22].mxu1 %v8573_v22 }
 0x143   :  { %1125 = vmatprep.mubr.f32.mxu1 %v8489_v51 }
 0x144   :  { %2394 = vmatmul.mubr.f32.gmra.mrb[22].mxu0 %v8574_v10 }
 0x145   :  { %2399 = vmatprep.mubr.f32.mxu0 %v8489_v51 }
 0x146   :  { %1127 = vmatmul.mubr.f32.gmra.mrb[24].mxu1 %v8575_v12 }
 0x147   :  { %1132 = vmatprep.mubr.f32.mxu1 %v8489_v51 }
 0x148   :  { %2401 = vmatmul.mubr.f32.gmra.mrb[24].mxu0 %v8576_v48 }
 0x149   :  { %2406 = vmatprep.mubr.f32.mxu0 %v8489_v51 }
 0x14a   :  { %1134 = vmatmul.mubr.f32.gmra.mrb[26].mxu1 %v8577_v62 }
 0x14b   :  { %1139 = vmatprep.mubr.f32.mxu1 %v8489_v51 }
 0x14c   :  { %2408 = vmatmul.mubr.f32.gmra.mrb[26].mxu0 %v8578_v59 }
 0x14d   :  { %2413 = vmatprep.mubr.f32.mxu0 %v8489_v51 }
 0x14e   :  { %1141 = vmatmul.mubr.f32.gmra.mrb[28].mxu1 %v8579_v30 }
 0x14f   :  { %1146 = vmatprep.mubr.f32.mxu1 %v8489_v51 }
 0x150   :  { %2415 = vmatmul.mubr.f32.gmra.mrb[28].mxu0 %v8580_v13 }
 0x151   :  { %2420 = vmatprep.mubr.f32.mxu0 %v8489_v51 }
 0x152   :  { %1148 = vmatmul.mubr.f32.gmra.mrb[30].mxu1 %v8581_v40 }
 0x153   :  { %1222 = vmatprep.mubr.f32.mxu1 %v8489_v51 }
 0x154   :  { %2422 = vmatmul.mubr.f32.gmra.mrb[30].mxu0 %v8582_v3 }
 0x155   :  { %2496 = vmatprep.mubr.f32.mxu0 %v8489_v51 }
 0x156   :  { %1224 = vmatmul.mubr.f32.vlgmr.msra.gmra.mrb[0].mxu1 %v5339_v29  ;;  %v2611_v29 = vlaneseq }
 0x157   :  { %1229 = vmatprep.mubr.f32.mxu1 %v8489_v51 }
 0x158   :  { %2498 = vmatmul.mubr.f32.vlgmr.msra.gmra.mrb[0].mxu0 %v5350_v36  ;;  %v2612_v36 = vshrl.u32 %v2611_v29, 7 }
 0x159   :  { %2503 = vmatprep.mubr.f32.mxu0 %v8489_v51 }
 0x15a   :  { %1231 = vmatmul.mubr.f32.gmra.mrb[2].mxu1 %v5407_v9  ;;  %v2613_v9 = vsub.s32 0, %v2612_v36 }
 0x15b   :  { %1236 = vmatprep.mubr.f32.mxu1 %v8489_v51 }
 0x15c   :  { %2505 = vmatmul.mubr.f32.gmra.mrb[2].mxu0 %v5423_v26  ;;  %v2609_v26 = vld [vmem:[%s8218_s4] sm:$0x3]  ;;  %s5248_s4 = smov 64  }
 0x15d   :  { %2510 = vmatprep.mubr.f32.mxu0 %v8489_v51 }
 0x15e   :  { %1238 = vmatmul.mubr.f32.gmra.mrb[4].mxu1 %v5425_v27  ;;  %v2617_v27 = vsub.s32 1, %v2612_v36 }
 0x15f   :  { %1243 = vmatprep.mubr.f32.mxu1 %v8489_v51 }
 0x160   :  { %2512 = vmatmul.mubr.f32.gmra.mrb[4].mxu0 %v5432_v39 }
 0x161   :  { %2517 = vmatprep.mubr.f32.mxu0 %v8489_v51 }
 0x162   :  { %1245 = vmatmul.mubr.f32.gmra.mrb[6].mxu1 %v5444_v52  ;;  %v6204_v52 = vrot.slane %v2609_v26, %v2613_v9 }
 0x163   :  { %1250 = vmatprep.mubr.f32.mxu1 %v8489_v51 }
 0x164   :  { %2519 = vmatmul.mubr.f32.gmra.mrb[6].mxu0 %v5452_v56 }
 0x165   :  { %2524 = vmatprep.mubr.f32.mxu0 %v8489_v51 }
 0x166   :  { %1252 = vmatmul.mubr.f32.gmra.mrb[8].mxu1 %v5467_v1  ;;  %v6206_v1 = vrot.slane %v2609_v26, %v2617_v27 }
 0x167   :  { %1257 = vmatprep.mubr.f32.mxu1 %v8489_v51 }
 0x168   :  { %2526 = vmatmul.mubr.f32.gmra.mrb[8].mxu0 %v5487_v14 }
 0x169   :  { %2531 = vmatprep.mubr.f32.mxu0 %v8489_v51 }
 0x16a   :  { %1259 = vmatmul.mubr.f32.gmra.mrb[10].mxu1 %v5513_v7 }
 0x16b   :  { %1264 = vmatprep.mubr.f32.mxu1 %v8489_v51 }
 0x16c   :  { %2533 = vmatmul.mubr.f32.gmra.mrb[10].mxu0 %v5522_v61 }
 0x16d   :  { %2538 = vmatprep.mubr.f32.mxu0 %v8489_v51 }
 0x16e   :  { %1266 = vmatmul.mubr.f32.gmra.mrb[12].mxu1 %v5530_v28 }
 0x16f   :  { %1271 = vmatprep.mubr.f32.mxu1 %v8489_v51 }
 0x170   :  { %2540 = vmatmul.mubr.f32.gmra.mrb[12].mxu0 %v5541_v38 }
 0x171   :  { %2545 = vmatprep.mubr.f32.mxu0 %v8489_v51 }
 0x172   :  { %1273 = vmatmul.mubr.f32.gmra.mrb[14].mxu1 %v5550_v53 }
 0x173   :  { %1278 = vmatprep.mubr.f32.mxu1 %v8489_v51 }
 0x174   :  { %2547 = vmatmul.mubr.f32.gmra.mrb[14].mxu0 %v5558_v2  ;;  %v2814_v2 = vand.u32 127, %v2611_v29 }
 0x175   :  { %2552 = vmatprep.mubr.f32.mxu0 %v8489_v51 }
 0x176   :  { %1280 = vmatmul.mubr.f32.gmra.mrb[16].mxu1 %v8567_v34  ;;  %vm2815_vm1 = vcmp.ge.s32.totalorder %v2814_v2, 32  ;;  %vm2816_vm2 = vcmp.lt.s32.totalorder %v2814_v2, 64 }
 0x177   :  { %1285 = vmatprep.mubr.f32.mxu1 %v8489_v51  ;;  %vm2817_vm3 = vmand %vm2815_vm1, %vm2816_vm2 }
 0x178   :  { %2554 = vmatmul.mubr.f32.gmra.mrb[16].mxu0 %v8568_v35  ;;  %v6212_v55 = vsel %vm2817_vm3, -1.5707964, %v8489_v51 }
 0x179   :  { %2559 = vmatprep.mubr.f32.mxu0 %v8489_v51 }
 0x17a   :  { %1287 = vmatmul.mubr.f32.gmra.mrb[18].mxu1 %v8569_v49 }
 0x17b   :  { %1292 = vmatprep.mubr.f32.mxu1 %v8489_v51 }
 0x17c   :  { %2561 = vmatmul.mubr.f32.gmra.mrb[18].mxu0 %v8570_v42 }
 0x17d   :  { %2566 = vmatprep.mubr.f32.mxu0 %v8489_v51 }
 0x17e   :  { %1294 = vmatmul.mubr.f32.gmra.mrb[20].mxu1 %v8571_v0 }
 0x17f   :  { %1299 = vmatprep.mubr.f32.mxu1 %v8489_v51 }
 0x180   :  { %2568 = vmatmul.mubr.f32.gmra.mrb[20].mxu0 %v8572_v17 }
 0x181   :  { %2573 = vmatprep.mubr.f32.mxu0 %v8489_v51 }
 0x182   :  { %1301 = vmatmul.mubr.f32.gmra.mrb[22].mxu1 %v8573_v22 }
 0x183   :  { %1306 = vmatprep.mubr.f32.mxu1 %v8489_v51 }
 0x184   :  { %2575 = vmatmul.mubr.f32.gmra.mrb[22].mxu0 %v8574_v10 }
 0x185   :  { %2580 = vmatprep.mubr.f32.mxu0 %v8489_v51 }
 0x186   :  { %1308 = vmatmul.mubr.f32.gmra.mrb[24].mxu1 %v8575_v12 }
 0x187   :  { %1313 = vmatprep.mubr.f32.mxu1 %v8489_v51 }
 0x188   :  { %2582 = vmatmul.mubr.f32.gmra.mrb[24].mxu0 %v8576_v48 }
 0x189   :  { %2587 = vmatprep.mubr.f32.mxu0 %v8489_v51 }
 0x18a   :  { %1315 = vmatmul.mubr.f32.gmra.mrb[26].mxu1 %v8577_v62 }
 0x18b   :  { %1320 = vmatprep.mubr.f32.mxu1 %v8489_v51 }
 0x18c   :  { %2589 = vmatmul.mubr.f32.gmra.mrb[26].mxu0 %v8578_v59 }
 0x18d   :  { %2594 = vmatprep.mubr.f32.mxu0 %v8489_v51 }
 0x18e   :  { %1322 = vmatmul.mubr.f32.gmra.mrb[28].mxu1 %v8579_v30 }
 0x18f   :  { %1327 = vmatprep.mubr.f32.mxu1 %v8489_v51 }
 0x190   :  { %2596 = vmatmul.mubr.f32.gmra.mrb[28].mxu0 %v8580_v13 }
 0x191   :  { %2601 = vmatprep.mubr.f32.mxu0 %v8489_v51 }
 0x192   :  { %1329 = vmatmul.mubr.f32.gmra.mrb[30].mxu1 %v8581_v40 }
 0x194   :  { %2603 = vmatmul.mubr.f32.gmra.mrb[30].mxu0 %v8582_v3 }
 0x229   :  { %v1225_v39 = vpop.f32.mrb[0].mxu1 }
 0x22a   :  { %v1227_v56 = vpop.f32.mrb[1].mxu1 }
 0x22b   :  { %v2499_v61 = vpop.f32.mrb[0].mxu0 }
 0x22c   :  { %v4727_v14 = vadd.f32 %v2499_v61, %v1225_v39  ;;  %v2501_v7 = vpop.f32.mrb[1].mxu0 }
 0x22d   :  { %v4728_v28 = vadd.f32 %v2501_v7, %v1227_v56  ;;  %v1232_v38 = vpop.f32.mrb[2].mxu1  ;;  %v8343_v7 = vmov 683565275  }
 0x22e   :  { %v6209_v53 = vadd.f32 %v4727_v14, %v6204_v52  ;;  %v1234_v24 = vpop.f32.mrb[3].mxu1 }
 0x22f   :  { %v2622_v31 = vadd.f32 %v4728_v28, %v6206_v1  ;;  %v2506_v37 = vpop.f32.mrb[2].mxu0 }
 0x230   :  { %8583 = vst [vmem:[#allocation2_spill] sm:$0xff] %v6209_v53  ;;  %v2899_v16 = vmul.f32 30.0, %v6209_v53  ;;  %v4729_v58 = vadd.f32 %v2506_v37, %v1232_v38  ;;  %v2508_v21 = vpop.f32.mrb[3].mxu0  ;;  %2653 = vrot.lane.b32.xlu0 %v6209_v53, %s5248_s4  ;;  %v8341_v38 = vmov 2475754826  }
 0x231   :  { %v6218_v15 = vmul.f32 %v2622_v31, %v2622_v31  ;;  %v4730_v4 = vadd.f32 %v2508_v21, %v1234_v24  ;;  %v1239_v5 = vpop.f32.mrb[4].mxu1  ;;  %v8336_v21 = vmov 2102212464  }
 0x232   :  { %v6221_v60 = vadd.f32 %v2899_v16, %v6212_v55  ;;  %v6224_v51 = vadd.f32 %v4729_v58, %v6204_v52  ;;  %v1241_v54 = vpop.f32.mrb[5].mxu1  ;;  %v8338_v16 = vmov 2131351028  }
 0x233   :  { %8584 = vst [vmem:[#allocation7_spill] sm:$0xff] %v6218_v15  ;;  %v2513_v11 = vpop.f32.mrb[4].mxu0  ;;  %v2624_v44 = vadd.f32 %v4730_v4, %v6206_v1 }
 0x234   :  { %8585 = vst [vmem:[#allocation4_spill] sm:$0xff] %v6221_v60  ;;  %8586 = vst [vmem:[#allocation8_spill] sm:$0xff] %v6224_v51  ;;  %v8335_v23 = vand.u32 2147483647, %v6221_v60  ;;  %v2934_v18 = vand.u32 2139095040, %v6221_v60  ;;  %v2900_v19 = vmul.f32 30.0, %v6224_v51  ;;  %2765 = vrot.lane.b32.xlu0 %v6218_v15, %s5248_s4  ;;  %v4731_v25 = vadd.f32 %v2513_v11, %v1239_v5 }
 0x235   :  { %v2515_v41 = vpop.f32.mrb[5].mxu0  ;;  %v1246_v45 = vpop.f32.mrb[6].mxu1  ;;  %v6232_v43 = vmul.f32 %v2624_v44, %v2624_v44  ;;  %v8352_v5 = vmov 920167782  }
 0x236   :  { %v4732_v57 = vadd.f32 %v2515_v41, %v1241_v54  ;;  %v2935_v63 = vshrl.u32 %v2934_v18, 23  ;;  %v2938_v6 = vand.u32 8388607, %v8335_v23  ;;  %v6237_v46 = vadd.f32 %v2900_v19, %v6212_v55  ;;  %v1248_v33 = vpop.f32.mrb[7].mxu1 }
 0x237   :  { %8587 = vst [vmem:[#allocation9_spill] sm:$0xff] %v6232_v43  ;;  %v6240_v50 = vadd.f32 %v4731_v25, %v6204_v52  ;;  %v2520_v20 = vpop.f32.mrb[6].mxu0  ;;  %2767 = vrot.lane.b32.xlu1 %v6232_v43, %s5248_s4 }
 0x238   :  { %8588 = vst [vmem:[#allocation10_spill] sm:$0xff] %v6237_v46  ;;  %v2626_v32 = vadd.f32 %v4732_v57, %v6206_v1  ;;  %v4615_v47 = vadd.s32 4294967169, %v2935_v63  ;;  %v2522_v8 = vpop.f32.mrb[7].mxu0  ;;  %2655 = vrot.lane.b32.xlu0 %v6224_v51, %s5248_s4  ;;  %v3037_v34 = vand.u32 2139095040, %v6237_v46  ;;  %v4733_v42 = vadd.f32 %v2520_v20, %v1246_v45 }
 0x239   :  { %8589 = vst [vmem:[#allocation11_spill] sm:$0xff] %v6240_v50  ;;  %v2901_v35 = vmul.f32 30.0, %v6240_v50  ;;  %v1253_v0 = vpop.f32.mrb[8].mxu1  ;;  %v2939_v17 = vor.u32 8388608, %v2938_v6  ;;  %v8334_v10 = vand.u32 2147483647, %v6237_v46  ;;  %v6255_v62 = vadd.f32 %v2522_v8, %v1248_v33 }
 0x23a   :  { %v6249_v49 = vmul.f32 %v2626_v32, %v2626_v32  ;;  %v2941_v22 = vadd.s32 1, %v4615_v47  ;;  %v3038_v12 = vshrl.u32 %v3037_v34, 23  ;;  %v6259_v30 = vpop.f32.mrb[9].mxu1  ;;  %v6268_v36 = vadd.f32 %v4733_v42, %v6204_v52 }
 0x23b   :  { %v6253_v48 = vadd.f32 %v2901_v35, %v6212_v55  ;;  %v2527_v59 = vpop.f32.mrb[8].mxu0  ;;  %2657 = vrot.lane.b32.xlu1 %v6240_v50, %s5248_s4  ;;  %v6274_v39 = vshll.u32 %v2939_v17, 8  ;;  %v6278_v56 = vand.u32 8388607, %v8334_v10  ;;  %v8348_v63 = vmov 1326507024  }
 0x23c   :  { %8590 = vst [vmem:[#allocation12_spill] sm:$0xff] %v6249_v49  ;;  %vm2942_vm4 = vcmp.gt.s32.totalorder %v2941_v22, 0  ;;  %v6261_v13 = vadd.f32 %v2527_v59, %v1253_v0  ;;  %v6263_v40 = vpop.f32.mrb[9].mxu0  ;;  %2769 = vrot.lane.b32.xlu0 %v6249_v49, %s5248_s4  ;;  %v4619_v29 = vadd.s32 4294967169, %v3038_v12  ;;  %8592 = vst [vmem:[#allocation14_spill] sm:$0xff] %v6268_v36  ;;  %v2902_v51 = vmul.f32 30.0, %v6268_v36 }
 0x23d   :  { %8591 = vst [vmem:[#allocation13_spill] sm:$0xff] %v6253_v48  ;;  %v2943_v3 = vsel %vm2942_vm4, %v2941_v22, 0  ;;  %v6270_v2 = vpop.f32.mrb[10].mxu1  ;;  %v3140_v61 = vand.u32 2139095040, %v6253_v48 }
 0x23e   :  { %v2944_v9 = vshrl.u32 %v2943_v3, 5  ;;  %v2945_v26 = vand.u32 31, %v2943_v3  ;;  %v6272_v27 = vpop.f32.mrb[11].mxu1  ;;  %v3044_v31 = vadd.s32 1, %v4619_v29 }
 0x23f   :  { %2659 = vrot.lane.b32.xlu1 %v6268_v36, %s5248_s4  ;;  %v6285_v37 = vpop.f32.mrb[10].mxu0 }
 0x240   :  { %v2946_v14 = vsub.s32 32, %v2945_v26  ;;  %v2948_v28 = vshll.u32 %v8343_v7, %v2945_v26  ;;  %v2951_v24 = vshll.u32 %v8341_v38, %v2945_v26  ;;  %v2954_v58 = vshll.u32 %v8338_v16, %v2945_v26  ;;  %v6290_v11 = vpop.f32.mrb[11].mxu0 }
 0x241   :  { %v2957_v4 = vshll.u32 %v8336_v21, %v2945_v26  ;;  %v2960_v54 = vshll.u32 %v8352_v5, %v2945_v26  ;;  %vm2963_vm5 = vcmp.lt.s32.totalorder %v2944_v9, 1  ;;  %v6292_v44 = vpop.f32.mrb[12].mxu1  ;;  %vm2964_vm6 = vcmp.lt.s32.totalorder %v2944_v9, 2 }
 0x242   :  { %v2949_v18 = vshrl.u32 %v8341_v38, %v2946_v14  ;;  %v2952_v19 = vshrl.u32 %v8338_v16, %v2946_v14  ;;  %v2955_v41 = vshrl.u32 %v8336_v21, %v2946_v14  ;;  %v6297_v25 = vpop.f32.mrb[13].mxu1  ;;  %v2947_v57 = vshrl.u32 %v8343_v7, %v2946_v14 }
 0x243   :  { %v2958_v45 = vshrl.u32 %v8352_v5, %v2946_v14  ;;  %v2961_v6 = vshrl.u32 %v8348_v63, %v2946_v14  ;;  %vm2965_vm7 = vcmp.lt.s32.totalorder %v2944_v9, 3  ;;  %v6302_v33 = vpop.f32.mrb[12].mxu0  ;;  %vm3045_vm8 = vcmp.gt.s32.totalorder %v3044_v31, 0 }
 0x244   :  { %v2950_v32 = vor.u32 %v2949_v18, %v2948_v28  ;;  %v2953_v20 = vor.u32 %v2952_v19, %v2951_v24  ;;  %v2956_v47 = vor.u32 %v2955_v41, %v2954_v58  ;;  %v6304_v8 = vpop.f32.mrb[13].mxu0  ;;  %vm2966_vm9 = vcmp.lt.s32.totalorder %v2944_v9, 4 }
 0x245   :  { %v2959_v34 = vor.u32 %v2958_v45, %v2957_v4  ;;  %v2962_v35 = vor.u32 %v2961_v6, %v2960_v54  ;;  %v3046_v42 = vsel %vm3045_vm8, %v3044_v31, 0  ;;  %v6306_v0 = vpop.f32.mrb[14].mxu1 }
 0x246   :  { %v2967_v17 = vsel %vm2963_vm5, %v2947_v57, %v2950_v32  ;;  %v2968_v22 = vsel %vm2966_vm9, %v2956_v47, 2102212464  ;;  %v2971_v12 = vsel %vm2963_vm5, %v2950_v32, %v2953_v20  ;;  %v2975_v59 = vsel %vm2963_vm5, %v2953_v20, %v2956_v47  ;;  %v6319_v54 = vpop.f32.mrb[15].mxu1 }
 0x247   :  { %v2969_v3 = vsel %vm2965_vm7, %v2953_v20, %v2968_v22  ;;  %v2972_v29 = vsel %vm2966_vm9, %v2959_v34, 920167782  ;;  %v2976_v26 = vsel %vm2966_vm9, %v2962_v35, 1326507024  ;;  %v6312_v14 = vshrl.u32 %v3046_v42, 5  ;;  %v6314_v28 = vpop.f32.mrb[14].mxu0 }
 0x248   :  { %v2970_v24 = vsel %vm2964_vm6, %v2967_v17, %v2969_v3  ;;  %v2973_v31 = vsel %vm2965_vm7, %v2956_v47, %v2972_v29  ;;  %v2977_v58 = vsel %vm2965_vm7, %v2959_v34, %v2976_v26  ;;  %v3048_v4 = vand.u32 31, %v3046_v42  ;;  %v6321_v18 = vpop.f32.mrb[15].mxu0 }
 0x249   :  { %8593 = vst [vmem:[#allocation15_spill] sm:$0xff] %v6321_v18  ;;  %v2974_v19 = vsel %vm2964_vm6, %v2971_v12, %v2973_v31  ;;  %v2978_v41 = vsel %vm2964_vm6, %v2975_v59, %v2977_v58  ;;  %v2986_v20 = vmul.u32 %v6274_v39, %v2970_v24  ;;  %v3042_v47 = vor.u32 8388608, %v6278_v56  ;;  %v6340_v22 = vpop.f32.mrb[16].mxu1 }
 0x24a   :  { %v6326_v57 = vmul.u32.u64.low %v6274_v39, %v2978_v41  ;;  %v6327_v45 = vmul.u32.u64.high %v6274_v39, %v2978_v41, %v6326_v57  ;;  %v6330_v6 = vmul.u32.u64.low %v6274_v39, %v2974_v19  ;;  %v6331_v32 = vmul.u32.u64.high %v6274_v39, %v2974_v19, %v6330_v6  ;;  %8594 = vst [vmem:[#allocation16_spill] sm:$0xff] %v6340_v22 }
 0x24b   :  { %v3049_v34 = vsub.s32 32, %v3048_v4  ;;  %v3141_v35 = vshrl.u32 %v3140_v61, 23  ;;  %v3051_v42 = vshll.u32 %v8343_v7, %v3048_v4  ;;  %v3054_v9 = vshll.u32 %v8341_v38, %v3048_v4  ;;  %v6342_v12 = vpop.f32.mrb[16].mxu0 }
 0x24c   :  { %v3057_v17 = vshll.u32 %v8338_v16, %v3048_v4  ;;  %vm3066_vm10 = vcmp.lt.s32.totalorder %v6312_v14, 1  ;;  %8595 = vst [vmem:[#allocation17_spill] sm:$0xff] %v6342_v12  ;;  %v3060_v61 = vshll.u32 %v8336_v21, %v3048_v4  ;;  %vm2988_vm11 = vc.u32 %v6327_v45, %v6330_v6 }
 0x24d   :  { %v3052_v59 = vshrl.u32 %v8341_v38, %v3049_v34  ;;  %v3055_v39 = vshrl.u32 %v8338_v16, %v3049_v34  ;;  %v3058_v56 = vshrl.u32 %v8336_v21, %v3049_v34  ;;  %v2989_v3 = vadd.s32 1, %v6331_v32 }
 0x24e   :  { %v3061_v29 = vshrl.u32 %v8352_v5, %v3049_v34  ;;  %v3063_v26 = vshll.u32 %v8352_v5, %v3048_v4  ;;  %v3064_v19 = vshrl.u32 %v8348_v63, %v3049_v34  ;;  %vm3068_vm12 = vcmp.lt.s32.totalorder %v6312_v14, 3 }
 0x24f   :  { %v3053_v24 = vor.u32 %v3052_v59, %v3051_v42  ;;  %v3056_v31 = vor.u32 %v3055_v39, %v3054_v9  ;;  %v3059_v58 = vor.u32 %v3058_v56, %v3057_v17  ;;  %v2990_v41 = vsel %vm2988_vm11, %v2989_v3, %v6331_v32 }
 0x250   :  { %v3062_v57 = vor.u32 %v3061_v29, %v3060_v61  ;;  %vm3069_vm13 = vcmp.lt.s32.totalorder %v6312_v14, 4  ;;  %v2991_v10 = vadd.s32 %v2990_v41, %v2986_v20  ;;  %v3050_v23 = vshrl.u32 %v8343_v7, %v3049_v34 }
 0x251   :  { %v3065_v21 = vor.u32 %v3064_v19, %v3063_v26  ;;  %v3071_v16 = vsel %vm3069_vm13, %v3059_v58, 2102212464  ;;  %v3074_v4 = vsel %vm3066_vm10, %v3053_v24, %v3056_v31  ;;  %v3078_v9 = vsel %vm3066_vm10, %v3056_v31, %v3059_v58 }
 0x252   :  { %v3075_v42 = vsel %vm3069_vm13, %v3062_v57, 920167782  ;;  %v4623_v17 = vadd.s32 4294967169, %v3141_v35  ;;  %vm3067_vm14 = vcmp.lt.s32.totalorder %v6312_v14, 2  ;;  %v3082_v39 = vshll.u32 %v3042_v47, 8 }
 0x253   :  { %v3076_v32 = vsel %vm3068_vm12, %v3059_v58, %v3075_v42  ;;  %v3079_v59 = vsel %vm3069_vm13, %v3065_v21, 1326507024  ;;  %v3070_v20 = vsel %vm3066_vm10, %v3050_v23, %v3053_v24  ;;  %v3072_v34 = vsel %vm3068_vm12, %v3056_v31, %v3071_v16 }
 0x254   :  { %v3077_v56 = vsel %vm3067_vm14, %v3074_v4, %v3076_v32  ;;  %v3080_v61 = vsel %vm3068_vm12, %v3062_v57, %v3079_v59  ;;  %v2992_v3 = vadd.s32 536870912, %v2991_v10  ;;  %v3147_v21 = vadd.s32 1, %v4623_v17 }
 0x255   :  { %v3081_v29 = vsel %vm3067_vm14, %v3078_v9, %v3080_v61  ;;  %v6371_v35 = vmul.u32.u64.low %v3082_v39, %v3077_v56  ;;  %v6372_v26 = vmul.u32.u64.high %v3082_v39, %v3077_v56, %v6371_v35  ;;  %v3073_v47 = vsel %vm3067_vm14, %v3070_v20, %v3072_v34 }
 0x256   :  { %v6375_v19 = vmul.u32.u64.low %v3082_v39, %v3081_v29  ;;  %v6376_v58 = vmul.u32.u64.high %v3082_v39, %v3081_v29, %v6375_v19  ;;  %vm3148_vm15 = vcmp.gt.s32.totalorder %v3147_v21, 0  ;;  %v6380_v23 = vadd.f32 %v6261_v13, %v6204_v52 }
 0x257   :  { %v6384_v16 = vadd.f32 %v6263_v40, %v6259_v30  ;;  %v6388_v14 = vadd.f32 %v6285_v37, %v6270_v2  ;;  %v6390_v24 = vshrl.u32 %v2992_v3, 30  ;;  %v3092_v31 = vadd.s32 1, %v6372_v26 }
 0x258   :  { %8596 = vst [vmem:[#allocation18_spill] sm:$0xff] %v6380_v23  ;;  %v8340_v41 = vand.u32 2147483647, %v6253_v48  ;;  %v3149_v57 = vsel %vm3148_vm15, %v3147_v21, 0  ;;  %v3089_v4 = vmul.u32 %v3082_v39, %v3073_v47  ;;  %vm3091_vm0 = vc.u32 %v6376_v58, %v6371_v35  ;;  %2661 = vrot.lane.b32.xlu0 %v6380_v23, %s5248_s4  ;;  %v6413_v47 = vpop.f32.mrb[17].mxu1 }
 0x259   :  { %v3151_v13 = vand.u32 31, %v3149_v57  ;;  %v3093_v30 = vsel %vm3091_vm0, %v3092_v31, %v6372_v26  ;;  %v2994_v37 = vshll.u32 %v6390_v24, 30  ;;  %v3150_v17 = vshrl.u32 %v3149_v57, 5  ;;  %8599 = vst [vmem:[#allocation19_spill] sm:$0xff] %v6413_v47  ;;  %v6415_v31 = vpop.f32.mrb[17].mxu0  ;;  %v6421_v43 = vpop.f32.mrb[18].mxu1 }
 0x25a   :  { %v3094_v40 = vadd.s32 %v3093_v30, %v3089_v4  ;;  %v3144_v42 = vand.u32 8388607, %v8340_v41  ;;  %v8597_v59 = vmov 2131351028   ;;  %v8598_v56 = vmov 2102212464  }
 0x25b   :  { %v3152_v2 = vsub.s32 32, %v3151_v13  ;;  %v3154_v20 = vshll.u32 %v8343_v7, %v3151_v13  ;;  %v3157_v34 = vshll.u32 %v8341_v38, %v3151_v13  ;;  %v3160_v26 = vshll.u32 %v8597_v59, %v3151_v13  ;;  %8600 = vst [vmem:[#allocation20_spill] sm:$0xff] %v6415_v31  ;;  %8601 = vst [vmem:[#allocation22_spill] sm:$0xff] %v6421_v43  ;;  %v6423_v50 = vpop.f32.mrb[18].mxu0 }
 0x25c   :  { %v3095_v9 = vadd.s32 536870912, %v3094_v40  ;;  %v3163_v19 = vshll.u32 %v8598_v56, %v3151_v13  ;;  %v6417_v57 = vsub.s32 %v2991_v10, %v2994_v37  ;;  %v3145_v4 = vor.u32 8388608, %v3144_v42  ;;  %8602 = vst [vmem:[#allocation23_spill] sm:$0xff] %v6423_v50 }
 0x25d   :  { %v3155_v32 = vshrl.u32 %v8341_v38, %v3152_v2  ;;  %v3158_v39 = vshrl.u32 %v8597_v59, %v3152_v2  ;;  %v3161_v61 = vshrl.u32 %v8598_v56, %v3152_v2  ;;  %v3164_v3 = vshrl.u32 %v8352_v5, %v3152_v2 }
 0x25e   :  { %v6408_v29 = vshrl.u32 %v3095_v9, 30  ;;  %v3167_v21 = vshrl.u32 %v8348_v63, %v3152_v2  ;;  %v3166_v49 = vshll.u32 %v8352_v5, %v3151_v13  ;;  %vm3169_vm1 = vcmp.lt.s32.totalorder %v3150_v17, 1 }
 0x25f   :  { %v3156_v30 = vor.u32 %v3155_v32, %v3154_v20  ;;  %v3159_v41 = vor.u32 %v3158_v39, %v3157_v34  ;;  %v3162_v7 = vor.u32 %v3161_v61, %v3160_v26  ;;  %v3165_v9 = vor.u32 %v3164_v3, %v3163_v19 }
 0x260   :  { %v3097_v38 = vshll.u32 %v6408_v29, 30  ;;  %v3168_v63 = vor.u32 %v3167_v21, %v3166_v49  ;;  %vm3172_vm2 = vcmp.lt.s32.totalorder %v3150_v17, 4  ;;  %v3185_v37 = vshll.u32 %v3145_v4, 8 }
 0x261   :  { %v3177_v10 = vsel %vm3169_vm1, %v3156_v30, %v3159_v41  ;;  %v2997_v42 = vsub.s32 0, %v6417_v57  ;;  %vm3171_vm3 = vcmp.lt.s32.totalorder %v3150_v17, 3  ;;  %v3174_v32 = vsel %vm3172_vm2, %v3162_v7, 2102212464 }
 0x262   :  { %v6426_v15 = vsub.s32 %v3094_v40, %v3097_v38  ;;  %v3178_v39 = vsel %vm3172_vm2, %v3165_v9, 920167782  ;;  %v8603_v13 = vmov 683565275   ;;  %vm3170_vm4 = vcmp.lt.s32.totalorder %v3150_v17, 2 }
 0x263   :  { %v3153_v20 = vshrl.u32 %v8603_v13, %v3152_v2  ;;  %v3179_v34 = vsel %vm3171_vm3, %v3162_v7, %v3178_v39  ;;  %v3181_v49 = vsel %vm3169_vm1, %v3159_v41, %v3162_v7  ;;  %v3182_v3 = vsel %vm3172_vm2, %v3168_v63, 1326507024 }
 0x264   :  { %v3180_v61 = vsel %vm3170_vm4, %v3177_v10, %v3179_v34  ;;  %v6433_v38 = vadd.f32 %v2902_v51, %v6212_v55  ;;  %v2628_v40 = vadd.f32 %v6255_v62, %v6206_v1  ;;  %v3100_v26 = vsub.s32 0, %v6426_v15 }
 0x265   :  { %v3173_v19 = vsel %vm3169_vm1, %v3153_v20, %v3156_v30  ;;  %v3175_v21 = vsel %vm3171_vm3, %v3159_v41, %v3174_v32  ;;  %v3183_v4 = vsel %vm3171_vm3, %v3165_v9, %v3182_v3  ;;  %v4616_v2 = vmin.u32 %v2997_v42, %v6417_v57  ;;  %v6463_v3 = vpop.f32.mrb[19].mxu1 }
 0x266   :  { %8604 = vst [vmem:[#allocation26_spill] sm:$0xff] %v6433_v38  ;;  %v3184_v5 = vsel %vm3170_vm4, %v3181_v49, %v3183_v4  ;;  %v6440_v39 = vmul.u32.u64.low %v3185_v37, %v3180_v61  ;;  %v6441_v36 = vmul.u32.u64.high %v3185_v37, %v3180_v61, %v6440_v39  ;;  %v3176_v51 = vsel %vm3170_vm4, %v3173_v19, %v3175_v21  ;;  %8607 = vst [vmem:[#allocation32_spill] sm:$0xff] %v6463_v3 }
 0x267   :  { %v6444_v7 = vmul.u32.u64.low %v3185_v37, %v3184_v5  ;;  %v6445_v63 = vmul.u32.u64.high %v3185_v37, %v3184_v5, %v6444_v7  ;;  %v3243_v10 = vand.u32 2139095040, %v6433_v38  ;;  %v6448_v62 = vmul.f32 %v2628_v40, %v2628_v40  ;;  %v6465_v40 = vpop.f32.mrb[19].mxu0 }
 0x268   :  { %v4620_v17 = vmin.u32 %v3100_v26, %v6426_v15  ;;  %v2999_v30 = vclz %v4616_v2  ;;  %v3195_v41 = vadd.s32 1, %v6441_v36  ;;  %v2630_v42 = vadd.f32 %v6384_v16, %v6206_v1  ;;  %8608 = vst [vmem:[#allocation35_spill] sm:$0xff] %v6465_v40  ;;  %v6476_v21 = vpop.f32.mrb[20].mxu0 }
 0x269   :  { %8605 = vst [vmem:[#allocation28_spill] sm:$0xff] %v6448_v62  ;;  %v3244_v9 = vshrl.u32 %v3243_v10, 23  ;;  %2771 = vrot.lane.b32.xlu1 %v6448_v62, %s5248_s4  ;;  %v3192_v32 = vmul.u32 %v3185_v37, %v3176_v51  ;;  %vm3194_vm5 = vc.u32 %v6445_v63, %v6440_v39  ;;  %v6461_v20 = vadd.f32 %v6388_v14, %v6204_v52  ;;  %v6474_v14 = vpop.f32.mrb[20].mxu1 }
 0x26a   :  { %v3196_v5 = vsel %vm3194_vm5, %v3195_v41, %v6441_v36  ;;  %v3102_v34 = vclz %v4620_v17  ;;  %v4617_v16 = vadd.s32 4294967294, %v2999_v30  ;;  %v8355_v26 = vand.u32 2147483647, %v6433_v38  ;;  %8610 = vst [vmem:[#allocation3_spill] sm:$0xff] %v6474_v14  ;;  %8611 = vst [vmem:[#allocation5_spill] sm:$0xff] %v6476_v21 }
 0x26b   :  { %8606 = vst [vmem:[#allocation31_spill] sm:$0xff] %v6461_v20  ;;  %v3197_v49 = vadd.s32 %v3196_v5, %v3192_v32  ;;  %v4627_v61 = vadd.s32 4294967169, %v3244_v9  ;;  %v6468_v37 = vmul.f32 %v2630_v42, %v2630_v42  ;;  %v2903_v10 = vmul.f32 30.0, %v6380_v23 }
 0x26c   :  { %v4621_v4 = vadd.s32 4294967294, %v3102_v34  ;;  %vm4618_vm7 = vcmp.lt.s32.totalorder %v4617_v16, 0  ;;  %v3247_v7 = vand.u32 8388607, %v8355_v26  ;;  %v8616_v21 = vmov 1326507024  }
 0x26d   :  { %8609 = vst [vmem:[#allocation37_spill] sm:$0xff] %v6468_v37  ;;  %2663 = vrot.lane.b32.xlu1 %v6461_v20, %s5248_s4  ;;  %v3198_v36 = vadd.s32 536870912, %v3197_v49  ;;  %v3250_v19 = vadd.s32 1, %v4627_v61  ;;  %2773 = vrot.lane.b32.xlu0 %v6468_v37, %s5248_s4  ;;  %v6484_v41 = vsel %vm4618_vm7, 0, %v4617_v16  ;;  %v6490_v61 = vadd.f32 %v2903_v10, %v6212_v55 }
 0x26e   :  { %vm4622_vm8 = vcmp.lt.s32.totalorder %v4621_v4, 0  ;;  %v3248_v32 = vor.u32 8388608, %v3247_v7  ;;  %v3003_v3 = vsub.s32 32, %v6484_v41  ;;  %v3007_v50 = vsub.s32 4294967266, %v6484_v41 }
 0x26f   :  { %v6478_v2 = vshrl.u32 %v3198_v36, 30  ;;  %vm3251_vm6 = vcmp.gt.s32.totalorder %v3250_v19, 0  ;;  %8613 = vst [vmem:[#allocation21_spill] sm:$0xff] %v6490_v61  ;;  %v8614_v36 = vmov 2475754826   ;;  %v6505_v31 = vsel %vm4622_vm8, 0, %v4621_v4 }
 0x270   :  { %v3252_v51 = vsel %vm3251_vm6, %v3250_v19, 0  ;;  %v3288_v48 = vshll.u32 %v3248_v32, 8  ;;  %vm2933_vm6 = vcmp.lt.s32.totalorder %v6221_v60, 0 }
 0x271   :  { %8612 = vst [vmem:[#allocation6_spill] sm:$0xff] %v6478_v2  ;;  %v3200_v17 = vshll.u32 %v6478_v2, 30  ;;  %v3254_v30 = vand.u32 31, %v3252_v51  ;;  %v3253_v5 = vshrl.u32 %v3252_v51, 5  ;;  %v8615_v51 = vmov 920167782  }
 0x273   :  { %v6486_v9 = vsub.s32 %v3197_v49, %v3200_v17  ;;  %v3255_v42 = vsub.s32 32, %v3254_v30  ;;  %v3257_v34 = vshll.u32 %v8603_v13, %v3254_v30  ;;  %v3260_v26 = vshll.u32 %v8614_v36, %v3254_v30 }
 0x274   :  { %v3263_v16 = vshll.u32 %v8597_v59, %v3254_v30  ;;  %v3266_v7 = vshll.u32 %v8598_v56, %v3254_v30  ;;  %v3269_v10 = vshll.u32 %v8615_v51, %v3254_v30  ;;  %vm3272_vm9 = vcmp.lt.s32.totalorder %v3253_v5, 1 }
 0x275   :  { %v3258_v19 = vshrl.u32 %v8614_v36, %v3255_v42  ;;  %v3261_v37 = vshrl.u32 %v8597_v59, %v3255_v42  ;;  %v3203_v62 = vsub.s32 0, %v6486_v9  ;;  %v3264_v49 = vshrl.u32 %v8598_v56, %v3255_v42 }
 0x276   :  { %v3267_v17 = vshrl.u32 %v8615_v51, %v3255_v42  ;;  %v3270_v14 = vshrl.u32 %v8616_v21, %v3255_v42  ;;  %vm3274_vm10 = vcmp.lt.s32.totalorder %v3253_v5, 3  ;;  %vm3275_vm11 = vcmp.lt.s32.totalorder %v3253_v5, 4 }
 0x277   :  { %v3259_v23 = vor.u32 %v3258_v19, %v3257_v34  ;;  %v3262_v53 = vor.u32 %v3261_v37, %v3260_v26  ;;  %v3265_v38 = vor.u32 %v3264_v49, %v3263_v16  ;;  %v4624_v47 = vmin.u32 %v3203_v62, %v6486_v9 }
 0x278   :  { %v3268_v40 = vor.u32 %v3267_v17, %v3266_v7  ;;  %v3271_v43 = vor.u32 %v3270_v14, %v3269_v10  ;;  %v3346_v37 = vand.u32 2139095040, %v6490_v61  ;;  %v3256_v14 = vshrl.u32 %v8603_v13, %v3255_v42 }
 0x279   :  { %v3280_v26 = vsel %vm3272_vm9, %v3259_v23, %v3262_v53  ;;  %v3277_v30 = vsel %vm3275_vm11, %v3265_v38, 2102212464  ;;  %v3284_v19 = vsel %vm3272_vm9, %v3262_v53, %v3265_v38  ;;  %vm3273_vm12 = vcmp.lt.s32.totalorder %v3253_v5, 2 }
 0x27a   :  { %v3281_v34 = vsel %vm3275_vm11, %v3268_v40, 920167782  ;;  %v3285_v16 = vsel %vm3275_vm11, %v3271_v43, 1326507024  ;;  %v3205_v49 = vclz %v4624_v47  ;;  %v2904_v17 = vmul.f32 30.0, %v6461_v20 }
 0x27b   :  { %v3282_v4 = vsel %vm3274_vm10, %v3265_v38, %v3281_v34  ;;  %v3286_v62 = vsel %vm3274_vm10, %v3268_v40, %v3285_v16  ;;  %v3008_v10 = vadd.s32 127, %v3007_v50  ;;  %v3276_v12 = vsel %vm3272_vm9, %v3256_v14, %v3259_v23  ;;  %v6554_v14 = vpop.f32.mrb[21].mxu1 }
 0x27c   :  { %v3283_v32 = vsel %vm3273_vm12, %v3280_v26, %v3282_v4  ;;  %v3287_v7 = vsel %vm3273_vm12, %v3284_v19, %v3286_v62  ;;  %v3278_v22 = vsel %vm3274_vm10, %v3262_v53, %v3277_v30  ;;  %v3347_v43 = vshrl.u32 %v3346_v37, 23  ;;  %v6556_v4 = vpop.f32.mrb[21].mxu0 }
 0x27d   :  { %v6519_v2 = vmul.u32.u64.low %v3288_v48, %v3287_v7  ;;  %v6520_v42 = vmul.u32.u64.high %v3288_v48, %v3287_v7, %v6519_v2  ;;  %v6522_v18 = vmul.u32.u64.low %v3288_v48, %v3283_v32  ;;  %v6523_v38 = vmul.u32.u64.high %v3288_v48, %v3283_v32, %v6522_v18 }
 0x27e   :  { %v2987_v47 = vadd.s32 %v6330_v6, %v6327_v45  ;;  %v3110_v40 = vsub.s32 4294967266, %v6505_v31  ;;  %v8366_v26 = vand.u32 2147483647, %v6490_v61  ;;  %v4631_v50 = vadd.s32 4294967169, %v3347_v43 }
 0x27f   :  { %v4625_v34 = vadd.s32 4294967294, %v3205_v49  ;;  %v3279_v23 = vsel %vm3273_vm12, %v3276_v12, %v3278_v22  ;;  %v6532_v53 = vadd.f32 %v2904_v17, %v6212_v55  ;;  %v6536_v2 = vadd.f32 %v6290_v11, %v6272_v27 }
 0x280   :  { %v3004_v37 = vshll.u32 %v6417_v57, %v6484_v41  ;;  %v3005_v30 = vshrl.u32 %v2987_v47, %v3003_v3  ;;  %v3090_v45 = vadd.s32 %v6371_v35, %v6376_v58  ;;  %v3353_v6 = vadd.s32 1, %v4631_v50 }
 0x281   :  { %8617 = vst [vmem:[#allocation24_spill] sm:$0xff] %v6532_v53  ;;  %v3009_v19 = vshll.u32 %v3008_v10, 23  ;;  %v3106_v16 = vsub.s32 32, %v6505_v31  ;;  %vm3297_vm13 = vc.u32 %v6520_v42, %v6522_v18  ;;  %v3298_v22 = vadd.s32 1, %v6523_v38 }
 0x282   :  { %v3111_v12 = vadd.s32 127, %v3110_v40  ;;  %v3295_v5 = vmul.u32 %v3288_v48, %v3279_v23  ;;  %v3350_v27 = vand.u32 8388607, %v8366_v26  ;;  %vm3354_vm14 = vcmp.gt.s32.totalorder %v3353_v6, 0  ;;  %v6568_v23 = vpop.f32.mrb[22].mxu1 }
 0x283   :  { %vm4626_vm15 = vcmp.lt.s32.totalorder %v4625_v34, 0  ;;  %v3299_v11 = vsel %vm3297_vm13, %v3298_v22, %v6523_v38  ;;  %v3355_v57 = vsel %vm3354_vm14, %v3353_v6, 0  ;;  %v3449_v35 = vand.u32 2139095040, %v6532_v53 }
 0x284   :  { %v6550_v58 = vor.u32 %v3005_v30, %v3004_v37  ;;  %v6552_v3 = vadd.s32 %v3299_v11, %v3295_v5  ;;  %v3357_v41 = vand.u32 31, %v3355_v57  ;;  %v6558_v48 = vor.u32 4788187, %v3009_v19  ;;  %v6570_v37 = vpop.f32.mrb[22].mxu0 }
 0x285   :  { %v3107_v62 = vshll.u32 %v6426_v15, %v6505_v31  ;;  %v3108_v49 = vshrl.u32 %v3090_v45, %v3106_v16  ;;  %v4739_v32 = vadd.f32 %v6302_v33, %v6292_v44  ;;  %v3112_v7 = vshll.u32 %v3111_v12, 23  ;;  %8618 = vst [vmem:[#allocation25_spill] sm:$0xff] %v6570_v37 }
 0x286   :  { %v6564_v17 = vsel %vm4626_vm15, 0, %v4625_v34  ;;  %v3351_v10 = vor.u32 8388608, %v3350_v27  ;;  %v3358_v43 = vsub.s32 32, %v3357_v41  ;;  %v3301_v38 = vadd.s32 536870912, %v6552_v3 }
 0x287   :  { %v3356_v47 = vshrl.u32 %v3355_v57, 5  ;;  %v3360_v40 = vshll.u32 %v8603_v13, %v3357_v41  ;;  %v3450_v50 = vshrl.u32 %v3449_v35, 23  ;;  %v3363_v31 = vshll.u32 %v8614_v36, %v3357_v41 }
 0x288   :  { %v3361_v15 = vshrl.u32 %v8614_v36, %v3358_v43  ;;  %v3366_v44 = vshll.u32 %v8597_v59, %v3357_v41  ;;  %v3369_v33 = vshll.u32 %v8598_v56, %v3357_v41  ;;  %v3364_v34 = vshrl.u32 %v8597_v59, %v3358_v43 }
 0x289   :  { %v3367_v30 = vshrl.u32 %v8598_v56, %v3358_v43  ;;  %v3370_v45 = vshrl.u32 %v8615_v51, %v3358_v43  ;;  %v3373_v6 = vshrl.u32 %v8616_v21, %v3358_v43  ;;  %v3011_v19 = vand.u32 2147483647, %v6558_v48 }
 0x28a   :  { %v3013_v16 = vcvt.s32.f32 %v6550_v58  ;;  %v3362_v22 = vor.u32 %v3361_v15, %v3360_v40  ;;  %v3372_v12 = vshll.u32 %v8615_v51, %v3357_v41  ;;  %v6583_v5 = vor.u32 %v3108_v49, %v3107_v62 }
 0x28b   :  { %v3365_v27 = vor.u32 %v3364_v34, %v3363_v31  ;;  %v3368_v11 = vor.u32 %v3367_v30, %v3366_v44  ;;  %v3371_v57 = vor.u32 %v3370_v45, %v3369_v33  ;;  %v6585_v35 = vor.u32 4788187, %v3112_v7 }
 0x28c   :  { %v3213_v26 = vsub.s32 4294967266, %v6564_v17  ;;  %v3374_v20 = vor.u32 %v3373_v6, %v3372_v12  ;;  %v8370_v61 = vand.u32 2147483647, %v6532_v53  ;;  %v6589_v37 = vshrl.u32 %v3301_v38, 30 }
 0x28d   :  { %vm3375_vm0 = vcmp.lt.s32.totalorder %v3356_v47, 1  ;;  %v3391_v48 = vshll.u32 %v3351_v10, 8  ;;  %v4635_v58 = vadd.s32 4294967169, %v3450_v50  ;;  %vm3377_vm1 = vcmp.lt.s32.totalorder %v3356_v47, 3 }
 0x28e   :  { %vm3378_vm2 = vcmp.lt.s32.totalorder %v3356_v47, 4  ;;  %v3383_v41 = vsel %vm3375_vm0, %v3362_v22, %v3365_v27  ;;  %v2632_v62 = vadd.f32 %v6536_v2, %v6206_v1  ;;  %v3387_v40 = vsel %vm3375_vm0, %v3365_v27, %v3368_v11 }
 0x28f   :  { %v3380_v49 = vsel %vm3378_vm2, %v3368_v11, 2102212464  ;;  %v3384_v7 = vsel %vm3378_vm2, %v3371_v57, 920167782  ;;  %v3388_v15 = vsel %vm3378_vm2, %v3374_v20, 1326507024  ;;  %v3359_v31 = vshrl.u32 %v8603_v13, %v3358_v43 }
 0x290   :  { %vm3376_vm3 = vcmp.lt.s32.totalorder %v3356_v47, 2  ;;  %v3385_v38 = vsel %vm3377_vm1, %v3368_v11, %v3384_v7  ;;  %v3389_v10 = vsel %vm3377_vm1, %v3371_v57, %v3388_v15  ;;  %v3303_v50 = vshll.u32 %v6589_v37, 30 }
 0x291   :  { %v3386_v44 = vsel %vm3376_vm3, %v3383_v41, %v3385_v38  ;;  %v3390_v33 = vsel %vm3376_vm3, %v3387_v40, %v3389_v10  ;;  %v3456_v34 = vadd.s32 1, %v4635_v58  ;;  %v3379_v2 = vsel %vm3375_vm0, %v3359_v31, %v3362_v22 }
 0x292   :  { %v3381_v30 = vsel %vm3377_vm1, %v3365_v27, %v3380_v49  ;;  %v6603_v45 = vmul.u32.u64.low %v3391_v48, %v3390_v33  ;;  %v6604_v20 = vmul.u32.u64.high %v3391_v48, %v3390_v33, %v6603_v45  ;;  %v3209_v43 = vsub.s32 32, %v6564_v17 }
 0x293   :  { %v6607_v6 = vmul.u32.u64.low %v3391_v48, %v3386_v44  ;;  %v6608_v12 = vmul.u32.u64.high %v3391_v48, %v3386_v44, %v6607_v6  ;;  %vm3457_vm4 = vcmp.gt.s32.totalorder %v3456_v34, 0  ;;  %v3214_v11 = vadd.s32 127, %v3213_v26 }
 0x294   :  { %v3458_v57 = vsel %vm3457_vm4, %v3456_v34, 0  ;;  %v6611_v41 = vmul.f32 %v2632_v62, %v2632_v62  ;;  %v6614_v58 = vadd.f32 %v4739_v32, %v6204_v52  ;;  %v3382_v22 = vsel %vm3376_vm3, %v3379_v2, %v3381_v30 }
 0x295   :  { %v3460_v27 = vand.u32 31, %v3458_v57  ;;  %v6619_v49 = vadd.f32 %v6304_v8, %v6297_v25  ;;  %v6623_v7 = vadd.f32 %v6314_v28, %v6306_v0  ;;  %v3193_v26 = vadd.s32 %v6440_v39, %v6445_v63 }
 0x296   :  { %8619 = vst [vmem:[#allocation27_spill] sm:$0xff] %v6611_v41  ;;  %8620 = vst [vmem:[#allocation29_spill] sm:$0xff] %v6614_v58  ;;  %v6628_v62 = vsub.s32 %v6552_v3, %v3303_v50  ;;  %vm3400_vm5 = vc.u32 %v6604_v20, %v6607_v6  ;;  %v3453_v32 = vand.u32 8388607, %v8370_v61  ;;  %2665 = vrot.lane.b32.xlu0 %v6614_v58, %s5248_s4  ;;  %2775 = vrot.lane.b32.xlu1 %v6611_v41, %s5248_s4 }
 0x297   :  { %v6638_v25 = vmul.f32 %v3013_v16, %v3011_v19  ;;  %v3116_v8 = vcvt.s32.f32 %v6583_v5  ;;  %v3401_v0 = vadd.s32 1, %v6608_v12  ;;  %v3461_v28 = vsub.s32 32, %v3460_v27  ;;  %v6648_v16 = vpop.f32.mrb[23].mxu1  ;;  %v6650_v5 = vpop.f32.mrb[23].mxu0 }
 0x298   :  { %v3114_v39 = vand.u32 2147483647, %v6585_v35  ;;  %v3210_v63 = vshll.u32 %v6486_v9, %v6564_v17  ;;  %v3211_v3 = vshrl.u32 %v3193_v26, %v3209_v43  ;;  %v3398_v47 = vmul.u32 %v3391_v48, %v3382_v22  ;;  %v6659_v45 = vpop.f32.mrb[24].mxu1  ;;  %v6661_v43 = vpop.f32.mrb[24].mxu0 }
 0x299   :  { %v3215_v40 = vshll.u32 %v3214_v11, 23  ;;  %v3402_v15 = vsel %vm3400_vm5, %v3401_v0, %v6608_v12  ;;  %v3464_v31 = vshrl.u32 %v8614_v36, %v3461_v28  ;;  %v3467_v19 = vshrl.u32 %v8597_v59, %v3461_v28  ;;  %8621 = vst [vmem:[#allocation30_spill] sm:$0xff] %v6661_v43 }
 0x29a   :  { %v3306_v38 = vsub.s32 0, %v6628_v62  ;;  %v3403_v10 = vadd.s32 %v3402_v15, %v3398_v47  ;;  %v3454_v35 = vor.u32 8388608, %v3453_v32  ;;  %v3463_v50 = vshll.u32 %v8603_v13, %v3460_v27 }
 0x29b   :  { %v3459_v9 = vshrl.u32 %v3458_v57, 5  ;;  %v3466_v17 = vshll.u32 %v8614_v36, %v3460_v27  ;;  %v3469_v48 = vshll.u32 %v8597_v59, %v3460_v27  ;;  %v3470_v44 = vshrl.u32 %v8598_v56, %v3461_v28 }
 0x29c   :  { %v3404_v33 = vadd.s32 536870912, %v3403_v10  ;;  %v3465_v34 = vor.u32 %v3464_v31, %v3463_v50  ;;  %v3472_v2 = vshll.u32 %v8598_v56, %v3460_v27  ;;  %v3473_v30 = vshrl.u32 %v8615_v51, %v3461_v28 }
 0x29d   :  { %v3468_v12 = vor.u32 %v3467_v19, %v3466_v17  ;;  %v3471_v11 = vor.u32 %v3470_v44, %v3469_v48  ;;  %v3475_v57 = vshll.u32 %v8615_v51, %v3460_v27  ;;  %v3476_v22 = vshrl.u32 %v8616_v21, %v3461_v28 }
 0x29e   :  { %v3015_v26 = vxor.u32 2147483648, %v6638_v25  ;;  %v3117_v32 = vmul.f32 %v3116_v8, %v3114_v39  ;;  %v3474_v0 = vor.u32 %v3473_v30, %v3472_v2  ;;  %v3212_v47 = vor.u32 %v3211_v3, %v3210_v63 }
 0x29f   :  { %v6667_v15 = vshrl.u32 %v3404_v33, 30  ;;  %v3477_v31 = vor.u32 %v3476_v22, %v3475_v57  ;;  %v2905_v50 = vmul.f32 30.0, %v6614_v58  ;;  %v3216_v61 = vor.u32 4788187, %v3215_v40 }
 0x2a0   :  { %v4628_v19 = vmin.u32 %v3306_v38, %v6628_v62  ;;  %vm3478_vm7 = vcmp.lt.s32.totalorder %v3459_v9, 1  ;;  %vm3481_vm8 = vcmp.lt.s32.totalorder %v3459_v9, 4  ;;  %v8622_v27 = vand.u32 2147483647, %v6221_v60 }
 0x2a1   :  { %v8623_v17 = vmov 0  ;;  %v3483_v48 = vsel %vm3481_vm8, %v3471_v11, 2102212464  ;;  %v3486_v8 = vsel %vm3478_vm7, %v3465_v34, %v3468_v12  ;;  %v3487_v39 = vsel %vm3481_vm8, %v3474_v0, 920167782 }
 0x2a2   :  { %vm6673_vm9 = vcmp.le.f32.partialorder %v8622_v27, 0.7853982  ;;  %v3494_v63 = vshll.u32 %v3454_v35, 8  ;;  %vm3036_vm10 = vcmp.lt.s32.totalorder %v6237_v46, 0  ;;  %v3462_v3 = vshrl.u32 %v8603_v13, %v3461_v28 }
 0x2a3   :  { %v8624_v17 = vsel %vm6673_vm9, 4294967295, %v8623_v17  ;;  %vm3479_vm11 = vcmp.lt.s32.totalorder %v3459_v9, 2  ;;  %vm3480_vm12 = vcmp.lt.s32.totalorder %v3459_v9, 3  ;;  %v3490_v40 = vsel %vm3478_vm7, %v3468_v12, %v3471_v11 }
 0x2a4   :  { %8625 = vst [vmem:[#allocation33_spill] sm:$0xff] %v8624_v17  ;;  %v3406_v38 = vshll.u32 %v6667_v15, 30  ;;  %v3488_v44 = vsel %vm3480_vm12, %v3471_v11, %v3487_v39  ;;  %v3491_v33 = vsel %vm3481_vm8, %v3477_v31, 1326507024  ;;  %v6683_v2 = vadd.f32 %v2905_v50, %v6212_v55 }
 0x2a5   :  { %v3482_v30 = vsel %vm3478_vm7, %v3462_v3, %v3465_v34  ;;  %v3484_v57 = vsel %vm3480_vm12, %v3468_v12, %v3483_v48  ;;  %v3489_v35 = vsel %vm3479_vm11, %v3486_v8, %v3488_v44  ;;  %v3492_v22 = vsel %vm3480_vm12, %v3474_v0, %v3491_v33 }
 0x2a6   :  { %8626 = vst [vmem:[#allocation34_spill] sm:$0xff] %v6683_v2  ;;  %v8627_v27 = vand.u32 2147483647, %v6237_v46  ;;  %v8628_v28 = vmov 0  ;;  %v3308_v41 = vclz %v4628_v19  ;;  %v3493_v58 = vsel %vm3479_vm11, %v3490_v40, %v3492_v22 }
 0x2a7   :  { %v6694_v11 = vmul.u32.u64.low %v3494_v63, %v3489_v35  ;;  %v6695_v31 = vmul.u32.u64.high %v3494_v63, %v3489_v35, %v6694_v11  ;;  %v3120_v50 = vsub.s32 4, %v6408_v29  ;;  %v3217_v34 = vand.u32 2147483647, %v3216_v61  ;;  %v8634_v35 = vld [vmem:[#allocation15_spill] sm:$0xff] }
 0x2a8   :  { %vm6689_vm13 = vcmp.le.f32.partialorder %v8627_v27, 0.7853982  ;;  %v6699_v12 = vmul.u32.u64.low %v3494_v63, %v3493_v58  ;;  %v6700_v48 = vmul.u32.u64.high %v3494_v63, %v3493_v58, %v6699_v12  ;;  %v3016_v0 = vsel %vm2933_vm6, %v3015_v26, %v6638_v25  ;;  %v8635_v27 = vld [vmem:[#allocation6_spill] sm:$0xff] }
 0x2a9   :  { %v8629_v28 = vsel %vm6689_vm13, 4294967295, %v8628_v28  ;;  %v3118_v8 = vxor.u32 2147483648, %v3117_v32  ;;  %v3485_v39 = vsel %vm3479_vm11, %v3482_v30, %v3484_v57  ;;  %v3552_v19 = vand.u32 2139095040, %v6683_v2  ;;  %v8637_v12 = vld [vmem:[#allocation17_spill] sm:$0xff] }
 0x2aa   :  { %8630 = vst [vmem:[#allocation36_spill] sm:$0xff] %v8629_v28  ;;  %v3219_v3 = vcvt.s32.f32 %v3212_v47  ;;  %v6707_v40 = vsub.s32 %v3403_v10, %v3406_v38  ;;  %v2634_v44 = vadd.f32 %v6619_v49, %v6206_v1  ;;  %v6713_v61 = vadd.f32 %v6623_v7, %v6204_v52 }
 0x2ab   :  { %v3017_v58 = vsub.s32 4, %v6390_v24  ;;  %v4629_v33 = vadd.s32 4294967294, %v3308_v41  ;;  %v3504_v25 = vadd.s32 1, %v6695_v31  ;;  %v3553_v26 = vshrl.u32 %v3552_v19, 23 }
 0x2ac   :  { %8631 = vst [vmem:[#allocation38_spill] sm:$0xff] %v6713_v61  ;;  %v3019_v9 = vsel %vm6673_vm9, %v6221_v60, %v3016_v0  ;;  %v3220_v47 = vmul.f32 %v3219_v3, %v3217_v34  ;;  %v3501_v10 = vmul.u32 %v3494_v63, %v3485_v39  ;;  %vm3503_vm14 = vc.u32 %v6700_v48, %v6694_v11  ;;  %v8639_v39 = vld [vmem:[#allocation13_spill] sm:$0xff] }
 0x2ad   :  { %2667 = vrot.lane.b32.xlu1 %v6713_v61, %s5248_s4  ;;  %v3119_v49 = vsel %vm3036_vm10, %v3118_v8, %v3117_v32  ;;  %v3505_v41 = vsel %vm3503_vm14, %v3504_v25, %v6695_v31  ;;  %v4639_v7 = vadd.s32 4294967169, %v3553_v26  ;;  %v6727_v38 = vmul.f32 %v2634_v44, %v2634_v44  ;;  %v8636_v31 = vld [vmem:[#allocation16_spill] sm:$0xff]  ;;  %v6759_v26 = vpop.f32.mrb[25].mxu1 }
 0x2ae   :  { %v6732_v30 = vsel %vm3036_vm10, %v3120_v50, %v6408_v29  ;;  %v3409_v63 = vsub.s32 0, %v6707_v40  ;;  %v3506_v57 = vadd.s32 %v3505_v41, %v3501_v10  ;;  %v6737_v22 = vadd.f32 %v8634_v35, %v6319_v54  ;;  %8640 = vst [vmem:[#allocation42_spill] sm:$0xff] %v6759_v26  ;;  %v6761_v10 = vpop.f32.mrb[25].mxu0 }
 0x2af   :  { %8632 = vst [vmem:[#allocation39_spill] sm:$0xff] %v6727_v38  ;;  %8633 = vst [vmem:[#allocation40_spill] sm:$0xff] %v6732_v30  ;;  %v3223_v34 = vsub.s32 4, %v8635_v27  ;;  %vm4630_vm15 = vcmp.lt.s32.totalorder %v4629_v33, 0  ;;  %v3559_v32 = vadd.s32 1, %v4639_v7  ;;  %v6742_v0 = vadd.f32 %v8637_v12, %v8636_v31  ;;  %2777 = vrot.lane.b32.xlu0 %v6727_v38, %s5248_s4  ;;  %v6778_v31 = vpop.f32.mrb[26].mxu1 }
 0x2b0   :  { %5151 = vcosq.f32 %v3019_v9  ;;  %v3122_v29 = vsel %vm6689_vm13, %v6237_v46, %v3119_v49  ;;  %v3221_v50 = vxor.u32 2147483648, %v3220_v47  ;;  %v3507_v8 = vadd.s32 536870912, %v3506_v57  ;;  %8641 = vst [vmem:[#allocation43_spill] sm:$0xff] %v6761_v10  ;;  %8643 = vst [vmem:[#allocation15_spill] sm:$0xff] %v6778_v31 }
 0x2b1   :  { %v6752_v54 = vsel %vm2933_vm6, %v3017_v58, %v6390_v24  ;;  %5153 = vsinq.f32 %v3019_v9  ;;  %vm3139_vm0 = vcmp.lt.s32.totalorder %v8639_v39, 0  ;;  %vm3560_vm1 = vcmp.gt.s32.totalorder %v3559_v32, 0 }
 0x2b2   :  { %8638 = vst [vmem:[#allocation41_spill] sm:$0xff] %v6752_v54  ;;  %v6755_v19 = vsel %vm4630_vm15, 0, %v4629_v33  ;;  %v4632_v3 = vmin.u32 %v3409_v63, %v6707_v40  ;;  %v8375_v44 = vand.u32 2147483647, %v6683_v2  ;;  %v3561_v25 = vsel %vm3560_vm1, %v3559_v32, 0 }
 0x2b3   :  { %5155 = vcosq.f32 %v3122_v29  ;;  %v6767_v58 = vsel %vm3139_vm0, %v3223_v34, %v8635_v27  ;;  %v3563_v9 = vand.u32 31, %v3561_v25  ;;  %v6769_v33 = vsel %vm3139_vm0, %v3221_v50, %v3220_v47  ;;  %v6780_v27 = vpop.f32.mrb[26].mxu0 }
 0x2b4   :  { %8642 = vst [vmem:[#allocation44_spill] sm:$0xff] %v6767_v58  ;;  %5157 = vsinq.f32 %v3122_v29  ;;  %v3296_v49 = vadd.s32 %v6522_v18, %v6520_v42  ;;  %v6773_v41 = vshrl.u32 %v3507_v8, 30  ;;  %v3312_v7 = vsub.s32 32, %v6755_v19  ;;  %8644 = vst [vmem:[#allocation6_spill] sm:$0xff] %v6780_v27 }
 0x2b5   :  { %v3316_v63 = vsub.s32 4294967266, %v6755_v19  ;;  %v3564_v35 = vsub.s32 32, %v3563_v9  ;;  %v2906_v32 = vmul.f32 30.0, %v6713_v61  ;;  %v3411_v34 = vclz %v4632_v3 }
 0x2b6   :  { %v3556_v47 = vand.u32 8388607, %v8375_v44  ;;  %v3562_v12 = vshrl.u32 %v3561_v25, 5  ;;  %v3566_v18 = vshll.u32 %v8603_v13, %v3563_v9  ;;  %v3569_v29 = vshll.u32 %v8614_v36, %v3563_v9 }
 0x2b7   :  { %v3567_v42 = vshrl.u32 %v8614_v36, %v3564_v35  ;;  %v3570_v50 = vshrl.u32 %v8597_v59, %v3564_v35  ;;  %v3573_v8 = vshrl.u32 %v8598_v56, %v3564_v35  ;;  %v3509_v24 = vshll.u32 %v6773_v41, 30 }
 0x2b8   :  { %v3572_v61 = vshll.u32 %v8597_v59, %v3563_v9  ;;  %v3575_v3 = vshll.u32 %v8598_v56, %v3563_v9  ;;  %v3576_v38 = vshrl.u32 %v8615_v51, %v3564_v35  ;;  %v3317_v44 = vadd.s32 127, %v3316_v63 }
 0x2b9   :  { %v3568_v25 = vor.u32 %v3567_v42, %v3566_v18  ;;  %v3571_v46 = vor.u32 %v3570_v50, %v3569_v29  ;;  %v6794_v58 = vadd.f32 %v2906_v32, %v6212_v55  ;;  %v3578_v17 = vshll.u32 %v8615_v51, %v3563_v9 }
 0x2ba   :  { %v6796_v30 = vpop.eup %5151  ;;  %v3574_v28 = vor.u32 %v3573_v8, %v3572_v61  ;;  %v3577_v60 = vor.u32 %v3576_v38, %v3575_v3  ;;  %v3579_v54 = vshrl.u32 %v8616_v21, %v3564_v35  ;;  %v3313_v31 = vshll.u32 %v6628_v62, %v6755_v19 }
 0x2bb   :  { %8645 = vst [vmem:[#allocation16_spill] sm:$0xff] %v6794_v58  ;;  %8646 = vst [vmem:[#allocation17_spill] sm:$0xff] %v6796_v30  ;;  %v6800_v27 = vpop.eup %5153  ;;  %v3314_v10 = vshrl.u32 %v3296_v49, %v3312_v7  ;;  %v4633_v63 = vadd.s32 4294967294, %v3411_v34  ;;  %v3557_v18 = vor.u32 8388608, %v3556_v47  ;;  %v6804_v42 = vsub.s32 %v3506_v57, %v3509_v24 }
 0x2bc   :  { %8647 = vst [vmem:[#allocation45_spill] sm:$0xff] %v6800_v27  ;;  %v3580_v32 = vor.u32 %v3579_v54, %v3578_v17  ;;  %vm3581_vm2 = vcmp.lt.s32.totalorder %v3562_v12, 1  ;;  %vm3584_vm3 = vcmp.lt.s32.totalorder %v3562_v12, 4  ;;  %v8649_v61 = vand.u32 2147483647, %v8639_v39 }
 0x2bd   :  { %v6806_v29 = vpop.eup %5155  ;;  %v8650_v38 = vmov 0  ;;  %vm3583_vm5 = vcmp.lt.s32.totalorder %v3562_v12, 3  ;;  %v3589_v9 = vsel %vm3581_vm2, %v3568_v25, %v3571_v46  ;;  %v3590_v62 = vsel %vm3584_vm3, %v3577_v60, 920167782 }
 0x2be   :  { %8648 = vst [vmem:[#allocation46_spill] sm:$0xff] %v6806_v29  ;;  %vm6810_vm4 = vcmp.le.f32.partialorder %v8649_v61, 0.7853982  ;;  %v3655_v19 = vand.u32 2139095040, %v6794_v58  ;;  %v6816_v49 = vpop.eup %5157  ;;  %v3318_v57 = vshll.u32 %v3317_v44, 23  ;;  %v3591_v54 = vsel %vm3583_vm5, %v3574_v28, %v3590_v62 }
 0x2bf   :  { %v8651_v38 = vsel %vm6810_vm4, 4294967295, %v8650_v38  ;;  %8653 = vst [vmem:[#allocation48_spill] sm:$0xff] %v6816_v49  ;;  %v3586_v17 = vsel %vm3584_vm3, %v3574_v28, 2102212464  ;;  %v3593_v24 = vsel %vm3581_vm2, %v3571_v46, %v3574_v28  ;;  %vm4634_vm6 = vcmp.lt.s32.totalorder %v4633_v63, 0 }
 0x2c0   :  { %8652 = vst [vmem:[#allocation47_spill] sm:$0xff] %v8651_v38  ;;  %v3565_v7 = vshrl.u32 %v8603_v13, %v3564_v35  ;;  %vm3582_vm7 = vcmp.lt.s32.totalorder %v3562_v12, 2  ;;  %v3594_v34 = vsel %vm3584_vm3, %v3580_v32, 1326507024  ;;  %v3512_v47 = vsub.s32 0, %v6804_v42 }
 0x2c1   :  { %v3592_v50 = vsel %vm3582_vm7, %v3589_v9, %v3591_v54  ;;  %v3595_v8 = vsel %vm3583_vm5, %v3577_v60, %v3594_v34  ;;  %v3597_v3 = vshll.u32 %v3557_v18, 8  ;;  %v3587_v44 = vsel %vm3583_vm5, %v3571_v46, %v3586_v17  ;;  %v8657_v17 = vld [vmem:[#allocation22_spill] sm:$0xff] }
 0x2c2   :  { %v3585_v61 = vsel %vm3581_vm2, %v3565_v7, %v3568_v25  ;;  %v3596_v62 = vsel %vm3582_vm7, %v3593_v24, %v3595_v8  ;;  %v3656_v29 = vshrl.u32 %v3655_v19, 23  ;;  %v3315_v28 = vor.u32 %v3314_v10, %v3313_v31  ;;  %v8656_v19 = vld [vmem:[#allocation20_spill] sm:$0xff]  ;;  %v8658_v24 = vld [vmem:[#allocation23_spill] sm:$0xff] }
 0x2c3   :  { %v3319_v49 = vor.u32 4788187, %v3318_v57  ;;  %v6828_v30 = vsel %vm4634_vm6, 0, %v4633_v63  ;;  %v6830_v32 = vmul.u32.u64.low %v3597_v3, %v3596_v62  ;;  %v6831_v27 = vmul.u32.u64.high %v3597_v3, %v3596_v62, %v6830_v32  ;;  %v8655_v63 = vld [vmem:[#allocation19_spill] sm:$0xff] }
 0x2c4   :  { %v6833_v9 = vmul.u32.u64.low %v3597_v3, %v3592_v50  ;;  %v6834_v54 = vmul.u32.u64.high %v3597_v3, %v3592_v50, %v6833_v9  ;;  %v4636_v60 = vmin.u32 %v3512_v47, %v6804_v42  ;;  %v3588_v46 = vsel %vm3582_vm7, %v3585_v61, %v3587_v44 }
 0x2c5   :  { %v8386_v25 = vand.u32 2147483647, %v6794_v58  ;;  %v4643_v18 = vadd.s32 4294967169, %v3656_v29  ;;  %v2636_v10 = vadd.f32 %v6737_v22, %v6206_v1  ;;  %v6844_v31 = vadd.f32 %v6742_v0, %v6204_v52 }
 0x2c6   :  { %v4744_v57 = vadd.f32 %v8656_v19, %v8655_v63  ;;  %v4745_v7 = vadd.f32 %v8658_v24, %v8657_v17  ;;  %v6854_v12 = vsel %vm6810_vm4, %v8639_v39, %v6769_v33  ;;  %v3320_v29 = vand.u32 2147483647, %v3319_v49  ;;  %v6866_v49 = vpop.f32.mrb[27].mxu1  ;;  %v8663_v63 = vld [vmem:[#allocation32_spill] sm:$0xff]  ;;  %v8664_v19 = vld [vmem:[#allocation35_spill] sm:$0xff] }
 0x2c7   :  { %8654 = vst [vmem:[#allocation49_spill] sm:$0xff] %v6844_v31  ;;  %v3399_v22 = vadd.s32 %v6607_v6, %v6604_v20  ;;  %v3662_v34 = vadd.s32 1, %v4643_v18  ;;  %v3419_v0 = vsub.s32 4294967266, %v6828_v30  ;;  %vm3606_vm8 = vc.u32 %v6831_v27, %v6833_v9  ;;  %2669 = vrot.lane.b32.xlu0 %v6844_v31, %s5248_s4  ;;  %8660 = vst [vmem:[#allocation20_spill] sm:$0xff] %v6866_v49  ;;  %v6868_v20 = vpop.f32.mrb[27].mxu0 }
 0x2c8   :  { %v3607_v47 = vadd.s32 1, %v6834_v54  ;;  %v6862_v50 = vmul.f32 %v2636_v10, %v2636_v10  ;;  %v3322_v8 = vcvt.s32.f32 %v3315_v28  ;;  %v3514_v33 = vclz %v4636_v60  ;;  %8661 = vst [vmem:[#allocation22_spill] sm:$0xff] %v6868_v20  ;;  %v6890_v24 = vpop.f32.mrb[28].mxu0 }
 0x2c9   :  { %v3604_v61 = vmul.u32 %v3597_v3, %v3588_v46  ;;  %vm3663_vm10 = vcmp.gt.s32.totalorder %v3662_v34, 0  ;;  %v3659_v44 = vand.u32 8388607, %v8386_v25  ;;  %v2638_v32 = vadd.f32 %v4744_v57, %v6206_v1  ;;  %v6888_v57 = vpop.f32.mrb[28].mxu1  ;;  %8666 = vst [vmem:[#allocation35_spill] sm:$0xff] %v6890_v24 }
 0x2ca   :  { %8659 = vst [vmem:[#allocation19_spill] sm:$0xff] %v6862_v50  ;;  %v3608_v6 = vsel %vm3606_vm8, %v3607_v47, %v6834_v54  ;;  %v3664_v62 = vsel %vm3663_vm10, %v3662_v34, 0  ;;  %2779 = vrot.lane.b32.xlu1 %v6862_v50, %s5248_s4  ;;  %v6876_v18 = vmul.f32 %v3322_v8, %v3320_v29  ;;  %v3415_v46 = vsub.s32 32, %v6828_v30  ;;  %8665 = vst [vmem:[#allocation32_spill] sm:$0xff] %v6888_v57 }
 0x2cb   :  { %v3609_v28 = vadd.s32 %v3608_v6, %v3604_v61  ;;  %v3666_v60 = vand.u32 31, %v3664_v62  ;;  %v6880_v10 = vadd.s32 127, %v3419_v0  ;;  %v6882_v54 = vmul.f32 %v2638_v32, %v2638_v32 }
 0x2cc   :  { %v6886_v17 = vadd.f32 %v8664_v19, %v8663_v63  ;;  %v4637_v29 = vadd.s32 4294967294, %v3514_v33  ;;  %v6893_v8 = vadd.f32 %v4745_v7, %v6204_v52  ;;  %v3660_v61 = vor.u32 8388608, %v3659_v44 }
 0x2cd   :  { %8662 = vst [vmem:[#allocation23_spill] sm:$0xff] %v6882_v54  ;;  %v3610_v34 = vadd.s32 536870912, %v3609_v28  ;;  %v3667_v47 = vsub.s32 32, %v3666_v60  ;;  %v3665_v6 = vshrl.u32 %v3664_v62, 5  ;;  %v3669_v0 = vshll.u32 %v8603_v13, %v3666_v60  ;;  %2781 = vrot.lane.b32.xlu0 %v6882_v54, %s5248_s4 }
 0x2ce   :  { %8667 = vst [vmem:[#allocation50_spill] sm:$0xff] %v6893_v8  ;;  %v3672_v32 = vshll.u32 %v8614_v36, %v3666_v60  ;;  %v3675_v33 = vshll.u32 %v8597_v59, %v3666_v60  ;;  %v3678_v25 = vshll.u32 %v8598_v56, %v3666_v60  ;;  %2671 = vrot.lane.b32.xlu1 %v6893_v8, %s5248_s4  ;;  %v3421_v20 = vshll.u32 %v6880_v10, 23 }
 0x2cf   :  { %v6899_v63 = vshrl.u32 %v3610_v34, 30  ;;  %v3670_v19 = vshrl.u32 %v8614_v36, %v3667_v47  ;;  %v3673_v7 = vshrl.u32 %v8597_v59, %v3667_v47  ;;  %v3676_v44 = vshrl.u32 %v8598_v56, %v3667_v47 }
 0x2d0   :  { %v3679_v62 = vshrl.u32 %v8615_v51, %v3667_v47  ;;  %v3682_v3 = vshrl.u32 %v8616_v21, %v3667_v47  ;;  %v3416_v34 = vshll.u32 %v6707_v40, %v6828_v30  ;;  %v3681_v50 = vshll.u32 %v8615_v51, %v3666_v60  ;;  %v8668_v30 = vld [vmem:[#allocation26_spill] sm:$0xff] }
 0x2d1   :  { %v3612_v35 = vshll.u32 %v6899_v63, 30  ;;  %v3671_v54 = vor.u32 %v3670_v19, %v3669_v0  ;;  %v3417_v39 = vshrl.u32 %v3399_v22, %v3415_v46  ;;  %v3674_v38 = vor.u32 %v3673_v7, %v3672_v32 }
 0x2d2   :  { %v3677_v24 = vor.u32 %v3676_v44, %v3675_v33  ;;  %v3680_v57 = vor.u32 %v3679_v62, %v3678_v25  ;;  %v3683_v26 = vor.u32 %v3682_v3, %v3681_v50  ;;  %v2907_v58 = vmul.f32 30.0, %v6844_v31 }
 0x2d3   :  { %v6915_v49 = vsub.s32 %v3609_v28, %v3612_v35  ;;  %vm4638_vm11 = vcmp.lt.s32.totalorder %v4637_v29, 0  ;;  %v3668_v43 = vshrl.u32 %v8603_v13, %v3667_v47  ;;  %vm3684_vm12 = vcmp.lt.s32.totalorder %v3665_v6, 1 }
 0x2d4   :  { %v3700_v40 = vshll.u32 %v3660_v61, 8  ;;  %vm3242_vm14 = vcmp.lt.s32.totalorder %v8668_v30, 0  ;;  %vm3686_vm15 = vcmp.lt.s32.totalorder %v3665_v6, 3  ;;  %vm3687_vm0 = vcmp.lt.s32.totalorder %v3665_v6, 4 }
 0x2d5   :  { %v3615_v60 = vsub.s32 0, %v6915_v49  ;;  %v3692_v25 = vsel %vm3684_vm12, %v3671_v54, %v3674_v38  ;;  %v3689_v22 = vsel %vm3687_vm0, %v3677_v24, 2102212464  ;;  %v3693_v46 = vsel %vm3687_vm0, %v3680_v57, 920167782 }
 0x2d6   :  { %v3696_v35 = vsel %vm3684_vm12, %v3674_v38, %v3677_v24  ;;  %v3697_v50 = vsel %vm3687_vm0, %v3683_v26, 1326507024  ;;  %vm3685_vm1 = vcmp.lt.s32.totalorder %v3665_v6, 2  ;;  %v3694_v3 = vsel %vm3686_vm15, %v3677_v24, %v3693_v46 }
 0x2d7   :  { %v3698_v28 = vsel %vm3686_vm15, %v3680_v57, %v3697_v50  ;;  %v6926_v10 = vadd.f32 %v2907_v58, %v6212_v55  ;;  %v3517_v47 = vsel %vm4638_vm11, 0, %v4637_v29  ;;  %v3688_v61 = vsel %vm3684_vm12, %v3668_v43, %v3671_v54  ;;  %v8674_v50 = vld [vmem:[#allocation5_spill] sm:$0xff] }
 0x2d8   :  { %v3695_v0 = vsel %vm3685_vm1, %v3692_v25, %v3694_v3  ;;  %v3699_v32 = vsel %vm3685_vm1, %v3696_v35, %v3698_v28  ;;  %v8669_v19 = vand.u32 2147483647, %v8668_v30  ;;  %v8670_v26 = vmov 0  ;;  %v8676_v3 = vld [vmem:[#allocation21_spill] sm:$0xff] }
 0x2d9   :  { %v4640_v24 = vmin.u32 %v3615_v60, %v6915_v49  ;;  %v3690_v57 = vsel %vm3686_vm15, %v3674_v38, %v3689_v22  ;;  %v6940_v58 = vmul.u32.u64.low %v3700_v40, %v3699_v32  ;;  %v6941_v33 = vmul.u32.u64.high %v3700_v40, %v3699_v32, %v6940_v58  ;;  %v8673_v60 = vld [vmem:[#allocation3_spill] sm:$0xff] }
 0x2da   :  { %vm6934_vm2 = vcmp.le.f32.partialorder %v8669_v19, 0.7853982  ;;  %v3324_v29 = vxor.u32 2147483648, %v6876_v18  ;;  %v3418_v43 = vor.u32 %v3417_v39, %v3416_v34  ;;  %v3422_v44 = vor.u32 4788187, %v3421_v20  ;;  %v8675_v39 = vld [vmem:[#allocation25_spill] sm:$0xff] }
 0x2db   :  { %v8671_v26 = vsel %vm6934_vm2, 4294967295, %v8670_v26  ;;  %v6944_v54 = vmul.u32.u64.low %v3700_v40, %v3695_v0  ;;  %v6945_v7 = vmul.u32.u64.high %v3700_v40, %v3695_v0, %v6944_v54  ;;  %v3518_v62 = vsub.s32 32, %v3517_v47 }
 0x2dc   :  { %8672 = vst [vmem:[#allocation51_spill] sm:$0xff] %v8671_v26  ;;  %v3522_v25 = vsub.s32 4294967266, %v3517_v47  ;;  %v3758_v46 = vand.u32 2139095040, %v6926_v10  ;;  %v3691_v35 = vsel %vm3685_vm1, %v3688_v61, %v3690_v57  ;;  %v4747_v38 = vadd.f32 %v8674_v50, %v8673_v60  ;;  %v6974_v50 = vpop.f32.mrb[29].mxu1 }
 0x2dd   :  { %v6954_v22 = vadd.f32 %v6556_v4, %v6554_v14  ;;  %v6958_v34 = vadd.f32 %v8675_v39, %v6568_v23  ;;  %vm3345_vm3 = vcmp.lt.s32.totalorder %v8676_v3, 0  ;;  %v3617_v20 = vclz %v4640_v24 }
 0x2de   :  { %vm3709_vm5 = vc.u32 %v6941_v33, %v6944_v54  ;;  %v3759_v28 = vshrl.u32 %v3758_v46, 23  ;;  %v2908_v6 = vmul.f32 30.0, %v6893_v8  ;;  %v3325_v61 = vsel %vm3242_vm14, %v3324_v29, %v6876_v18  ;;  %v6976_v18 = vpop.f32.mrb[29].mxu0 }
 0x2df   :  { %v3502_v14 = vadd.s32 %v6694_v11, %v6700_v48  ;;  %v3710_v4 = vadd.s32 1, %v6945_v7  ;;  %v2640_v23 = vadd.f32 %v6886_v17, %v6206_v1  ;;  %v3423_v0 = vand.u32 2147483647, %v3422_v44 }
 0x2e0   :  { %v3523_v32 = vadd.s32 127, %v3522_v25  ;;  %v3707_v19 = vmul.u32 %v3700_v40, %v3691_v35  ;;  %v4647_v24 = vadd.s32 4294967169, %v3759_v28  ;;  %v3425_v57 = vcvt.s32.f32 %v3418_v43  ;;  %v6994_v35 = vpop.f32.mrb[30].mxu1 }
 0x2e1   :  { %v3520_v58 = vshrl.u32 %v3502_v14, %v3518_v62  ;;  %v3711_v46 = vsel %vm3709_vm5, %v3710_v4, %v6945_v7  ;;  %v8393_v60 = vand.u32 2147483647, %v6926_v10  ;;  %v4641_v11 = vadd.s32 4294967294, %v3617_v20  ;;  %8680 = vst [vmem:[#allocation52_spill] sm:$0xff] %v6994_v35  ;;  %v6996_v20 = vpop.f32.mrb[30].mxu0 }
 0x2e2   :  { %v3712_v48 = vadd.s32 %v3711_v46, %v3707_v19  ;;  %v3765_v29 = vadd.s32 1, %v4647_v24  ;;  %v6979_v39 = vadd.f32 %v2908_v6, %v6212_v55  ;;  %v6984_v17 = vsel %vm6934_vm2, %v8668_v30, %v3325_v61  ;;  %8681 = vst [vmem:[#allocation53_spill] sm:$0xff] %v6996_v20 }
 0x2e3   :  { %v3519_v40 = vshll.u32 %v6804_v42, %v3517_v47  ;;  %v6987_v43 = vmul.f32 %v2640_v23, %v2640_v23  ;;  %v6990_v7 = vadd.f32 %v4747_v38, %v6204_v52  ;;  %v6992_v44 = vmul.f32 %v3425_v57, %v3423_v0 }
 0x2e4   :  { %8677 = vst [vmem:[#allocation3_spill] sm:$0xff] %v6979_v39  ;;  %v3524_v62 = vshll.u32 %v3523_v32, 23  ;;  %v3713_v25 = vadd.s32 536870912, %v3712_v48  ;;  %vm3766_vm6 = vcmp.gt.s32.totalorder %v3765_v29, 0  ;;  %5159 = vcosq.f32 %v6854_v12 }
 0x2e5   :  { %8678 = vst [vmem:[#allocation5_spill] sm:$0xff] %v6987_v43  ;;  %8679 = vst [vmem:[#allocation25_spill] sm:$0xff] %v6990_v7  ;;  %v6999_v28 = vor.u32 %v3520_v58, %v3519_v40  ;;  %v3762_v42 = vand.u32 8388607, %v8393_v60  ;;  %v3767_v47 = vsel %vm3766_vm6, %v3765_v29, 0  ;;  %2673 = vrot.lane.b32.xlu0 %v6990_v7, %s5248_s4  ;;  %2783 = vrot.lane.b32.xlu1 %v6987_v43, %s5248_s4  ;;  %5161 = vsinq.f32 %v6854_v12 }
 0x2e6   :  { %vm4642_vm7 = vcmp.lt.s32.totalorder %v4641_v11, 0  ;;  %v7008_v38 = vshrl.u32 %v3713_v25, 30  ;;  %v3861_v6 = vand.u32 2139095040, %v6979_v39  ;;  %v8682_v61 = vsub.s32 4, %v6589_v37 }
 0x2e7   :  { %5163 = vcosq.f32 %v6984_v17  ;;  %v8684_v4 = vsub.s32 4, %v6667_v15  ;;  %v3769_v23 = vand.u32 31, %v3767_v47  ;;  %v7027_v32 = vor.u32 4788187, %v3524_v62 }
 0x2e8   :  { %v7016_v14 = vsel %vm3242_vm14, %v8682_v61, %v6589_v37  ;;  %v3605_v19 = vadd.s32 %v6833_v9, %v6831_v27  ;;  %v3715_v37 = vshll.u32 %v7008_v38, 30  ;;  %v7033_v57 = vsel %vm4642_vm7, 0, %v4641_v11 }
 0x2e9   :  { %8683 = vst [vmem:[#allocation54_spill] sm:$0xff] %v7016_v14  ;;  %v7024_v12 = vsel %vm3345_vm3, %v8684_v4, %v6667_v15  ;;  %v3763_v58 = vor.u32 8388608, %v3762_v42  ;;  %v3770_v46 = vsub.s32 32, %v3769_v23  ;;  %v3772_v15 = vshll.u32 %v8603_v13, %v3769_v23 }
 0x2ea   :  { %8685 = vst [vmem:[#allocation55_spill] sm:$0xff] %v7024_v12  ;;  %v7035_v29 = vsub.s32 %v3712_v48, %v3715_v37  ;;  %v3775_v40 = vshll.u32 %v8614_v36, %v3769_v23  ;;  %v3862_v25 = vshrl.u32 %v3861_v6, 23  ;;  %v3778_v27 = vshll.u32 %v8597_v59, %v3769_v23 }
 0x2eb   :  { %v3773_v62 = vshrl.u32 %v8614_v36, %v3770_v46  ;;  %v3776_v61 = vshrl.u32 %v8597_v59, %v3770_v46  ;;  %v3779_v9 = vshrl.u32 %v8598_v56, %v3770_v46  ;;  %v3768_v4 = vshrl.u32 %v3767_v47, 5 }
 0x2ec   :  { %v3781_v11 = vshll.u32 %v8598_v56, %v3769_v23  ;;  %v3782_v42 = vshrl.u32 %v8615_v51, %v3770_v46  ;;  %v3784_v48 = vshll.u32 %v8615_v51, %v3769_v23  ;;  %v3785_v6 = vshrl.u32 %v8616_v21, %v3770_v46 }
 0x2ed   :  { %v3774_v37 = vor.u32 %v3773_v62, %v3772_v15  ;;  %v3777_v60 = vor.u32 %v3776_v61, %v3775_v40  ;;  %v3780_v24 = vor.u32 %v3779_v9, %v3778_v27  ;;  %v3526_v0 = vand.u32 2147483647, %v7027_v32 }
 0x2ee   :  { %v3718_v43 = vsub.s32 0, %v7035_v29  ;;  %v3783_v8 = vor.u32 %v3782_v42, %v3781_v11  ;;  %v7050_v30 = vpop.eup %5159  ;;  %v3621_v47 = vsub.s32 32, %v7033_v57  ;;  %v3625_v12 = vsub.s32 4294967266, %v7033_v57 }
 0x2ef   :  { %8686 = vst [vmem:[#allocation56_spill] sm:$0xff] %v7050_v30  ;;  %v3786_v26 = vor.u32 %v3785_v6, %v3784_v48  ;;  %v4651_v23 = vadd.s32 4294967169, %v3862_v25  ;;  %v7054_v15 = vpop.eup %5161  ;;  %v3771_v40 = vshrl.u32 %v8603_v13, %v3770_v46  ;;  %vm3787_vm8 = vcmp.lt.s32.totalorder %v3768_v4, 1 }
 0x2f0   :  { %8687 = vst [vmem:[#allocation57_spill] sm:$0xff] %v7054_v15  ;;  %vm3790_vm10 = vcmp.lt.s32.totalorder %v3768_v4, 4  ;;  %v3803_v32 = vshll.u32 %v3763_v58, 8  ;;  %vm3789_vm11 = vcmp.lt.s32.totalorder %v3768_v4, 3  ;;  %v3795_v27 = vsel %vm3787_vm8, %v3774_v37, %v3777_v60 }
 0x2f1   :  { %v7057_v62 = vpop.eup %5163  ;;  %v3792_v61 = vsel %vm3790_vm10, %v3780_v24, 2102212464  ;;  %v3796_v9 = vsel %vm3790_vm10, %v3783_v8, 920167782  ;;  %v4644_v11 = vmin.u32 %v3718_v43, %v7035_v29  ;;  %vm3788_vm12 = vcmp.lt.s32.totalorder %v3768_v4, 2 }
 0x2f2   :  { %8688 = vst [vmem:[#allocation58_spill] sm:$0xff] %v7057_v62  ;;  %v3797_v42 = vsel %vm3789_vm11, %v3780_v24, %v3796_v9  ;;  %v3799_v31 = vsel %vm3787_vm8, %v3777_v60, %v3780_v24  ;;  %v3791_v48 = vsel %vm3787_vm8, %v3771_v40, %v3774_v37  ;;  %v3800_v6 = vsel %vm3790_vm10, %v3786_v26, 1326507024 }
 0x2f3   :  { %v3798_v25 = vsel %vm3788_vm12, %v3795_v27, %v3797_v42  ;;  %v3868_v14 = vadd.s32 1, %v4651_v23  ;;  %v3793_v46 = vsel %vm3789_vm11, %v3777_v60, %v3792_v61  ;;  %v3801_v30 = vsel %vm3789_vm11, %v3783_v8, %v3800_v6 }
 0x2f4   :  { %v7061_v15 = vmul.u32.u64.low %v3803_v32, %v3798_v25  ;;  %v7062_v58 = vmul.u32.u64.high %v3803_v32, %v3798_v25, %v7061_v15  ;;  %v3623_v62 = vshrl.u32 %v3605_v19, %v3621_v47  ;;  %v3626_v20 = vadd.s32 127, %v3625_v12 }
 0x2f5   :  { %v3802_v35 = vsel %vm3788_vm12, %v3799_v31, %v3801_v30  ;;  %vm3869_vm14 = vcmp.gt.s32.totalorder %v3868_v14, 0  ;;  %v3622_v43 = vshll.u32 %v6915_v49, %v7033_v57  ;;  %v3720_v24 = vclz %v4644_v11 }
 0x2f6   :  { %v8689_v37 = vand.u32 2147483647, %v6979_v39  ;;  %v3870_v26 = vsel %vm3869_vm14, %v3868_v14, 0  ;;  %v3794_v60 = vsel %vm3788_vm12, %v3791_v48, %v3793_v46  ;;  %5165 = vsinq.f32 %v6984_v17  ;;  %v7101_v48 = vpop.f32.mrb[31].mxu0 }
 0x2f7   :  { %v7071_v8 = vmul.u32.u64.low %v3803_v32, %v3802_v35  ;;  %v7072_v23 = vmul.u32.u64.high %v3803_v32, %v3802_v35, %v7071_v8  ;;  %v3872_v61 = vand.u32 31, %v3870_v26  ;;  %v8690_v31 = vxor.u32 2147483648, %v6992_v44 }
 0x2f8   :  { %v3865_v40 = vand.u32 8388607, %v8689_v37  ;;  %v3813_v12 = vadd.s32 1, %v7062_v58  ;;  %v8691_v14 = vcvt.s32.f32 %v6999_v28  ;;  %v7088_v35 = vor.u32 %v3623_v62, %v3622_v43 }
 0x2f9   :  { %v7080_v30 = vsel %vm3345_vm3, %v8690_v31, %v6992_v44  ;;  %v3627_v57 = vshll.u32 %v3626_v20, 23  ;;  %v3873_v4 = vsub.s32 32, %v3872_v61  ;;  %v4645_v17 = vadd.s32 4294967294, %v3720_v24 }
 0x2fa   :  { %v7086_v19 = vmul.f32 %v8691_v14, %v3526_v0  ;;  %v3810_v47 = vmul.u32 %v3803_v32, %v3794_v60  ;;  %v3866_v27 = vor.u32 8388608, %v3865_v40  ;;  %v3871_v9 = vshrl.u32 %v3870_v26, 5  ;;  %v7099_v32 = vpop.f32.mrb[31].mxu1 }
 0x2fb   :  { %vm3812_vm15 = vc.u32 %v7072_v23, %v7061_v15  ;;  %v3875_v44 = vshll.u32 %v8603_v13, %v3872_v61  ;;  %v3876_v11 = vshrl.u32 %v8614_v36, %v3873_v4  ;;  %v3878_v42 = vshll.u32 %v8614_v36, %v3872_v61 }
 0x2fc   :  { %v3814_v28 = vsel %vm3812_vm15, %v3813_v12, %v7062_v58  ;;  %v3879_v0 = vshrl.u32 %v8597_v59, %v3873_v4  ;;  %v3881_v20 = vshll.u32 %v8597_v59, %v3872_v61  ;;  %v3884_v62 = vshll.u32 %v8598_v56, %v3872_v61 }
 0x2fd   :  { %v3815_v25 = vadd.s32 %v3814_v28, %v3810_v47  ;;  %v3877_v6 = vor.u32 %v3876_v11, %v3875_v44  ;;  %v3882_v46 = vshrl.u32 %v8598_v56, %v3873_v4  ;;  %v3885_v43 = vshrl.u32 %v8615_v51, %v3873_v4 }
 0x2fe   :  { %v3880_v24 = vor.u32 %v3879_v0, %v3878_v42  ;;  %v3887_v37 = vshll.u32 %v8615_v51, %v3872_v61  ;;  %v3888_v58 = vshrl.u32 %v8616_v21, %v3873_v4  ;;  %v2909_v40 = vmul.f32 30.0, %v6990_v7 }
 0x2ff   :  { %v3628_v26 = vor.u32 4788187, %v3627_v57  ;;  %v3816_v60 = vadd.s32 536870912, %v3815_v25  ;;  %v3883_v8 = vor.u32 %v3882_v46, %v3881_v20  ;;  %v3886_v31 = vor.u32 %v3885_v43, %v3884_v62 }
 0x300   :  { %v3631_v12 = vcvt.s32.f32 %v7088_v35  ;;  %v3889_v14 = vor.u32 %v3888_v58, %v3887_v37  ;;  %vm3890_vm0 = vcmp.lt.s32.totalorder %v3871_v9, 1  ;;  %v3906_v47 = vshll.u32 %v3866_v27, 8  ;;  %v7118_v42 = vpop.eup %5165 }
 0x301   :  { %v8692_v44 = vand.u32 2147483647, %v8676_v3  ;;  %v8693_v11 = vmov 0  ;;  %vm4646_vm3 = vcmp.lt.s32.totalorder %v4645_v17, 0  ;;  %v7115_v61 = vshrl.u32 %v3816_v60, 30  ;;  %8696 = vst [vmem:[#allocation60_spill] sm:$0xff] %v7118_v42 }
 0x302   :  { %vm3893_vm5 = vcmp.lt.s32.totalorder %v3871_v9, 4  ;;  %v3898_v57 = vsel %vm3890_vm0, %v3877_v6, %v3880_v24  ;;  %vm3448_vm6 = vcmp.lt.s32.totalorder %v6532_v53, 0  ;;  %v3874_v35 = vshrl.u32 %v8603_v13, %v3873_v4 }
 0x303   :  { %vm7111_vm1 = vcmp.le.f32.partialorder %v8692_v44, 0.7853982  ;;  %vm3892_vm7 = vcmp.lt.s32.totalorder %v3871_v9, 3  ;;  %v3895_v27 = vsel %vm3893_vm5, %v3883_v8, 2102212464  ;;  %v3818_v0 = vshll.u32 %v7115_v61, 30 }
 0x304   :  { %v8694_v11 = vsel %vm7111_vm1, 4294967295, %v8693_v11  ;;  %v3899_v28 = vsel %vm3893_vm5, %v3886_v31, 920167782  ;;  %vm3891_vm8 = vcmp.lt.s32.totalorder %v3871_v9, 2  ;;  %v3902_v62 = vsel %vm3890_vm0, %v3880_v24, %v3883_v8 }
 0x305   :  { %8695 = vst [vmem:[#allocation59_spill] sm:$0xff] %v8694_v11  ;;  %v3900_v20 = vsel %vm3892_vm7, %v3883_v8, %v3899_v28  ;;  %v3629_v46 = vand.u32 2147483647, %v3628_v26  ;;  %v3903_v37 = vsel %vm3893_vm5, %v3889_v14, 1326507024  ;;  %v7126_v58 = vadd.f32 %v2909_v40, %v6212_v55 }
 0x306   :  { %v3901_v43 = vsel %vm3891_vm8, %v3898_v57, %v3900_v20  ;;  %v7128_v60 = vsub.s32 %v3815_v25, %v3818_v0  ;;  %v3894_v4 = vsel %vm3890_vm0, %v3874_v35, %v3877_v6  ;;  %v3896_v44 = vsel %vm3892_vm7, %v3880_v24, %v3895_v27  ;;  %v8703_v20 = vld [vmem:[#allocation30_spill] sm:$0xff] }
 0x307   :  { %8697 = vst [vmem:[#allocation61_spill] sm:$0xff] %v7126_v58  ;;  %v3904_v49 = vsel %vm3892_vm7, %v3886_v31, %v3903_v37  ;;  %v7132_v7 = vsel %vm4646_vm3, 0, %v4645_v17  ;;  %v7135_v42 = vmul.u32.u64.low %v3906_v47, %v3901_v43  ;;  %v7136_v8 = vmul.u32.u64.high %v3906_v47, %v3901_v43, %v7135_v42  ;;  %v8709_v37 = vld [vmem:[#allocation16_spill] sm:$0xff] }
 0x308   :  { %v3905_v28 = vsel %vm3891_vm8, %v3902_v62, %v3904_v49  ;;  %v8698_v26 = vand.u32 2147483647, %v6532_v53  ;;  %v8699_v40 = vmov 0  ;;  %v3530_v25 = vxor.u32 2147483648, %v7086_v19 }
 0x309   :  { %v3821_v6 = vsub.s32 0, %v7128_v60  ;;  %v7147_v24 = vmul.u32.u64.low %v3906_v47, %v3905_v28  ;;  %v7148_v31 = vmul.u32.u64.high %v3906_v47, %v3905_v28, %v7147_v24  ;;  %vm3551_vm11 = vcmp.lt.s32.totalorder %v6683_v2, 0 }
 0x30a   :  { %vm7141_vm10 = vcmp.le.f32.partialorder %v8698_v26, 0.7853982  ;;  %v3632_v49 = vmul.f32 %v3631_v12, %v3629_v46  ;;  %v3897_v17 = vsel %vm3891_vm8, %v3894_v4, %v3896_v44  ;;  %v3964_v14 = vand.u32 2139095040, %v7126_v58 }
 0x30b   :  { %v8700_v40 = vsel %vm7141_vm10, 4294967295, %v8699_v40  ;;  %v2642_v57 = vadd.f32 %v6954_v22, %v6206_v1  ;;  %v3728_v35 = vsub.s32 4294967266, %v7132_v7  ;;  %v7158_v27 = vadd.f32 %v6958_v34, %v6204_v52 }
 0x30c   :  { %8701 = vst [vmem:[#allocation62_spill] sm:$0xff] %v8700_v40  ;;  %v4750_v0 = vadd.f32 %v6650_v5, %v6648_v16  ;;  %v4751_v62 = vadd.f32 %v8703_v20, %v6659_v45  ;;  %v3431_v9 = vsel %vm7111_vm1, %v8676_v3, %v7080_v30  ;;  %v3916_v12 = vadd.s32 1, %v7136_v8  ;;  %v8715_v20 = vld [vmem:[#allocation6_spill] sm:$0xff] }
 0x30d   :  { %8702 = vst [vmem:[#allocation63_spill] sm:$0xff] %v7158_v27  ;;  %v3965_v22 = vshrl.u32 %v3964_v14, 23  ;;  %v7169_v46 = vmul.f32 %v2642_v57, %v2642_v57  ;;  %v3531_v34 = vsel %vm3448_vm6, %v3530_v25, %v7086_v19  ;;  %v4648_v43 = vmin.u32 %v3821_v6, %v7128_v60  ;;  %2675 = vrot.lane.b32.xlu1 %v7158_v27, %s5248_s4  ;;  %v8713_v14 = vld [vmem:[#allocation43_spill] sm:$0xff] }
 0x30e   :  { %v3913_v16 = vmul.u32 %v3906_v47, %v3897_v17  ;;  %vm3915_vm12 = vc.u32 %v7148_v31, %v7135_v42  ;;  %v8705_v5 = vand.u32 2147483647, %v6683_v2  ;;  %v8706_v45 = vmov 0  ;;  %v8712_v17 = vld [vmem:[#allocation42_spill] sm:$0xff] }
 0x30f   :  { %8704 = vst [vmem:[#allocation30_spill] sm:$0xff] %v7169_v46  ;;  %v3633_v30 = vxor.u32 2147483648, %v3632_v49  ;;  %vm3654_vm15 = vcmp.lt.s32.totalorder %v8709_v37, 0  ;;  %v3917_v19 = vsel %vm3915_vm12, %v3916_v12, %v7136_v8  ;;  %v4655_v4 = vadd.s32 4294967169, %v3965_v22  ;;  %2785 = vrot.lane.b32.xlu0 %v7169_v46, %s5248_s4  ;;  %v8714_v8 = vld [vmem:[#allocation15_spill] sm:$0xff] }
 0x310   :  { %vm7181_vm14 = vcmp.le.f32.partialorder %v8705_v5, 0.7853982  ;;  %v2644_v47 = vadd.f32 %v4750_v0, %v6206_v1  ;;  %v3729_v44 = vadd.s32 127, %v3728_v35  ;;  %v3918_v28 = vadd.s32 %v3917_v19, %v3913_v16 }
 0x311   :  { %v8707_v45 = vsel %vm7181_vm14, 4294967295, %v8706_v45  ;;  %v8404_v26 = vand.u32 2147483647, %v7126_v58  ;;  %v7192_v25 = vadd.f32 %v4751_v62, %v6204_v52  ;;  %v3971_v6 = vadd.s32 1, %v4655_v4 }
 0x312   :  { %8708 = vst [vmem:[#allocation64_spill] sm:$0xff] %v8707_v45  ;;  %v7194_v24 = vmul.f32 %v2644_v47, %v2644_v47  ;;  %v7198_v57 = vadd.f32 %v8713_v14, %v8712_v17  ;;  %v7202_v0 = vadd.f32 %v8715_v20, %v8714_v8  ;;  %v8716_v35 = vsub.s32 4, %v6773_v41 }
 0x313   :  { %8710 = vst [vmem:[#allocation65_spill] sm:$0xff] %v7192_v25  ;;  %v3823_v62 = vclz %v4648_v43  ;;  %v3919_v22 = vadd.s32 536870912, %v3918_v28  ;;  %v2910_v16 = vmul.f32 30.0, %v7158_v27  ;;  %5167 = vcosq.f32 %v3431_v9  ;;  %2677 = vrot.lane.b32.xlu0 %v7192_v25, %s5248_s4 }
 0x314   :  { %8711 = vst [vmem:[#allocation66_spill] sm:$0xff] %v7194_v24  ;;  %v7209_v12 = vsel %vm3448_vm6, %v8716_v35, %v6773_v41  ;;  %v3534_v5 = vsel %vm7141_vm10, %v6532_v53, %v3531_v34  ;;  %v3635_v19 = vsub.s32 4, %v6899_v63  ;;  %vm3972_vm0 = vcmp.gt.s32.totalorder %v3971_v6, 0  ;;  %2787 = vrot.lane.b32.xlu1 %v7194_v24, %s5248_s4 }
 0x315   :  { %8717 = vst [vmem:[#allocation42_spill] sm:$0xff] %v7209_v12  ;;  %5169 = vsinq.f32 %v3431_v9  ;;  %v3634_v41 = vsel %vm3551_vm11, %v3633_v30, %v3632_v49  ;;  %v3738_v43 = vsub.s32 4, %v7008_v38  ;;  %v7223_v4 = vshrl.u32 %v3919_v22, 30 }
 0x316   :  { %v3724_v47 = vsub.s32 32, %v7132_v7  ;;  %v3730_v34 = vshll.u32 %v3729_v44, 23  ;;  %v3968_v17 = vand.u32 8388607, %v8404_v26  ;;  %v3973_v14 = vsel %vm3972_vm0, %v3971_v6, 0 }
 0x317   :  { %5171 = vcosq.f32 %v3534_v5  ;;  %v4649_v8 = vadd.s32 4294967294, %v3823_v62  ;;  %v3921_v20 = vshll.u32 %v7223_v4, 30  ;;  %v7230_v9 = vadd.f32 %v2910_v16, %v6212_v55 }
 0x318   :  { %5173 = vsinq.f32 %v3534_v5  ;;  %v7235_v49 = vsel %vm3551_vm11, %v3635_v19, %v6899_v63  ;;  %v3708_v30 = vadd.s32 %v6944_v54, %v6941_v33  ;;  %v3975_v44 = vand.u32 31, %v3973_v14 }
 0x319   :  { %8718 = vst [vmem:[#allocation43_spill] sm:$0xff] %v7230_v9  ;;  %8719 = vst [vmem:[#allocation15_spill] sm:$0xff] %v7235_v49  ;;  %v3637_v6 = vsel %vm7181_vm14, %v6683_v2, %v3634_v41  ;;  %v3725_v35 = vshll.u32 %v7035_v29, %v7132_v7  ;;  %v7247_v62 = vsel %vm3654_vm15, %v3738_v43, %v7008_v38  ;;  %v3731_v16 = vor.u32 4788187, %v3730_v34 }
 0x31a   :  { %8720 = vst [vmem:[#allocation6_spill] sm:$0xff] %v7247_v62  ;;  %v7249_v22 = vsub.s32 %v3918_v28, %v3921_v20  ;;  %v3726_v63 = vshrl.u32 %v3708_v30, %v3724_v47  ;;  %v3969_v5 = vor.u32 8388608, %v3968_v17  ;;  %v3976_v19 = vsub.s32 32, %v3975_v44 }
 0x31b   :  { %vm4650_vm3 = vcmp.lt.s32.totalorder %v4649_v8, 0  ;;  %v3978_v54 = vshll.u32 %v8603_v13, %v3975_v44  ;;  %v4067_v41 = vand.u32 2139095040, %v7230_v9  ;;  %v3981_v29 = vshll.u32 %v8614_v36, %v3975_v44 }
 0x31c   :  { %v3924_v33 = vsub.s32 0, %v7249_v22  ;;  %v3979_v7 = vshrl.u32 %v8614_v36, %v3976_v19  ;;  %v3982_v38 = vshrl.u32 %v8597_v59, %v3976_v19  ;;  %v3985_v28 = vshrl.u32 %v8598_v56, %v3976_v19 }
 0x31d   :  { %v3974_v43 = vshrl.u32 %v3973_v14, 5  ;;  %v3984_v47 = vshll.u32 %v8597_v59, %v3975_v44  ;;  %v3987_v34 = vshll.u32 %v8598_v56, %v3975_v44  ;;  %v3988_v17 = vshrl.u32 %v8615_v51, %v3976_v19  ;;  %v7261_v20 = vpop.eup %5167 }
 0x31e   :  { %8721 = vst [vmem:[#allocation67_spill] sm:$0xff] %v7261_v20  ;;  %v3980_v30 = vor.u32 %v3979_v7, %v3978_v54  ;;  %v3983_v26 = vor.u32 %v3982_v38, %v3981_v29  ;;  %v3990_v24 = vshll.u32 %v8615_v51, %v3975_v44  ;;  %v3991_v27 = vshrl.u32 %v8616_v21, %v3976_v19 }
 0x31f   :  { %v7265_v46 = vpop.eup %5169  ;;  %5175 = vcosq.f32 %v3637_v6  ;;  %v4652_v2 = vmin.u32 %v3924_v33, %v7249_v22  ;;  %v3986_v14 = vor.u32 %v3985_v28, %v3984_v47  ;;  %v3989_v53 = vor.u32 %v3988_v17, %v3987_v34 }
 0x320   :  { %8722 = vst [vmem:[#allocation68_spill] sm:$0xff] %v7265_v46  ;;  %v3727_v62 = vor.u32 %v3726_v63, %v3725_v35  ;;  %v3732_v45 = vand.u32 2147483647, %v3731_v16  ;;  %v3992_v49 = vor.u32 %v3991_v27, %v3990_v24  ;;  %v4068_v3 = vshrl.u32 %v4067_v41, 23 }
 0x321   :  { %v7268_v40 = vpop.eup %5171  ;;  %v7271_v54 = vsel %vm4650_vm3, 0, %v4649_v8  ;;  %vm3993_vm5 = vcmp.lt.s32.totalorder %v3974_v43, 1  ;;  %vm3996_vm6 = vcmp.lt.s32.totalorder %v3974_v43, 4  ;;  %v4009_v44 = vshll.u32 %v3969_v5, 8 }
 0x322   :  { %8723 = vst [vmem:[#allocation69_spill] sm:$0xff] %v7268_v40  ;;  %v7273_v7 = vpop.eup %5173  ;;  %v3977_v29 = vshrl.u32 %v8603_v13, %v3976_v19  ;;  %vm3995_vm7 = vcmp.lt.s32.totalorder %v3974_v43, 3  ;;  %v4001_v33 = vsel %vm3993_vm5, %v3980_v30, %v3983_v26  ;;  %v4002_v38 = vsel %vm3996_vm6, %v3989_v53, 920167782 }
 0x323   :  { %8724 = vst [vmem:[#allocation70_spill] sm:$0xff] %v7273_v7  ;;  %v3926_v35 = vclz %v4652_v2  ;;  %vm3994_vm8 = vcmp.lt.s32.totalorder %v3974_v43, 2  ;;  %v3998_v27 = vsel %vm3996_vm6, %v3986_v14, 2102212464  ;;  %v4003_v24 = vsel %vm3995_vm7, %v3986_v14, %v4002_v38 }
 0x324   :  { %v4004_v63 = vsel %vm3994_vm8, %v4001_v33, %v4003_v24  ;;  %v4005_v8 = vsel %vm3993_vm5, %v3983_v26, %v3986_v14  ;;  %v4006_v16 = vsel %vm3996_vm6, %v3992_v49, 1326507024  ;;  %v4659_v41 = vadd.s32 4294967169, %v4068_v3 }
 0x325   :  { %v3734_v5 = vcvt.s32.f32 %v3727_v62  ;;  %v3831_v28 = vsub.s32 4294967266, %v7271_v54  ;;  %v3997_v19 = vsel %vm3993_vm5, %v3977_v29, %v3980_v30  ;;  %v8414_v47 = vand.u32 2147483647, %v7230_v9 }
 0x326   :  { %v3999_v34 = vsel %vm3995_vm7, %v3983_v26, %v3998_v27  ;;  %v4007_v2 = vsel %vm3995_vm7, %v3989_v53, %v4006_v16  ;;  %v7285_v17 = vmul.u32.u64.low %v4009_v44, %v4004_v63  ;;  %v7286_v40 = vmul.u32.u64.high %v4009_v44, %v4004_v63, %v7285_v17 }
 0x327   :  { %5177 = vsinq.f32 %v3637_v6  ;;  %v3735_v33 = vmul.f32 %v3734_v5, %v3732_v45  ;;  %v4653_v14 = vadd.s32 4294967294, %v3926_v35  ;;  %v4008_v3 = vsel %vm3994_vm8, %v4005_v8, %v4007_v2  ;;  %v8728_v35 = vld [vmem:[#allocation22_spill] sm:$0xff] }
 0x328   :  { %v3811_v49 = vadd.s32 %v7061_v15, %v7072_v23  ;;  %v7292_v62 = vmul.u32.u64.low %v4009_v44, %v4008_v3  ;;  %v7293_v30 = vmul.u32.u64.high %v4009_v44, %v4008_v3, %v7292_v62  ;;  %v4074_v29 = vadd.s32 1, %v4659_v41  ;;  %v8727_v23 = vld [vmem:[#allocation20_spill] sm:$0xff] }
 0x329   :  { %v7295_v38 = vpop.eup %5175  ;;  %v3827_v53 = vsub.s32 32, %v7271_v54  ;;  %v3832_v26 = vadd.s32 127, %v3831_v28  ;;  %v4000_v27 = vsel %vm3994_vm8, %v3997_v19, %v3999_v34  ;;  %v4071_v45 = vand.u32 8388607, %v8414_v47 }
 0x32a   :  { %8725 = vst [vmem:[#allocation71_spill] sm:$0xff] %v7295_v38  ;;  %v4019_v6 = vadd.s32 1, %v7286_v40  ;;  %vm4075_vm11 = vcmp.gt.s32.totalorder %v4074_v29, 0  ;;  %v7304_v15 = vadd.f32 %v7202_v0, %v6204_v52  ;;  %v7308_v24 = vadd.f32 %v8728_v35, %v8727_v23 }
 0x32b   :  { %v3736_v63 = vxor.u32 2147483648, %v3735_v33  ;;  %vm4654_vm12 = vcmp.lt.s32.totalorder %v4653_v14, 0  ;;  %v4076_v8 = vsel %vm4075_vm11, %v4074_v29, 0  ;;  %v2911_v43 = vmul.f32 30.0, %v7192_v25 }
 0x32c   :  { %8726 = vst [vmem:[#allocation72_spill] sm:$0xff] %v7304_v15  ;;  %v4016_v41 = vmul.u32 %v4009_v44, %v4000_v27  ;;  %vm4018_vm0 = vc.u32 %v7293_v30, %v7285_v17  ;;  %v4078_v5 = vand.u32 31, %v4076_v8  ;;  %2679 = vrot.lane.b32.xlu1 %v7304_v15, %s5248_s4  ;;  %v3828_v0 = vshll.u32 %v7128_v60, %v7271_v54 }
 0x32d   :  { %v3829_v28 = vshrl.u32 %v3811_v49, %v3827_v53  ;;  %v4020_v19 = vsel %vm4018_vm0, %v4019_v6, %v7286_v40  ;;  %v4072_v34 = vor.u32 8388608, %v4071_v45  ;;  %v3833_v2 = vshll.u32 %v3832_v26, 23 }
 0x32e   :  { %v7319_v3 = vsel %vm4654_vm12, 0, %v4653_v14  ;;  %v4021_v62 = vadd.s32 %v4020_v19, %v4016_v41  ;;  %v4079_v29 = vsub.s32 32, %v4078_v5  ;;  %v4077_v44 = vshrl.u32 %v4076_v8, 5 }
 0x32f   :  { %v4081_v27 = vshll.u32 %v8603_v13, %v4078_v5  ;;  %v4084_v23 = vshll.u32 %v8614_v36, %v4078_v5  ;;  %v7324_v35 = vadd.f32 %v2911_v43, %v6212_v55  ;;  %v4087_v40 = vshll.u32 %v8597_v59, %v4078_v5 }
 0x330   :  { %v4022_v47 = vadd.s32 536870912, %v4021_v62  ;;  %v4082_v60 = vshrl.u32 %v8614_v36, %v4079_v29  ;;  %v4085_v54 = vshrl.u32 %v8597_v59, %v4079_v29  ;;  %v4088_v14 = vshrl.u32 %v8598_v56, %v4079_v29 }
 0x331   :  { %8729 = vst [vmem:[#allocation20_spill] sm:$0xff] %v7324_v35  ;;  %v7329_v49 = vpop.eup %5177  ;;  %v4090_v53 = vshll.u32 %v8598_v56, %v4078_v5  ;;  %v4091_v26 = vshrl.u32 %v8615_v51, %v4079_v29  ;;  %v4094_v45 = vshrl.u32 %v8616_v21, %v4079_v29  ;;  %v3737_v6 = vsel %vm3654_vm15, %v3736_v63, %v3735_v33 }
 0x332   :  { %8730 = vst [vmem:[#allocation22_spill] sm:$0xff] %v7329_v49  ;;  %v3830_v8 = vor.u32 %v3829_v28, %v3828_v0  ;;  %v7337_v43 = vshrl.u32 %v4022_v47, 30  ;;  %v4093_v41 = vshll.u32 %v8615_v51, %v4078_v5  ;;  %v4083_v19 = vor.u32 %v4082_v60, %v4081_v27 }
 0x333   :  { %v4086_v16 = vor.u32 %v4085_v54, %v4084_v23  ;;  %v4089_v25 = vor.u32 %v4088_v14, %v4087_v40  ;;  %v4092_v38 = vor.u32 %v4091_v26, %v4090_v53  ;;  %v3834_v49 = vor.u32 4788187, %v3833_v2 }
 0x334   :  { %v3934_v7 = vsub.s32 4294967266, %v7319_v3  ;;  %v4024_v12 = vshll.u32 %v7337_v43, 30  ;;  %v4095_v20 = vor.u32 %v4094_v45, %v4093_v41  ;;  %v4080_v46 = vshrl.u32 %v8603_v13, %v4079_v29 }
 0x335   :  { %vm4099_vm3 = vcmp.lt.s32.totalorder %v4077_v44, 4  ;;  %v4112_v11 = vshll.u32 %v4072_v34, 8  ;;  %v8422_v33 = vand.u32 2147483647, %v7324_v35  ;;  %vm4096_vm15 = vcmp.lt.s32.totalorder %v4077_v44, 1 }
 0x336   :  { %v7344_v47 = vsub.s32 %v4021_v62, %v4024_v12  ;;  %vm4097_vm5 = vcmp.lt.s32.totalorder %v4077_v44, 2  ;;  %v4101_v63 = vsel %vm4099_vm3, %v4089_v25, 2102212464  ;;  %v8731_v5 = vand.u32 2147483647, %v8709_v37 }
 0x337   :  { %vm3757_vm7 = vcmp.lt.s32.totalorder %v6926_v10, 0  ;;  %vm4098_vm8 = vcmp.lt.s32.totalorder %v4077_v44, 3  ;;  %v4104_v28 = vsel %vm4096_vm15, %v4083_v19, %v4086_v16  ;;  %v4105_v34 = vsel %vm4099_vm3, %v4092_v38, 920167782 }
 0x338   :  { %vm7349_vm6 = vcmp.le.f32.partialorder %v8731_v5, 0.7853982  ;;  %v4108_v2 = vsel %vm4096_vm15, %v4086_v16, %v4089_v25  ;;  %v4027_v12 = vsub.s32 0, %v7344_v47  ;;  %v4100_v62 = vsel %vm4096_vm15, %v4080_v46, %v4083_v19 }
 0x339   :  { %v4106_v29 = vsel %vm4098_vm8, %v4089_v25, %v4105_v34  ;;  %v4109_v27 = vsel %vm4099_vm3, %v4095_v20, 1326507024  ;;  %v4102_v23 = vsel %vm4098_vm8, %v4086_v16, %v4101_v63  ;;  %v4170_v40 = vand.u32 2139095040, %v7324_v35  ;;  %v8734_v34 = vld [vmem:[#allocation32_spill] sm:$0xff] }
 0x33a   :  { %v4107_v60 = vsel %vm4097_vm5, %v4104_v28, %v4106_v29  ;;  %v4110_v54 = vsel %vm4098_vm8, %v4092_v38, %v4109_v27  ;;  %v4656_v14 = vmin.u32 %v4027_v12, %v7344_v47  ;;  %v3837_v41 = vcvt.s32.f32 %v3830_v8  ;;  %v8735_v12 = vld [vmem:[#allocation35_spill] sm:$0xff] }
 0x33b   :  { %v4111_v53 = vsel %vm4097_vm5, %v4108_v2, %v4110_v54  ;;  %v7361_v26 = vmul.u32.u64.low %v4112_v11, %v4107_v60  ;;  %v7362_v45 = vmul.u32.u64.high %v4112_v11, %v4107_v60, %v7361_v26  ;;  %v4171_v25 = vshrl.u32 %v4170_v40, 23 }
 0x33c   :  { %v7365_v5 = vmul.u32.u64.low %v4112_v11, %v4111_v53  ;;  %v7366_v46 = vmul.u32.u64.high %v4112_v11, %v4111_v53, %v7365_v5  ;;  %v3835_v20 = vand.u32 2147483647, %v3834_v49  ;;  %v3930_v16 = vsub.s32 32, %v7319_v3 }
 0x33d   :  { %v4029_v19 = vclz %v4656_v14  ;;  %v4103_v38 = vsel %vm4097_vm5, %v4100_v62, %v4102_v23  ;;  %v3935_v63 = vadd.s32 127, %v3934_v7  ;;  %v4663_v28 = vadd.s32 4294967169, %v4171_v25 }
 0x33e   :  { %v7372_v2 = vadd.f32 %v8735_v12, %v8734_v34  ;;  %v7376_v29 = vadd.f32 %v6976_v18, %v6974_v50  ;;  %v4122_v27 = vadd.s32 1, %v7362_v45  ;;  %v4174_v49 = vand.u32 8388607, %v8422_v33 }
 0x33f   :  { %v4657_v8 = vadd.s32 4294967294, %v4029_v19  ;;  %v2912_v60 = vmul.f32 30.0, %v7304_v15  ;;  %v3914_v7 = vadd.s32 %v7135_v42, %v7148_v31  ;;  %v4119_v44 = vmul.u32 %v4112_v11, %v4103_v38 }
 0x340   :  { %vm4121_vm11 = vc.u32 %v7366_v46, %v7361_v26  ;;  %v4177_v62 = vadd.s32 1, %v4663_v28  ;;  %v3740_v50 = vsel %vm7349_vm6, %v8709_v37, %v3737_v6  ;;  %v7389_v18 = vmul.f32 %v3837_v41, %v3835_v20 }
 0x341   :  { %v8736_v23 = vsub.s32 4, %v7115_v61  ;;  %v4123_v42 = vsel %vm4121_vm11, %v4122_v27, %v7362_v45  ;;  %v3932_v11 = vshrl.u32 %v3914_v7, %v3930_v16  ;;  %vm4658_vm12 = vcmp.lt.s32.totalorder %v4657_v8, 0 }
 0x342   :  { %v4124_v31 = vadd.s32 %v4123_v42, %v4119_v44  ;;  %vm4178_vm0 = vcmp.gt.s32.totalorder %v4177_v62, 0  ;;  %v3936_v40 = vshll.u32 %v3935_v63, 23  ;;  %v4175_v14 = vor.u32 8388608, %v4174_v49 }
 0x343   :  { %v7396_v54 = vsel %vm3757_vm7, %v8736_v23, %v7115_v61  ;;  %v4179_v53 = vsel %vm4178_vm0, %v4177_v62, 0  ;;  %v7400_v6 = vadd.f32 %v2912_v60, %v6212_v55  ;;  %5179 = vcosq.f32 %v3740_v50 }
 0x344   :  { %8737 = vst [vmem:[#allocation32_spill] sm:$0xff] %v7396_v54  ;;  %v3931_v41 = vshll.u32 %v7249_v22, %v7319_v3  ;;  %v4125_v5 = vadd.s32 536870912, %v4124_v31  ;;  %v4181_v25 = vand.u32 31, %v4179_v53  ;;  %5181 = vsinq.f32 %v3740_v50 }
 0x345   :  { %8738 = vst [vmem:[#allocation35_spill] sm:$0xff] %v7400_v6  ;;  %v7406_v20 = vsel %vm4658_vm12, 0, %v4657_v8  ;;  %v7414_v63 = vadd.f32 %v7198_v57, %v6206_v1  ;;  %v7416_v28 = vor.u32 4788187, %v3936_v40  ;;  %v4017_v22 = vadd.s32 %v7285_v17, %v7293_v30 }
 0x346   :  { %v7408_v16 = vor.u32 %v3932_v11, %v3931_v41  ;;  %v7410_v19 = vshrl.u32 %v4125_v5, 30  ;;  %v4182_v38 = vsub.s32 32, %v4181_v25  ;;  %v7420_v3 = vshll.u32 %v4175_v14, 8 }
 0x347   :  { %v4273_v34 = vand.u32 2139095040, %v7400_v6  ;;  %v4037_v12 = vsub.s32 4294967266, %v7406_v20  ;;  %v4184_v27 = vshll.u32 %v8603_v13, %v4181_v25  ;;  %v4187_v57 = vshll.u32 %v8614_v36, %v4181_v25 }
 0x348   :  { %v4127_v8 = vshll.u32 %v7410_v19, 30  ;;  %v4185_v49 = vshrl.u32 %v8614_v36, %v4182_v38  ;;  %v4188_v60 = vshrl.u32 %v8597_v59, %v4182_v38  ;;  %v4190_v7 = vshll.u32 %v8597_v59, %v4181_v25 }
 0x349   :  { %v4191_v17 = vshrl.u32 %v8598_v56, %v4182_v38  ;;  %v4180_v44 = vshrl.u32 %v4179_v53, 5  ;;  %v4193_v62 = vshll.u32 %v8598_v56, %v4181_v25  ;;  %v4194_v50 = vshrl.u32 %v8615_v51, %v4182_v38 }
 0x34a   :  { %v7431_v30 = vsub.s32 %v4124_v31, %v4127_v8  ;;  %v4186_v23 = vor.u32 %v4185_v49, %v4184_v27  ;;  %v4189_v42 = vor.u32 %v4188_v60, %v4187_v57  ;;  %v4196_v5 = vshll.u32 %v8615_v51, %v4181_v25 }
 0x34b   :  { %v4192_v11 = vor.u32 %v4191_v17, %v4190_v7  ;;  %v4195_v41 = vor.u32 %v4194_v50, %v4193_v62  ;;  %v4197_v33 = vshrl.u32 %v8616_v21, %v4182_v38  ;;  %v4033_v31 = vsub.s32 32, %v7406_v20 }
 0x34c   :  { %v4130_v14 = vsub.s32 0, %v7431_v30  ;;  %v4038_v8 = vadd.s32 127, %v4037_v12  ;;  %v4183_v53 = vshrl.u32 %v8603_v13, %v4182_v38  ;;  %v4274_v45 = vshrl.u32 %v4273_v34, 23 }
 0x34d   :  { %v7441_v61 = vpop.eup %5179  ;;  %v4198_v49 = vor.u32 %v4197_v33, %v4196_v5  ;;  %vm4199_vm3 = vcmp.lt.s32.totalorder %v4180_v44, 1  ;;  %vm4202_vm15 = vcmp.lt.s32.totalorder %v4180_v44, 4  ;;  %vm4201_vm5 = vcmp.lt.s32.totalorder %v4180_v44, 3 }
 0x34e   :  { %8739 = vst [vmem:[#allocation73_spill] sm:$0xff] %v7441_v61  ;;  %v4660_v27 = vmin.u32 %v4130_v14, %v7431_v30  ;;  %v7444_v57 = vpop.eup %5181  ;;  %v4204_v60 = vsel %vm4202_vm15, %v4192_v11, 2102212464  ;;  %v4207_v25 = vsel %vm4199_vm3, %v4186_v23, %v4189_v42  ;;  %v4208_v7 = vsel %vm4202_vm15, %v4195_v41, 920167782 }
 0x34f   :  { %vm4200_vm8 = vcmp.lt.s32.totalorder %v4180_v44, 2  ;;  %v4209_v12 = vsel %vm4201_vm5, %v4192_v11, %v4208_v7  ;;  %v4211_v62 = vsel %vm4199_vm3, %v4189_v42, %v4192_v11  ;;  %v8740_v38 = vand.u32 2147483647, %v6926_v10 }
 0x350   :  { %v4132_v17 = vclz %v4660_v27  ;;  %vm3860_vm12 = vcmp.lt.s32.totalorder %v6979_v39, 0  ;;  %v4034_v33 = vshll.u32 %v7344_v47, %v7406_v20  ;;  %v4203_v50 = vsel %vm4199_vm3, %v4183_v53, %v4186_v23 }
 0x351   :  { %vm7449_vm11 = vcmp.le.f32.partialorder %v8740_v38, 0.7853982  ;;  %v4210_v14 = vsel %vm4200_vm8, %v4207_v25, %v4209_v12  ;;  %v4212_v5 = vsel %vm4202_vm15, %v4198_v49, 1326507024  ;;  %v4205_v40 = vsel %vm4201_vm5, %v4189_v42, %v4204_v60 }
 0x352   :  { %v4661_v27 = vadd.s32 4294967294, %v4132_v17  ;;  %v4213_v11 = vsel %vm4201_vm5, %v4195_v41, %v4212_v5  ;;  %v4667_v7 = vadd.s32 4294967169, %v4274_v45  ;;  %v4035_v15 = vshrl.u32 %v4017_v22, %v4033_v31 }
 0x353   :  { %v4214_v38 = vsel %vm4200_vm8, %v4211_v62, %v4213_v11  ;;  %v7461_v37 = vmul.u32.u64.low %v7420_v3, %v4210_v14  ;;  %v7462_v54 = vmul.u32.u64.high %v7420_v3, %v4210_v14, %v7461_v37  ;;  %v4039_v61 = vshll.u32 %v4038_v8, 23 }
 0x354   :  { %vm4662_vm0 = vcmp.lt.s32.totalorder %v4661_v27, 0  ;;  %v7466_v47 = vmul.u32.u64.low %v7420_v3, %v4214_v38  ;;  %v7467_v20 = vmul.u32.u64.high %v7420_v3, %v4214_v38, %v7466_v47  ;;  %v4206_v42 = vsel %vm4200_vm8, %v4203_v50, %v4205_v40 }
 0x355   :  { %v7469_v23 = vsel %vm4662_vm0, 0, %v4661_v27  ;;  %v4280_v41 = vadd.s32 1, %v4667_v7  ;;  %v7474_v45 = vadd.f32 %v7372_v2, %v6204_v52  ;;  %v8744_v22 = vxor.u32 2147483648, %v7389_v18 }
 0x356   :  { %v3938_v8 = vand.u32 2147483647, %v7416_v28  ;;  %v3940_v53 = vcvt.s32.f32 %v7408_v16  ;;  %v7485_v49 = vmul.f32 %v7414_v63, %v7414_v63  ;;  %v4036_v44 = vor.u32 %v4035_v15, %v4034_v33 }
 0x357   :  { %8743 = vst [vmem:[#allocation74_spill] sm:$0xff] %v7474_v45  ;;  %v3840_v31 = vsel %vm3757_vm7, %v8744_v22, %v7389_v18  ;;  %v4225_v40 = vadd.s32 1, %v7462_v54  ;;  %v8746_v2 = vand.u32 2147483647, %v7400_v6  ;;  %vm4281_vm3 = vcmp.gt.s32.totalorder %v4280_v41, 0  ;;  %2681 = vrot.lane.b32.xlu0 %v7474_v45, %s5248_s4 }
 0x358   :  { %8745 = vst [vmem:[#allocation75_spill] sm:$0xff] %v7485_v49  ;;  %v4040_v25 = vor.u32 4788187, %v4039_v61  ;;  %v4136_v18 = vsub.s32 32, %v7469_v23  ;;  %v4222_v28 = vmul.u32 %v7420_v3, %v4206_v42  ;;  %vm4224_vm7 = vc.u32 %v7467_v20, %v7461_v37 }
 0x359   :  { %v4277_v60 = vand.u32 8388607, %v8746_v2  ;;  %v4140_v16 = vsub.s32 4294967266, %v7469_v23  ;;  %v4226_v15 = vsel %vm4224_vm7, %v4225_v40, %v7462_v54  ;;  %v4282_v63 = vsel %vm4281_vm3, %v4280_v41, 0 }
 0x35a   :  { %v2650_v17 = vadd.f32 %v7376_v29, %v6206_v1  ;;  %v7503_v12 = vsel %vm7449_vm11, %v6926_v10, %v3840_v31  ;;  %v8747_v61 = vsub.s32 4, %v7223_v4  ;;  %v4227_v62 = vadd.s32 %v4226_v15, %v4222_v28 }
 0x35b   :  { %v2913_v33 = vmul.f32 30.0, %v7474_v45  ;;  %v7513_v54 = vmul.f32 %v3940_v53, %v3938_v8  ;;  %v4043_v50 = vcvt.s32.f32 %v4036_v44  ;;  %v4120_v29 = vadd.s32 %v7361_v26, %v7366_v46  ;;  %2789 = vrot.lane.b32.xlu0 %v7485_v49, %s5248_s4 }
 0x35c   :  { %v7510_v3 = vsel %vm3860_vm12, %v8747_v61, %v7223_v4  ;;  %v4284_v14 = vand.u32 31, %v4282_v63  ;;  %v4041_v5 = vand.u32 2147483647, %v4040_v25  ;;  %v4137_v27 = vshll.u32 %v7431_v30, %v7469_v23 }
 0x35d   :  { %v4228_v11 = vadd.s32 536870912, %v4227_v62  ;;  %v4278_v4 = vor.u32 8388608, %v4277_v60  ;;  %v4138_v7 = vshrl.u32 %v4120_v29, %v4136_v18  ;;  %v4141_v38 = vadd.s32 127, %v4140_v16 }
 0x35e   :  { %v4285_v47 = vsub.s32 32, %v4284_v14  ;;  %v7521_v42 = vmul.f32 %v2650_v17, %v2650_v17  ;;  %v4283_v22 = vshrl.u32 %v4282_v63, 5  ;;  %v4287_v26 = vshll.u32 %v8603_v13, %v4284_v14 }
 0x35f   :  { %v7523_v41 = vshrl.u32 %v4228_v11, 30  ;;  %v7527_v46 = vadd.f32 %v2913_v33, %v6212_v55  ;;  %v4290_v8 = vshll.u32 %v8614_v36, %v4284_v14  ;;  %v4293_v44 = vshll.u32 %v8597_v59, %v4284_v14 }
 0x360   :  { %8748 = vst [vmem:[#allocation76_spill] sm:$0xff] %v7521_v42  ;;  %v4288_v31 = vshrl.u32 %v8614_v36, %v4285_v47  ;;  %v4291_v30 = vshrl.u32 %v8597_v59, %v4285_v47  ;;  %v4294_v23 = vshrl.u32 %v8598_v56, %v4285_v47  ;;  %2793 = vrot.lane.b32.xlu0 %v7521_v42, %s5248_s4  ;;  %v3942_v16 = vxor.u32 2147483648, %v7513_v54 }
 0x361   :  { %v4230_v53 = vshll.u32 %v7523_v41, 30  ;;  %v4296_v40 = vshll.u32 %v8598_v56, %v4284_v14  ;;  %v4297_v2 = vshrl.u32 %v8615_v51, %v4285_v47  ;;  %v4299_v18 = vshll.u32 %v8615_v51, %v4284_v14 }
 0x362   :  { %v4289_v60 = vor.u32 %v4288_v31, %v4287_v26  ;;  %v4292_v25 = vor.u32 %v4291_v30, %v4290_v8  ;;  %v4300_v28 = vshrl.u32 %v8616_v21, %v4285_v47  ;;  %v4295_v63 = vor.u32 %v4294_v23, %v4293_v44 }
 0x363   :  { %v7542_v15 = vsub.s32 %v4227_v62, %v4230_v53  ;;  %v4298_v17 = vor.u32 %v4297_v2, %v4296_v40  ;;  %v7544_v61 = vmul.f32 %v4043_v50, %v4041_v5  ;;  %v7546_v33 = vor.u32 %v4138_v7, %v4137_v27 }
 0x364   :  { %v4301_v29 = vor.u32 %v4300_v28, %v4299_v18  ;;  %v4318_v11 = vshll.u32 %v4278_v4, 8  ;;  %v4142_v42 = vshll.u32 %v4141_v38, 23  ;;  %vm4302_vm15 = vcmp.lt.s32.totalorder %v4283_v22, 1 }
 0x365   :  { %v4233_v26 = vsub.s32 0, %v7542_v15  ;;  %vm4305_vm5 = vcmp.lt.s32.totalorder %v4283_v22, 4  ;;  %vm4304_vm8 = vcmp.lt.s32.totalorder %v4283_v22, 3  ;;  %v4310_v14 = vsel %vm4302_vm15, %v4289_v60, %v4292_v25 }
 0x366   :  { %v4311_v31 = vsel %vm4305_vm5, %v4298_v17, 920167782  ;;  %v4376_v62 = vand.u32 2139095040, %v7527_v46  ;;  %vm4303_vm0 = vcmp.lt.s32.totalorder %v4283_v22, 2  ;;  %v4307_v50 = vsel %vm4305_vm5, %v4295_v63, 2102212464 }
 0x367   :  { %v4664_v8 = vmin.u32 %v4233_v26, %v7542_v15  ;;  %v4312_v5 = vsel %vm4304_vm8, %v4295_v63, %v4311_v31  ;;  %v4286_v27 = vshrl.u32 %v8603_v13, %v4285_v47  ;;  %v4314_v7 = vsel %vm4302_vm15, %v4292_v25, %v4295_v63 }
 0x368   :  { %v4313_v4 = vsel %vm4303_vm0, %v4310_v14, %v4312_v5  ;;  %v4315_v38 = vsel %vm4305_vm5, %v4301_v29, 1326507024  ;;  %v8749_v40 = vand.u32 2147483647, %v6979_v39  ;;  %vm8430_vm7 = vcmp.lt.s32.totalorder %v7126_v58, 0  ;;  %v8752_v5 = vld [vmem:[#allocation52_spill] sm:$0xff] }
 0x369   :  { %v4235_v30 = vclz %v4664_v8  ;;  %v4316_v23 = vsel %vm4304_vm8, %v4298_v17, %v4315_v38  ;;  %v7557_v53 = vmul.u32.u64.low %v4318_v11, %v4313_v4  ;;  %v7558_v44 = vmul.u32.u64.high %v4318_v11, %v4313_v4, %v7557_v53  ;;  %v8753_v4 = vld [vmem:[#allocation53_spill] sm:$0xff] }
 0x36a   :  { %vm7563_vm3 = vcmp.le.f32.partialorder %v8749_v40, 0.7853982  ;;  %v4306_v47 = vsel %vm4302_vm15, %v4286_v27, %v4289_v60  ;;  %v4308_v18 = vsel %vm4304_vm8, %v4292_v25, %v4307_v50  ;;  %v4317_v28 = vsel %vm4303_vm0, %v4314_v7, %v4316_v23 }
 0x36b   :  { %v4377_v63 = vshrl.u32 %v4376_v62, 23  ;;  %v4143_v17 = vor.u32 4788187, %v4142_v42  ;;  %v4665_v29 = vadd.s32 4294967294, %v4235_v30  ;;  %v8427_v31 = vand.u32 2147483647, %v7527_v46 }
 0x36c   :  { %v7571_v26 = vmul.u32.u64.low %v4318_v11, %v4317_v28  ;;  %v7572_v14 = vmul.u32.u64.high %v4318_v11, %v4317_v28, %v7571_v26  ;;  %v4757_v38 = vadd.f32 %v8753_v4, %v8752_v5  ;;  %v4758_v40 = vadd.f32 %v7101_v48, %v7099_v32 }
 0x36d   :  { %v4671_v8 = vadd.s32 4294967169, %v4377_v63  ;;  %5183 = vcosq.f32 %v7503_v12  ;;  %vm4666_vm15 = vcmp.lt.s32.totalorder %v4665_v29, 0  ;;  %v4309_v60 = vsel %vm4303_vm0, %v4306_v47, %v4308_v18 }
 0x36e   :  { %v4328_v42 = vadd.s32 1, %v7558_v44  ;;  %v7582_v25 = vsel %vm4666_vm15, 0, %v4665_v29  ;;  %v2648_v62 = vadd.f32 %v7308_v24, %v6206_v1  ;;  %v7587_v27 = vadd.f32 %v4757_v38, %v6204_v52  ;;  %v8756_v29 = vld [vmem:[#allocation2_spill] sm:$0xff] }
 0x36f   :  { %v4383_v50 = vadd.s32 1, %v4671_v8  ;;  %v3943_v32 = vsel %vm3860_vm12, %v3942_v16, %v7513_v54  ;;  %v4045_v48 = vxor.u32 2147483648, %v7544_v61  ;;  %v4144_v7 = vand.u32 2147483647, %v4143_v17 }
 0x370   :  { %8754 = vst [vmem:[#allocation52_spill] sm:$0xff] %v7587_v27  ;;  %v4146_v22 = vcvt.s32.f32 %v7546_v33  ;;  %v4325_v30 = vmul.u32 %v4318_v11, %v4309_v60  ;;  %vm4327_vm5 = vc.u32 %v7572_v14, %v7557_v53  ;;  %v4380_v24 = vand.u32 8388607, %v8427_v31  ;;  %2683 = vrot.lane.b32.xlu1 %v7587_v27, %s5248_s4  ;;  %v7633_v60 = vpop.permute.xlu0 %2653 }
 0x371   :  { %vm4384_vm8 = vcmp.gt.s32.totalorder %v4383_v50, 0  ;;  %v4243_v52 = vsub.s32 4294967266, %v7582_v25  ;;  %v4329_v54 = vsel %vm4327_vm5, %v4328_v42, %v7558_v44  ;;  %v2652_v23 = vadd.f32 %v4758_v40, %v6206_v1 }
 0x372   :  { %v4385_v16 = vsel %vm4384_vm8, %v4383_v50, 0  ;;  %5185 = vsinq.f32 %v7503_v12  ;;  %v4330_v33 = vadd.s32 %v4329_v54, %v4325_v30  ;;  %v7604_v11 = vmul.f32 %v2648_v62, %v2648_v62 }
 0x373   :  { %v4387_v47 = vand.u32 31, %v4385_v16  ;;  %v7609_v18 = vsel %vm7563_vm3, %v6979_v39, %v3943_v32  ;;  %v7614_v28 = vsel %vm8430_vm7, %v4045_v48, %v7544_v61  ;;  %v7616_v44 = vmul.f32 %v4146_v22, %v4144_v7 }
 0x374   :  { %8755 = vst [vmem:[#allocation53_spill] sm:$0xff] %v7604_v11  ;;  %v4223_v1 = vadd.s32 %v7461_v37, %v7467_v20  ;;  %v4331_v12 = vadd.s32 536870912, %v4330_v33  ;;  %v4381_v63 = vor.u32 8388608, %v4380_v24  ;;  %2791 = vrot.lane.b32.xlu1 %v7604_v11, %s5248_s4  ;;  %v2701_v26 = vmul.f32 %v8756_v29, %v8756_v29 }
 0x375   :  { %v4388_v17 = vsub.s32 32, %v4387_v47  ;;  %v4239_v8 = vsub.s32 32, %v7582_v25  ;;  %v4244_v5 = vadd.s32 127, %v4243_v52  ;;  %v4390_v61 = vshll.u32 %v8603_v13, %v4387_v47 }
 0x376   :  { %v7626_v4 = vmul.f32 %v2652_v23, %v2652_v23  ;;  %v7628_v38 = vshrl.u32 %v4331_v12, 30  ;;  %v4393_v20 = vshll.u32 %v8614_v36, %v4387_v47  ;;  %v4386_v62 = vshrl.u32 %v4385_v16, 5 }
 0x377   :  { %v4391_v37 = vshrl.u32 %v8614_v36, %v4388_v17  ;;  %v4394_v40 = vshrl.u32 %v8597_v59, %v4388_v17  ;;  %v7635_v42 = vpop.eup %5183  ;;  %v4397_v50 = vshrl.u32 %v8598_v56, %v4388_v17  ;;  %v4399_v32 = vshll.u32 %v8598_v56, %v4387_v47 }
 0x378   :  { %8757 = vst [vmem:[#allocation2_spill] sm:$0xff] %v7626_v4  ;;  %v4400_v48 = vshrl.u32 %v8615_v51, %v4388_v17  ;;  %v4333_v7 = vshll.u32 %v7628_v38, 30  ;;  %v4396_v24 = vshll.u32 %v8597_v59, %v4387_v47  ;;  %2795 = vrot.lane.b32.xlu1 %v7626_v4, %s5248_s4  ;;  %v4402_v54 = vshll.u32 %v8615_v51, %v4387_v47 }
 0x379   :  { %v4392_v22 = vor.u32 %v4391_v37, %v4390_v61  ;;  %v4395_v30 = vor.u32 %v4394_v40, %v4393_v20  ;;  %v4403_v16 = vshrl.u32 %v8616_v21, %v4388_v17  ;;  %v2717_v23 = vmul.f32 %v7633_v60, %v7633_v60 }
 0x37a   :  { %v4401_v52 = vor.u32 %v4400_v48, %v4399_v32  ;;  %v8758_v12 = vand.u32 2147483647, %v7126_v58  ;;  %v8759_v29 = vmov 0  ;;  %v4240_v61 = vshll.u32 %v7542_v15, %v7582_v25 }
 0x37b   :  { %v7656_v37 = vsub.s32 %v4330_v33, %v4333_v7  ;;  %v4398_v20 = vor.u32 %v4397_v50, %v4396_v24  ;;  %v7658_v40 = vshll.u32 %v4381_v63, 8  ;;  %v4241_v47 = vshrl.u32 %v4223_v1, %v4239_v8 }
 0x37c   :  { %vm7650_vm12 = vcmp.le.f32.partialorder %v8758_v12, 0.7853982  ;;  %v4404_v32 = vor.u32 %v4403_v16, %v4402_v54  ;;  %vm4405_vm0 = vcmp.lt.s32.totalorder %v4386_v62, 1  ;;  %v2914_v48 = vmul.f32 30.0, %v7587_v27  ;;  %v7661_v31 = vpop.eup %5185 }
 0x37d   :  { %v8760_v29 = vsel %vm7650_vm12, 4294967295, %v8759_v29  ;;  %v4245_v4 = vshll.u32 %v4244_v5, 23  ;;  %v4336_v12 = vsub.s32 0, %v7656_v37  ;;  %vm4408_vm15 = vcmp.lt.s32.totalorder %v4386_v62, 4 }
 0x37e   :  { %v4413_v11 = vsel %vm4405_vm0, %v4392_v22, %v4395_v30  ;;  %v4389_v15 = vshrl.u32 %v8603_v13, %v4388_v17  ;;  %vm4406_vm5 = vcmp.lt.s32.totalorder %v4386_v62, 2  ;;  %vm4407_vm8 = vcmp.lt.s32.totalorder %v4386_v62, 3 }
 0x37f   :  { %v4414_v25 = vsel %vm4408_vm15, %v4401_v52, 920167782  ;;  %v4668_v33 = vmin.u32 %v4336_v12, %v7656_v37  ;;  %v4410_v1 = vsel %vm4408_vm15, %v4398_v20, 2102212464  ;;  %v4417_v8 = vsel %vm4405_vm0, %v4395_v30, %v4398_v20 }
 0x380   :  { %v4415_v63 = vsel %vm4407_vm8, %v4398_v20, %v4414_v25  ;;  %v4418_v7 = vsel %vm4408_vm15, %v4404_v32, 1326507024  ;;  %v7670_v5 = vadd.f32 %v2914_v48, %v6212_v55  ;;  %v2733_v24 = vadd.f32 %v2717_v23, %v2701_v26 }
 0x381   :  { %v4416_v50 = vsel %vm4406_vm5, %v4413_v11, %v4415_v63  ;;  %vm4066_vm7 = vcmp.lt.s32.totalorder %v7230_v9, 0  ;;  %v4246_v54 = vor.u32 4788187, %v4245_v4  ;;  %v4338_v17 = vclz %v4668_v33 }
 0x382   :  { %v4409_v16 = vsel %vm4405_vm0, %v4389_v15, %v4392_v22  ;;  %v4419_v27 = vsel %vm4407_vm8, %v4401_v52, %v4418_v7  ;;  %v4411_v45 = vsel %vm4407_vm8, %v4395_v30, %v4410_v1  ;;  %v4242_v11 = vor.u32 %v4241_v47, %v4240_v61  ;;  %v8764_v47 = vld [vmem:[#allocation7_spill] sm:$0xff] }
 0x383   :  { %v4420_v12 = vsel %vm4406_vm5, %v4417_v8, %v4419_v27  ;;  %v7676_v25 = vmul.u32.u64.low %v7658_v40, %v4416_v50  ;;  %v7677_v20 = vmul.u32.u64.high %v7658_v40, %v4416_v50, %v7676_v25  ;;  %v4669_v32 = vadd.s32 4294967294, %v4338_v17 }
 0x384   :  { %v7681_v55 = vmul.u32.u64.low %v7658_v40, %v4420_v12  ;;  %v7682_v26 = vmul.u32.u64.high %v7658_v40, %v4420_v12, %v7681_v55  ;;  %5187 = vcosq.f32 %v7609_v18  ;;  %v4049_v4 = vsel %vm7650_vm12, %v7126_v58, %v7614_v28 }
 0x385   :  { %v8761_v27 = vand.u32 2147483647, %v7230_v9  ;;  %v8762_v22 = vmov 0  ;;  %v8433_v30 = vand.u32 2147483647, %v7670_v5  ;;  %v4479_v52 = vand.u32 2139095040, %v7670_v5 }
 0x386   :  { %v4148_v23 = vxor.u32 2147483648, %v7616_v44  ;;  %vm4670_vm15 = vcmp.lt.s32.totalorder %v4669_v32, 0  ;;  %v4412_v61 = vsel %vm4406_vm5, %v4409_v16, %v4411_v45  ;;  %v2749_v48 = vadd.f32 %v2733_v24, %v8764_v47  ;;  %v2766_v24 = vpop.permute.xlu0 %2765 }
 0x387   :  { %vm7691_vm0 = vcmp.le.f32.partialorder %v8761_v27, 0.7853982  ;;  %v4247_v15 = vand.u32 2147483647, %v4246_v54  ;;  %v7700_v33 = vsel %vm4670_vm15, 0, %v4669_v32  ;;  %v4431_v28 = vadd.s32 1, %v7677_v20 }
 0x388   :  { %v8763_v22 = vsel %vm7691_vm0, 4294967295, %v8762_v22  ;;  %v4480_v1 = vshrl.u32 %v4479_v52, 23  ;;  %5189 = vsinq.f32 %v7609_v18  ;;  %v4047_v63 = vsub.s32 4, %v7337_v43 }
 0x389   :  { %v4150_v8 = vsub.s32 4, %v7410_v19  ;;  %v4249_v50 = vcvt.s32.f32 %v4242_v11  ;;  %v4428_v7 = vmul.u32 %v7658_v40, %v4412_v61  ;;  %vm4430_vm5 = vc.u32 %v7682_v26, %v7676_v25 }
 0x38a   :  { %v4675_v45 = vadd.s32 4294967169, %v4480_v1  ;;  %v4483_v62 = vand.u32 8388607, %v8433_v30  ;;  %5191 = vcosq.f32 %v4049_v4  ;;  %v4346_v54 = vsub.s32 4294967266, %v7700_v33 }
 0x38b   :  { %v4432_v18 = vsel %vm4430_vm5, %v4431_v28, %v7677_v20  ;;  %v2797_v17 = vadd.f32 %v2766_v24, %v2749_v48  ;;  %v4149_v16 = vsel %vm4066_vm7, %v4148_v23, %v7616_v44  ;;  %v7716_v12 = vmul.f32 %v4249_v50, %v4247_v15 }
 0x38c   :  { %v4433_v40 = vadd.s32 %v4432_v18, %v4428_v7  ;;  %v4486_v11 = vadd.s32 1, %v4675_v45  ;;  %vm8765_vm8 = vcmp.lt.s32.totalorder %v7126_v58, 0  ;;  %5193 = vsinq.f32 %v4049_v4  ;;  %v8768_v45 = vld [vmem:[#allocation45_spill] sm:$0xff] }
 0x38d   :  { %v7721_v32 = vsel %vm8765_vm8, %v4047_v63, %v7337_v43  ;;  %v7726_v55 = vsel %vm4066_vm7, %v4150_v8, %v7410_v19  ;;  %v4342_v27 = vsub.s32 32, %v7700_v33  ;;  %v4484_v52 = vor.u32 8388608, %v4483_v62  ;;  %v8766_v8 = vld [vmem:[#allocation41_spill] sm:$0xff] }
 0x38e   :  { %v4434_v44 = vadd.s32 536870912, %v4433_v40  ;;  %vm4487_vm15 = vcmp.gt.s32.totalorder %v4486_v11, 0  ;;  %v7733_v23 = vsel %vm7691_vm0, %v7230_v9, %v4149_v16  ;;  %v4347_v43 = vadd.s32 127, %v4346_v54  ;;  %v7735_v47 = vpop.eup %5187  ;;  %v8769_v9 = vld [vmem:[#allocation17_spill] sm:$0xff] }
 0x38f   :  { %v4488_v61 = vsel %vm4487_vm15, %v4486_v11, 0  ;;  %v2835_v4 = vmul.f32 100.0, %v2797_v17  ;;  %v4326_v48 = vadd.s32 %v7557_v53, %v7572_v14  ;;  %v4343_v1 = vshll.u32 %v7656_v37, %v7700_v33 }
 0x390   :  { %v7740_v15 = vshrl.u32 %v4434_v44, 30  ;;  %v4490_v28 = vand.u32 31, %v4488_v61  ;;  %v2819_v63 = vmul.f32 -30.0, %v7633_v60  ;;  %v3020_v7 = vsel %vm6673_vm9, 0, %v8766_v8 }
 0x391   :  { %v4344_v24 = vshrl.u32 %v4326_v48, %v4342_v27  ;;  %v7750_v17 = vshll.u32 %v4484_v52, 8  ;;  %v4348_v14 = vshll.u32 %v4347_v43, 23  ;;  %v4489_v16 = vshrl.u32 %v4488_v61, 5 }
 0x392   :  { %v4436_v54 = vshll.u32 %v7740_v15, 30  ;;  %v4491_v18 = vsub.s32 32, %v4490_v28  ;;  %v7752_v53 = vpop.eup %5189  ;;  %v4493_v37 = vshll.u32 %v8603_v13, %v4490_v28  ;;  %v2851_v33 = vsub.f32 %v2819_v63, %v2835_v4 }
 0x393   :  { %v4496_v44 = vshll.u32 %v8614_v36, %v4490_v28  ;;  %v4499_v27 = vshll.u32 %v8597_v59, %v4490_v28  ;;  %v4502_v43 = vshll.u32 %v8598_v56, %v4490_v28  ;;  %v4505_v4 = vshll.u32 %v8615_v51, %v4490_v28 }
 0x394   :  { %v7755_v60 = vsub.s32 %v4433_v40, %v4436_v54  ;;  %v4494_v11 = vshrl.u32 %v8614_v36, %v4491_v18  ;;  %v7760_v48 = vpop.eup %5191  ;;  %v4497_v52 = vshrl.u32 %v8597_v59, %v4491_v18  ;;  %v4500_v8 = vshrl.u32 %v8598_v56, %v4491_v18 }
 0x395   :  { %v4503_v61 = vshrl.u32 %v8615_v51, %v4491_v18  ;;  %v4506_v36 = vshrl.u32 %v8616_v21, %v4491_v18  ;;  %v7770_v63 = vand.u32 3, %v3020_v7  ;;  %v4345_v62 = vor.u32 %v4344_v24, %v4343_v1 }
 0x396   :  { %v4439_v40 = vsub.s32 0, %v7755_v60  ;;  %v7772_v50 = vpop.eup %5193  ;;  %v4495_v54 = vor.u32 %v4494_v11, %v4493_v37  ;;  %v4498_v59 = vor.u32 %v4497_v52, %v4496_v44  ;;  %v4501_v30 = vor.u32 %v4500_v8, %v4499_v27  ;;  %v2768_v8 = vpop.permute.xlu1 %2767 }
 0x397   :  { %v4504_v19 = vor.u32 %v4503_v61, %v4502_v43  ;;  %v4507_v20 = vor.u32 %v4506_v36, %v4505_v4  ;;  %v3030_v58 = vxor.u32 2147483648, %v8769_v9  ;;  %v4349_v49 = vor.u32 4788187, %v4348_v14  ;;  %v2656_v4 = vpop.permute.xlu0 %2655 }
 0x398   :  { %v4672_v56 = vmin.u32 %v4439_v40, %v7755_v60  ;;  %v4492_v39 = vshrl.u32 %v8603_v13, %v4491_v18  ;;  %vm4511_vm7 = vcmp.lt.s32.totalorder %v4489_v16, 4  ;;  %v2867_v51 = vmul.f32 1.442695, %v2851_v33 }
 0x399   :  { %vm4508_vm5 = vcmp.lt.s32.totalorder %v4489_v16, 1  ;;  %vm4509_vm8 = vcmp.lt.s32.totalorder %v4489_v16, 2  ;;  %v4513_v28 = vsel %vm4511_vm7, %v4501_v30, 2102212464  ;;  %vm4510_vm15 = vcmp.lt.s32.totalorder %v4489_v16, 3 }
 0x39a   :  { %v4441_v21 = vclz %v4672_v56  ;;  %v4516_v7 = vsel %vm4508_vm5, %v4495_v54, %v4498_v59  ;;  %v4517_v37 = vsel %vm4511_vm7, %v4504_v19, 920167782  ;;  %v4520_v11 = vsel %vm4508_vm5, %v4498_v59, %v4501_v30 }
 0x39b   :  { %v8770_v1 = vand.u32 2147483647, %v7324_v35  ;;  %v4512_v14 = vsel %vm4508_vm5, %v4492_v39, %v4495_v54  ;;  %v4518_v27 = vsel %vm4510_vm15, %v4501_v30, %v4517_v37  ;;  %v4521_v13 = vsel %vm4511_vm7, %v4507_v20, 1326507024 }
 0x39c   :  { %v4673_v44 = vadd.s32 4294967294, %v4441_v21  ;;  %v4514_v18 = vsel %vm4510_vm15, %v4498_v59, %v4513_v28  ;;  %v4519_v33 = vsel %vm4509_vm8, %v4516_v7, %v4518_v27  ;;  %v4522_v52 = vsel %vm4510_vm15, %v4504_v19, %v4521_v13  ;;  %v8779_v13 = vld [vmem:[#allocation4_spill] sm:$0xff] }
 0x39d   :  { %vm7779_vm9 = vcmp.le.f32.partialorder %v8770_v1, 0.7853982  ;;  %5195 = vpow2.f32 %v2867_v51  ;;  %v4523_v43 = vsel %vm4509_vm8, %v4520_v11, %v4522_v52  ;;  %v8773_v39 = vsub.s32 4, %v7523_v41 }
 0x39e   :  { %vm4674_vm0 = vcmp.lt.s32.totalorder %v4673_v44, 0  ;;  %v7786_v61 = vmul.u32.u64.low %v7750_v17, %v4519_v33  ;;  %v7787_v40 = vmul.u32.u64.high %v7750_v17, %v4519_v33, %v7786_v61  ;;  %vm8774_vm7 = vcmp.lt.s32.totalorder %v7324_v35, 0 }
 0x39f   :  { %v7795_v30 = vsel %vm8774_vm7, %v8773_v39, %v7523_v41  ;;  %v7798_v20 = vmul.u32.u64.low %v7750_v17, %v4523_v43  ;;  %v7799_v19 = vmul.u32.u64.high %v7750_v17, %v4523_v43, %v7798_v20  ;;  %vm3026_vm5 = vcmp.eq.s32.totalorder %v7770_v63, 0 }
 0x3a0   :  { %v4350_v36 = vand.u32 2147483647, %v4349_v49  ;;  %v7802_v54 = vsel %vm4674_vm0, 0, %v4673_v44  ;;  %v4515_v59 = vsel %vm4509_vm8, %v4512_v14, %v4514_v18  ;;  %vm3029_vm15 = vcmp.eq.s32.totalorder %v7770_v63, 2  ;;  %vm8777_vm0 = vmmov %vm8774_vm7  ;;  %v8780_v18 = vld [vmem:[#allocation11_spill] sm:$0xff]  ;;  %v8781_v20 = vld [vmem:[#allocation9_spill] sm:$0xff] }
 0x3a1   :  { %5197 = vcosq.f32 %v7733_v23  ;;  %vm4272_vm12 = vcmp.lt.s32.totalorder %v7400_v6, 0  ;;  %v8775_v41 = vxor.u32 2147483648, %v8768_v45  ;;  %v3031_v51 = vsel %vm3029_vm15, %v3030_v58, %v8768_v45  ;;  %v8778_v58 = vld [vmem:[#allocation8_spill] sm:$0xff]  ;;  %v2658_v45 = vpop.permute.xlu1 %2657 }
 0x3a2   :  { %v2718_v21 = vmul.f32 %v2656_v4, %v2656_v4  ;;  %v8776_v49 = vxor.u32 2147483648, %v7716_v12  ;;  %v4352_v28 = vcvt.s32.f32 %v4345_v62  ;;  %v4534_v7 = vadd.s32 1, %v7787_v40 }
 0x3a3   :  { %v3028_v56 = vsel %vm3026_vm5, %v8769_v9, %v8775_v41  ;;  %vm3025_vm8 = vcmp.lt.s32.totalorder %v7770_v63, 2  ;;  %v4449_v37 = vsub.s32 4294967266, %v7802_v54  ;;  %v4531_v11 = vmul.u32 %v7750_v17, %v4515_v59 }
 0x3a4   :  { %v4252_v16 = vsel %vm8777_vm0, %v8776_v49, %v7716_v12  ;;  %vm4533_vm7 = vc.u32 %v7799_v19, %v7786_v61  ;;  %v2702_v9 = vmul.f32 %v8778_v58, %v8778_v58  ;;  %5199 = vsinq.f32 %v7733_v23  ;;  %v8795_v49 = vld [vmem:[#allocation10_spill] sm:$0xff] }
 0x3a5   :  { %v4353_v1 = vmul.f32 %v4352_v28, %v4350_v36  ;;  %v4535_v12 = vsel %vm4533_vm7, %v4534_v7, %v7787_v40  ;;  %v3032_v62 = vsel %vm3025_vm8, %v3028_v56, %v3031_v51  ;;  %v4255_v63 = vsel %vm7779_vm9, %v7324_v35, %v4252_v16  ;;  %v8783_v16 = vld [vmem:[#allocation40_spill] sm:$0xff]  ;;  %v8802_v35 = vld [vmem:[#allocation54_spill] sm:$0xff] }
 0x3a6   :  { %v4356_v44 = vsub.s32 4, %v7628_v38  ;;  %v4536_v17 = vadd.s32 %v4535_v12, %v4531_v11  ;;  %v2734_v14 = vadd.f32 %v2718_v21, %v2702_v9  ;;  %v4445_v27 = vsub.s32 32, %v7802_v54  ;;  %v2770_v11 = vpop.permute.xlu0 %2769  ;;  %v7855_v12 = vpop.permute.xlu1 %2659 }
 0x3a7   :  { %vm3023_vm5 = vweird.f32 %v8779_v13  ;;  %v2703_v33 = vmul.f32 %v8780_v18, %v8780_v18  ;;  %v2719_v23 = vmul.f32 %v2658_v45, %v2658_v45  ;;  %v5196_v52 = vpop.eup %5195  ;;  %v4450_v43 = vadd.s32 127, %v4449_v37 }
 0x3a8   :  { %v4537_v40 = vadd.s32 536870912, %v4536_v17  ;;  %v3033_v39 = vsel %vm3023_vm5, nan, %v3032_v62  ;;  %v2750_v36 = vadd.f32 %v2734_v14, %v8781_v20  ;;  %v4354_v59 = vxor.u32 2147483648, %v4353_v1 }
 0x3a9   :  { %v4429_v41 = vadd.s32 %v7676_v25, %v7682_v26  ;;  %v4579_v56 = vmul.f32 %v5196_v52, %v3033_v39  ;;  %v2735_v51 = vadd.f32 %v2719_v23, %v2703_v33  ;;  %5201 = vcosq.f32 %v4255_v63  ;;  %v8786_v26 = vld [vmem:[#allocation12_spill] sm:$0xff] }
 0x3aa   :  { %v7838_v21 = vshrl.u32 %v4537_v40, 30  ;;  %v8784_v28 = vsel %vm6689_vm13, 0, %v8783_v16  ;;  %v2798_v37 = vadd.f32 %v2768_v8, %v2750_v36  ;;  %5203 = vsinq.f32 %v4255_v63  ;;  %v8788_v33 = vld [vmem:[#allocation44_spill] sm:$0xff] }
 0x3ab   :  { %v7844_v7 = vand.u32 3, %v8784_v28  ;;  %v7849_v58 = vsel %vm4272_vm12, %v4356_v44, %v7628_v38  ;;  %v4447_v25 = vshrl.u32 %v4429_v41, %v4445_v27  ;;  %4595 = vst [vmem:[%s8219_s5] sm:$0xff] %v4579_v56  ;;  %v2751_v9 = vadd.f32 %v2735_v51, %v8786_v26  ;;  %v7857_v62 = vpop.eup %5197  ;;  %v8787_v27 = vld [vmem:[#allocation48_spill] sm:$0xff] }
 0x3ac   :  { %8785 = vst [vmem:[#allocation7_spill] sm:$0xff] %v7849_v58  ;;  %v4451_v14 = vshll.u32 %v4450_v43, 23  ;;  %v4539_v8 = vshll.u32 %v7838_v21, 30  ;;  %v2820_v63 = vmul.f32 -30.0, %v2656_v4  ;;  %v2836_v13 = vmul.f32 100.0, %v2798_v37  ;;  %v8796_v37 = vld [vmem:[#allocation14_spill] sm:$0xff] }
 0x3ad   :  { %v4355_v38 = vsel %vm4272_vm12, %v4354_v59, %v4353_v1  ;;  %v4446_v44 = vshll.u32 %v7755_v60, %v7802_v54  ;;  %v3130_v18 = vxor.u32 2147483648, %v8787_v27  ;;  %v3226_v52 = vsel %vm6810_vm4, 0, %v8788_v33  ;;  %v8794_v1 = vld [vmem:[#allocation46_spill] sm:$0xff] }
 0x3ae   :  { %v8790_v40 = vand.u32 2147483647, %v7400_v6  ;;  %v8791_v43 = vmov 0  ;;  %v7874_v4 = vsub.s32 %v4536_v17, %v4539_v8  ;;  %vm3128_vm15 = vcmp.lt.s32.totalorder %v7844_v7, 2  ;;  %v7878_v60 = vpop.eup %5199  ;;  %v2662_v17 = vpop.permute.xlu0 %2661 }
 0x3af   :  { %v3133_v39 = vxor.u32 2147483648, %v8794_v1  ;;  %v2852_v20 = vsub.f32 %v2820_v63, %v2836_v13  ;;  %v4448_v54 = vor.u32 %v4447_v25, %v4446_v44  ;;  %vm3129_vm12 = vcmp.eq.s32.totalorder %v7844_v7, 0  ;;  %v2772_v8 = vpop.permute.xlu1 %2771  ;;  %v8799_v44 = vld [vmem:[#allocation18_spill] sm:$0xff] }
 0x3b0   :  { %vm7870_vm13 = vcmp.le.f32.partialorder %v8790_v40, 0.7853982  ;;  %vm3132_vm4 = vcmp.eq.s32.totalorder %v7844_v7, 2  ;;  %v2799_v36 = vadd.f32 %v2770_v11, %v2751_v9  ;;  %v4452_v59 = vor.u32 4788187, %v4451_v14  ;;  %v8797_v11 = vld [vmem:[#allocation57_spill] sm:$0xff] }
 0x3b1   :  { %v8792_v43 = vsel %vm7870_vm13, 4294967295, %v8791_v43  ;;  %v4542_v41 = vsub.s32 0, %v7874_v4  ;;  %v2869_v56 = vmul.f32 1.442695, %v2852_v20  ;;  %v3230_v51 = vand.u32 3, %v3226_v52  ;;  %v8798_v14 = vld [vmem:[#allocation56_spill] sm:$0xff] }
 0x3b2   :  { %8793 = vst [vmem:[#allocation41_spill] sm:$0xff] %v8792_v43  ;;  %vm3126_vm0 = vweird.f32 %v8795_v49  ;;  %v2821_v16 = vmul.f32 -30.0, %v2658_v45  ;;  %v2837_v28 = vmul.f32 100.0, %v2799_v36  ;;  %v2704_v26 = vmul.f32 %v8796_v37, %v8796_v37 }
 0x3b3   :  { %v2720_v25 = vmul.f32 %v7855_v12, %v7855_v12  ;;  %v4676_v63 = vmin.u32 %v4542_v41, %v7874_v4  ;;  %v3233_v9 = vxor.u32 2147483648, %v8797_v11  ;;  %v3236_v13 = vxor.u32 2147483648, %v8798_v14  ;;  %v7893_v40 = vpop.eup %5201 }
 0x3b4   :  { %v2705_v33 = vmul.f32 %v8799_v44, %v8799_v44  ;;  %5205 = vpow2.f32 %v2869_v56  ;;  %v2853_v23 = vsub.f32 %v2821_v16, %v2837_v28  ;;  %v2721_v52 = vmul.f32 %v2662_v17, %v2662_v17  ;;  %8800 = vst [vmem:[#allocation33_spill] sm:$0xff] %v7893_v40  ;;  %v7901_v37 = vpop.eup %5203  ;;  %v8801_v16 = vld [vmem:[#allocation28_spill] sm:$0xff] }
 0x3b5   :  { %v2736_v45 = vadd.f32 %v2720_v25, %v2704_v26  ;;  %v4544_v20 = vclz %v4676_v63  ;;  %v3131_v36 = vsel %vm3129_vm12, %v8794_v1, %v3130_v18  ;;  %v3134_v41 = vsel %vm3132_vm4, %v3133_v39, %v8787_v27 }
 0x3b6   :  { %vm3232_vm8 = vcmp.eq.s32.totalorder %v3230_v51, 0  ;;  %vm3235_vm7 = vcmp.eq.s32.totalorder %v3230_v51, 2  ;;  %v2871_v44 = vmul.f32 1.442695, %v2853_v23  ;;  %v2737_v56 = vadd.f32 %v2721_v52, %v2705_v33  ;;  %v7916_v33 = vpop.permute.xlu1 %2663 }
 0x3b7   :  { %v2752_v28 = vadd.f32 %v2736_v45, %v8801_v16  ;;  %v4677_v26 = vadd.s32 4294967294, %v4544_v20  ;;  %v3234_v25 = vsel %vm3232_vm8, %v8798_v14, %v3233_v9  ;;  %v3237_v63 = vsel %vm3235_vm7, %v3236_v13, %v8797_v11  ;;  %v8804_v13 = vld [vmem:[#allocation37_spill] sm:$0xff] }
 0x3b8   :  { %v3329_v18 = vsel %vm6934_vm2, 0, %v8802_v35  ;;  %v7912_v27 = vsel %vm7870_vm13, %v7400_v6, %v4355_v38  ;;  %v4453_v1 = vand.u32 2147483647, %v4452_v59  ;;  %v3135_v39 = vsel %vm3128_vm15, %v3131_v36, %v3134_v41  ;;  %v2774_v38 = vpop.permute.xlu0 %2773  ;;  %v8805_v45 = vld [vmem:[#allocation13_spill] sm:$0xff]  ;;  %v8806_v41 = vld [vmem:[#allocation60_spill] sm:$0xff] }
 0x3b9   :  { %5207 = vpow2.f32 %v2871_v44  ;;  %vm4678_vm5 = vcmp.lt.s32.totalorder %v4677_v26, 0  ;;  %vm3231_vm12 = vcmp.lt.s32.totalorder %v3230_v51, 2  ;;  %v2800_v11 = vadd.f32 %v2772_v8, %v2752_v28  ;;  %v8808_v28 = vld [vmem:[#allocation55_spill] sm:$0xff] }
 0x3ba   :  { %v4455_v14 = vcvt.s32.f32 %v4448_v54  ;;  %v3238_v58 = vsel %vm3231_vm12, %v3234_v25, %v3237_v63  ;;  %v7919_v35 = vand.u32 3, %v3329_v18  ;;  %v2753_v23 = vadd.f32 %v2737_v56, %v8804_v13 }
 0x3bb   :  { %5209 = vcosq.f32 %v7912_v27  ;;  %v4532_v7 = vadd.s32 %v7786_v61, %v7799_v19  ;;  %v3136_v59 = vsel %vm3126_vm0, nan, %v3135_v39  ;;  %vm3229_vm2 = vweird.f32 %v8805_v45  ;;  %v8807_v61 = vld [vmem:[#allocation58_spill] sm:$0xff] }
 0x3bc   :  { %v7928_v52 = vmul.f32 %v4455_v14, %v4453_v1  ;;  %v7930_v51 = vsel %vm4678_vm5, 0, %v4677_v26  ;;  %v2822_v54 = vmul.f32 -30.0, %v7855_v12  ;;  %v2838_v8 = vmul.f32 100.0, %v2800_v11  ;;  %v2776_v26 = vpop.permute.xlu1 %2775  ;;  %v8810_v11 = vld [vmem:[#allocation31_spill] sm:$0xff]  ;;  %v2666_v13 = vpop.permute.xlu0 %2665 }
 0x3bd   :  { %v3239_v20 = vsel %vm3229_vm2, nan, %v3238_v58  ;;  %v2823_v36 = vmul.f32 -30.0, %v2662_v17  ;;  %v3336_v44 = vxor.u32 2147483648, %v8806_v41  ;;  %v2801_v56 = vadd.f32 %v2774_v38, %v2753_v23 }
 0x3be   :  { %v5206_v16 = vpop.eup %5205  ;;  %vm3334_vm15 = vcmp.lt.s32.totalorder %v7919_v35, 2  ;;  %v3339_v19 = vxor.u32 2147483648, %v8807_v61  ;;  %v2854_v49 = vsub.f32 %v2822_v54, %v2838_v8  ;;  %v3432_v63 = vsel %vm7111_vm1, 0, %v8808_v28  ;;  %v8812_v8 = vld [vmem:[#allocation67_spill] sm:$0xff] }
 0x3bf   :  { %v4548_v18 = vsub.s32 32, %v7930_v51  ;;  %v4552_v12 = vsub.s32 4294967266, %v7930_v51  ;;  %v4580_v1 = vmul.f32 %v5206_v16, %v3136_v59  ;;  %vm3335_vm4 = vcmp.eq.s32.totalorder %v7919_v35, 0  ;;  %v8811_v59 = vld [vmem:[#allocation68_spill] sm:$0xff] }
 0x3c0   :  { %v2873_v17 = vmul.f32 1.442695, %v2854_v49  ;;  %v2839_v39 = vmul.f32 100.0, %v2801_v56  ;;  %v2706_v14 = vmul.f32 %v8810_v11, %v8810_v11  ;;  %v2722_v58 = vmul.f32 %v7916_v33, %v7916_v33  ;;  %v8813_v11 = vld [vmem:[#allocation29_spill] sm:$0xff]  ;;  %v7959_v40 = vpop.permute.xlu1 %2667 }
 0x3c1   :  { %4596 = vst [vmem:[%s8219_s5 + $0x8] sm:$0xff] %v4580_v1  ;;  %v3337_v23 = vsel %vm3335_vm4, %v8807_v61, %v3336_v44  ;;  %vm3338_vm1 = vcmp.eq.s32.totalorder %v7919_v35, 2  ;;  %v3436_v38 = vand.u32 3, %v3432_v63  ;;  %v3439_v45 = vxor.u32 2147483648, %v8811_v59  ;;  %v8814_v63 = vld [vmem:[#allocation27_spill] sm:$0xff] }
 0x3c2   :  { %5211 = vpow2.f32 %v2873_v17  ;;  %v3442_v56 = vxor.u32 2147483648, %v8812_v8  ;;  %v2855_v16 = vsub.f32 %v2823_v36, %v2839_v39  ;;  %v2738_v49 = vadd.f32 %v2722_v58, %v2706_v14  ;;  %v8815_v36 = vld [vmem:[#allocation42_spill] sm:$0xff]  ;;  %v2778_v39 = vpop.permute.xlu0 %2777 }
 0x3c3   :  { %v5208_v54 = vpop.eup %5207  ;;  %v3340_v25 = vsel %vm3338_vm1, %v3339_v19, %v8806_v41  ;;  %v2707_v9 = vmul.f32 %v8813_v11, %v8813_v11  ;;  %v2723_v1 = vmul.f32 %v2666_v13, %v2666_v13  ;;  %v4550_v6 = vshrl.u32 %v4532_v7, %v4548_v18 }
 0x3c4   :  { %v4581_v28 = vmul.f32 %v5208_v54, %v3239_v20  ;;  %v7956_v44 = vadd.s32 127, %v4552_v12  ;;  %v2875_v61 = vmul.f32 1.442695, %v2855_v16  ;;  %v2754_v43 = vadd.f32 %v2738_v49, %v8814_v63 }
 0x3c5   :  { %v7961_v17 = vpop.eup %5209  ;;  %vm3438_vm0 = vcmp.eq.s32.totalorder %v3436_v38, 0  ;;  %vm3441_vm8 = vcmp.eq.s32.totalorder %v3436_v38, 2  ;;  %v2739_v20 = vadd.f32 %v2723_v1, %v2707_v9  ;;  %v3535_v7 = vsel %vm7141_vm10, 0, %v8815_v36  ;;  %v8823_v1 = vld [vmem:[#allocation69_spill] sm:$0xff] }
 0x3c6   :  { %4597 = vst [vmem:[%s8219_s5 + $0x10] sm:$0xff] %v4581_v28  ;;  %v3440_v19 = vsel %vm3438_vm0, %v8812_v8, %v3439_v45  ;;  %v3443_v18 = vsel %vm3441_vm8, %v3442_v56, %v8811_v59  ;;  %5213 = vpow2.f32 %v2875_v61  ;;  %v2802_v12 = vadd.f32 %v2776_v26, %v2754_v43  ;;  %v8817_v28 = vld [vmem:[#allocation39_spill] sm:$0xff]  ;;  %v8818_v59 = vld [vmem:[#allocation26_spill] sm:$0xff]  ;;  %v8819_v43 = vld [vmem:[#allocation21_spill] sm:$0xff] }
 0x3c7   :  { %v4457_v14 = vxor.u32 2147483648, %v7928_v52  ;;  %v4549_v58 = vshll.u32 %v7874_v4, %v7930_v51  ;;  %v3341_v54 = vsel %vm3334_vm15, %v3337_v23, %v3340_v25  ;;  %vm3437_vm7 = vcmp.lt.s32.totalorder %v3436_v38, 2  ;;  %v8820_v8 = vld [vmem:[#allocation15_spill] sm:$0xff]  ;;  %v2780_v38 = vpop.permute.xlu1 %2779  ;;  %v8822_v25 = vld [vmem:[#allocation70_spill] sm:$0xff] }
 0x3c8   :  { %v2824_v9 = vmul.f32 -30.0, %v7916_v33  ;;  %v3539_v16 = vand.u32 3, %v3535_v7  ;;  %v2840_v49 = vmul.f32 100.0, %v2802_v12  ;;  %v2755_v45 = vadd.f32 %v2739_v20, %v8817_v28  ;;  %v8865_v7 = vld [vmem:[#allocation20_spill] sm:$0xff] }
 0x3c9   :  { %vm4375_vm10 = vcmp.lt.s32.totalorder %v7527_v46, 0  ;;  %vm3332_vm5 = vweird.f32 %v8818_v59  ;;  %vm3435_vm12 = vweird.f32 %v8819_v43  ;;  %v3444_v26 = vsel %vm3437_vm7, %v3440_v19, %v3443_v18  ;;  %v2670_v18 = vpop.permute.xlu0 %2669 }
 0x3ca   :  { %v3638_v4 = vsel %vm7181_vm14, 0, %v8820_v8  ;;  %v7984_v35 = vor.u32 %v4550_v6, %v4549_v58  ;;  %v4554_v51 = vshll.u32 %v7956_v44, 23  ;;  %v3342_v33 = vsel %vm3332_vm5, nan, %v3341_v54  ;;  %v8827_v58 = vld [vmem:[#allocation22_spill] sm:$0xff] }
 0x3cb   :  { %v2856_v23 = vsub.f32 %v2824_v9, %v2840_v49  ;;  %v3542_v11 = vxor.u32 2147483648, %v8822_v25  ;;  %v3545_v61 = vxor.u32 2147483648, %v8823_v1  ;;  %v3642_v63 = vand.u32 3, %v3638_v4  ;;  %v8828_v9 = vld [vmem:[#allocation71_spill] sm:$0xff]  ;;  %v8830_v4 = vld [vmem:[#allocation49_spill] sm:$0xff] }
 0x3cc   :  { %v2803_v20 = vadd.f32 %v2778_v39, %v2755_v45  ;;  %v5212_v36 = vpop.eup %5211  ;;  %v8824_v41 = vand.u32 2147483647, %v7527_v46  ;;  %v3445_v6 = vsel %vm3435_vm12, nan, %v3444_v26  ;;  %v2825_v19 = vmul.f32 -30.0, %v2666_v13  ;;  %v8829_v39 = vld [vmem:[#allocation38_spill] sm:$0xff] }
 0x3cd   :  { %vm3541_vm14 = vcmp.eq.s32.totalorder %v3539_v16, 0  ;;  %v2877_v44 = vmul.f32 1.442695, %v2856_v23  ;;  %v4582_v12 = vmul.f32 %v5212_v36, %v3342_v33  ;;  %v3645_v54 = vxor.u32 2147483648, %v8827_v58 }
 0x3ce   :  { %vm7991_vm2 = vcmp.le.f32.partialorder %v8824_v41, 0.7853982  ;;  %v3648_v49 = vxor.u32 2147483648, %v8828_v9  ;;  %v2841_v28 = vmul.f32 100.0, %v2803_v20  ;;  %vm3544_vm15 = vcmp.eq.s32.totalorder %v3539_v16, 2  ;;  %v8008_v20 = vpop.permute.xlu1 %2671 }
 0x3cf   :  { %5215 = vpow2.f32 %v2877_v44  ;;  %v2708_v45 = vmul.f32 %v8829_v39, %v8829_v39  ;;  %v2724_v59 = vmul.f32 %v7959_v40, %v7959_v40  ;;  %4598 = vst [vmem:[%s8219_s5 + $0x18] sm:$0xff] %v4582_v12  ;;  %v3543_v13 = vsel %vm3541_vm14, %v8823_v1, %v3542_v11  ;;  %v8835_v39 = vld [vmem:[#allocation34_spill] sm:$0xff] }
 0x3d0   :  { %v3546_v43 = vsel %vm3544_vm15, %v3545_v61, %v8822_v25  ;;  %vm3644_vm4 = vcmp.eq.s32.totalorder %v3642_v63, 0  ;;  %v2857_v26 = vsub.f32 %v2825_v19, %v2841_v28  ;;  %v5214_v8 = vpop.eup %5213  ;;  %vm3647_vm1 = vcmp.eq.s32.totalorder %v3642_v63, 2  ;;  %v8831_v61 = vld [vmem:[#allocation19_spill] sm:$0xff]  ;;  %v2782_v28 = vpop.permute.xlu0 %2781 }
 0x3d1   :  { %v2740_v56 = vadd.f32 %v2724_v59, %v2708_v45  ;;  %v2709_v33 = vmul.f32 %v8830_v4, %v8830_v4  ;;  %v2725_v23 = vmul.f32 %v2670_v18, %v2670_v18  ;;  %v4583_v36 = vmul.f32 %v5214_v8, %v3445_v6  ;;  %v8832_v6 = vld [vmem:[#allocation6_spill] sm:$0xff]  ;;  %v8836_v4 = vld [vmem:[#allocation73_spill] sm:$0xff] }
 0x3d2   :  { %v3646_v41 = vsel %vm3644_vm4, %v8828_v9, %v3645_v54  ;;  %v3649_v44 = vsel %vm3647_vm1, %v3648_v49, %v8827_v58  ;;  %v2879_v12 = vmul.f32 1.442695, %v2857_v26  ;;  %v4458_v25 = vsel %vm4375_vm10, %v4457_v14, %v7928_v52  ;;  %v8833_v49 = vld [vmem:[#allocation24_spill] sm:$0xff] }
 0x3d3   :  { %v4555_v11 = vor.u32 4788187, %v4554_v51  ;;  %v2741_v1 = vadd.f32 %v2725_v23, %v2709_v33  ;;  %v2756_v19 = vadd.f32 %v2740_v56, %v8831_v61  ;;  %4599 = vst [vmem:[%s8219_s5 + $0x20] sm:$0xff] %v4583_v36  ;;  %vm3540_vm0 = vcmp.lt.s32.totalorder %v3539_v16, 2  ;;  %v8834_v16 = vld [vmem:[#allocation23_spill] sm:$0xff] }
 0x3d4   :  { %vm3643_vm8 = vcmp.lt.s32.totalorder %v3642_v63, 2  ;;  %5217 = vpow2.f32 %v2879_v12  ;;  %v3741_v58 = vsel %vm7349_vm6, 0, %v8832_v6  ;;  %v3547_v54 = vsel %vm3540_vm0, %v3543_v13, %v3546_v43  ;;  %v2674_v36 = vpop.permute.xlu0 %2673  ;;  %v8838_v12 = vld [vmem:[#allocation50_spill] sm:$0xff] }
 0x3d5   :  { %5219 = vsinq.f32 %v7912_v27  ;;  %v3650_v52 = vsel %vm3643_vm8, %v3646_v41, %v3649_v44  ;;  %v2804_v14 = vadd.f32 %v2780_v38, %v2756_v19  ;;  %v4461_v51 = vsel %vm7991_vm2, %v7527_v46, %v4458_v25  ;;  %v2784_v27 = vpop.permute.xlu1 %2783  ;;  %v8837_v44 = vld [vmem:[#allocation32_spill] sm:$0xff] }
 0x3d6   :  { %v4558_v9 = vcvt.s32.f32 %v7984_v35  ;;  %vm3538_vm7 = vweird.f32 %v8833_v49  ;;  %v2757_v63 = vadd.f32 %v2741_v1, %v8834_v16  ;;  %vm3641_vm5 = vweird.f32 %v8835_v39 }
 0x3d7   :  { %v2826_v0 = vmul.f32 -30.0, %v7959_v40  ;;  %v3745_v45 = vand.u32 3, %v3741_v58  ;;  %v2842_v59 = vmul.f32 100.0, %v2804_v14  ;;  %v4556_v13 = vand.u32 2147483647, %v4555_v11 }
 0x3d8   :  { %v3548_v43 = vsel %vm3538_vm7, nan, %v3547_v54  ;;  %v3651_v38 = vsel %vm3641_vm5, nan, %v3650_v52  ;;  %v3748_v26 = vxor.u32 2147483648, %v7444_v57  ;;  %v2827_v56 = vmul.f32 -30.0, %v2670_v18 }
 0x3d9   :  { %v5216_v8 = vpop.eup %5215  ;;  %v3751_v35 = vxor.u32 2147483648, %v8836_v4  ;;  %v2858_v33 = vsub.f32 %v2826_v0, %v2842_v59  ;;  %v2805_v23 = vadd.f32 %v2782_v28, %v2757_v63  ;;  %v3844_v40 = vsel %vm7449_vm11, 0, %v8837_v44  ;;  %v8839_v28 = vld [vmem:[#allocation25_spill] sm:$0xff]  ;;  %v8047_v14 = vpop.permute.xlu1 %2675 }
 0x3da   :  { %v4584_v41 = vmul.f32 %v5216_v8, %v3548_v43  ;;  %v2710_v25 = vmul.f32 %v8838_v12, %v8838_v12  ;;  %v2726_v11 = vmul.f32 %v8008_v20, %v8008_v20  ;;  %vm3747_vm6 = vcmp.eq.s32.totalorder %v3745_v45, 0  ;;  %v8840_v0 = vld [vmem:[#allocation5_spill] sm:$0xff] }
 0x3db   :  { %vm3750_vm12 = vcmp.eq.s32.totalorder %v3745_v45, 2  ;;  %v2881_v1 = vmul.f32 1.442695, %v2858_v33  ;;  %v2843_v18 = vmul.f32 100.0, %v2805_v23  ;;  %v3749_v61 = vsel %vm3747_vm6, %v8836_v4, %v3748_v26  ;;  %v2786_v4 = vpop.permute.xlu0 %2785  ;;  %v8841_v23 = vld [vmem:[#allocation30_spill] sm:$0xff] }
 0x3dc   :  { %4600 = vst [vmem:[%s8219_s5 + $0x28] sm:$0xff] %v4584_v41  ;;  %v2742_v19 = vadd.f32 %v2726_v11, %v2710_v25  ;;  %v2711_v34 = vmul.f32 %v8839_v28, %v8839_v28  ;;  %v2727_v6 = vmul.f32 %v2674_v36, %v2674_v36  ;;  %v3752_v58 = vsel %vm3750_vm12, %v3751_v35, %v7444_v57  ;;  %v8842_v25 = vld [vmem:[#allocation16_spill] sm:$0xff] }
 0x3dd   :  { %5221 = vpow2.f32 %v2881_v1  ;;  %v3848_v54 = vand.u32 3, %v3844_v40  ;;  %v2859_v52 = vsub.f32 %v2827_v56, %v2843_v18  ;;  %v3851_v16 = vxor.u32 2147483648, %v7661_v31  ;;  %v2788_v12 = vpop.permute.xlu1 %2787 }
 0x3de   :  { %v5218_v49 = vpop.eup %5217  ;;  %v3854_v63 = vxor.u32 2147483648, %v7635_v42  ;;  %v2743_v39 = vadd.f32 %v2727_v6, %v2711_v34  ;;  %v2758_v59 = vadd.f32 %v2742_v19, %v8840_v0  ;;  %v8054_v26 = vmul.f32 %v4558_v9, %v4556_v13 }
 0x3df   :  { %v8052_v43 = vpop.eup %5219  ;;  %v4585_v8 = vmul.f32 %v5218_v49, %v3651_v38  ;;  %vm3746_vm11 = vcmp.lt.s32.totalorder %v3745_v45, 2  ;;  %v2883_v57 = vmul.f32 1.442695, %v2859_v52  ;;  %5223 = vcosq.f32 %v4461_v51  ;;  %v8073_v18 = vpop.permute.xlu0 %2677 }
 0x3e0   :  { %v4562_v56 = vsub.s32 4, %v7838_v21  ;;  %v3753_v35 = vsel %vm3746_vm11, %v3749_v61, %v3752_v58  ;;  %v2806_v33 = vadd.f32 %v2784_v27, %v2758_v59  ;;  %vm3850_vm14 = vcmp.eq.s32.totalorder %v3848_v54, 0  ;;  %v8844_v61 = vld [vmem:[#allocation63_spill] sm:$0xff] }
 0x3e1   :  { %4601 = vst [vmem:[%s8219_s5 + $0x30] sm:$0xff] %v4585_v8  ;;  %vm3853_vm15 = vcmp.eq.s32.totalorder %v3848_v54, 2  ;;  %5225 = vpow2.f32 %v2883_v57  ;;  %v2759_v41 = vadd.f32 %v2743_v39, %v8841_v23  ;;  %v3852_v9 = vsel %vm3850_vm14, %v7635_v42, %v3851_v16  ;;  %v8086_v39 = vpop.permute.xlu1 %2679  ;;  %v8845_v8 = vld [vmem:[#allocation65_spill] sm:$0xff]  ;;  %v8846_v57 = vld [vmem:[#allocation66_spill] sm:$0xff] }
 0x3e2   :  { %v3855_v45 = vsel %vm3853_vm15, %v3854_v63, %v7661_v31  ;;  %v2828_v13 = vmul.f32 -30.0, %v8008_v20  ;;  %v2844_v38 = vmul.f32 100.0, %v2806_v33  ;;  %5227 = vsinq.f32 %v4461_v51 }
 0x3e3   :  { %v4560_v44 = vxor.u32 2147483648, %v8054_v26  ;;  %v3947_v27 = vsel %vm7563_vm3, 0, %v7510_v3  ;;  %v2807_v40 = vadd.f32 %v2786_v4, %v2759_v41  ;;  %vm3744_vm4 = vweird.f32 %v8842_v25  ;;  %v8088_v0 = vpop.permute.xlu0 %2681 }
 0x3e4   :  { %vm3849_vm1 = vcmp.lt.s32.totalorder %v3848_v54, 2  ;;  %v2860_v11 = vsub.f32 %v2828_v13, %v2844_v38  ;;  %vm8843_vm0 = vnez %v8760_v29  ;;  %vm4478_vm8 = vcmp.lt.s32.totalorder %v7670_v5, 0 }
 0x3e5   :  { %v4050_v31 = vsel %vm8843_vm0, 0, %v7721_v32  ;;  %v3754_v42 = vsel %vm3744_vm4, nan, %v3753_v35  ;;  %v3856_v20 = vsel %vm3849_vm1, %v3852_v9, %v3855_v45  ;;  %v2829_v51 = vmul.f32 -30.0, %v2674_v36 }
 0x3e6   :  { %v2845_v1 = vmul.f32 100.0, %v2807_v40  ;;  %v3951_v2 = vand.u32 3, %v3947_v27  ;;  %v2885_v3 = vmul.f32 1.442695, %v2860_v11  ;;  %v2712_v19 = vmul.f32 %v8844_v61, %v8844_v61 }
 0x3e7   :  { %v2728_v28 = vmul.f32 %v8047_v14, %v8047_v14  ;;  %v5222_v34 = vpop.eup %5221  ;;  %v3954_v29 = vxor.u32 2147483648, %v7752_v53  ;;  %v3957_v32 = vxor.u32 2147483648, %v7735_v47  ;;  %v4054_v6 = vand.u32 3, %v4050_v31  ;;  %v8123_v31 = vpop.permute.xlu1 %2683 }
 0x3e8   :  { %v2861_v58 = vsub.f32 %v2829_v51, %v2845_v1  ;;  %v4586_v54 = vmul.f32 %v5222_v34, %v3754_v42  ;;  %5229 = vpow2.f32 %v2885_v3  ;;  %v2729_v52 = vmul.f32 %v8073_v18, %v8073_v18  ;;  %v2790_v42 = vpop.permute.xlu0 %2789  ;;  %v8853_v1 = vld [vmem:[#allocation75_spill] sm:$0xff] }
 0x3e9   :  { %v2744_v36 = vadd.f32 %v2728_v28, %v2712_v19  ;;  %vm3847_vm3 = vweird.f32 %v6926_v10  ;;  %v4057_v49 = vxor.u32 2147483648, %v7772_v50  ;;  %v4060_v16 = vxor.u32 2147483648, %v7760_v48  ;;  %v8090_v59 = vpop.eup %5223 }
 0x3ea   :  { %v2887_v63 = vmul.f32 1.442695, %v2861_v58  ;;  %4602 = vst [vmem:[%s8219_s5 + $0x38] sm:$0xff] %v4586_v54  ;;  %vm3953_vm7 = vcmp.eq.s32.totalorder %v3951_v2, 0  ;;  %vm3956_vm5 = vcmp.eq.s32.totalorder %v3951_v2, 2  ;;  %v2713_v10 = vmul.f32 %v8845_v8, %v8845_v8 }
 0x3eb   :  { %v2760_v4 = vadd.f32 %v2744_v36, %v8846_v57  ;;  %v5226_v35 = vpop.eup %5225  ;;  %v3857_v33 = vsel %vm3847_vm3, nan, %v3856_v20  ;;  %v3955_v23 = vsel %vm3953_vm7, %v7735_v47, %v3954_v29  ;;  %v3958_v41 = vsel %vm3956_vm5, %v3957_v32, %v7752_v53  ;;  %v8854_v29 = vld [vmem:[#allocation61_spill] sm:$0xff] }
 0x3ec   :  { %5231 = vpow2.f32 %v2887_v63  ;;  %v4587_v9 = vmul.f32 %v5226_v35, %v3857_v33  ;;  %vm4056_vm6 = vcmp.eq.s32.totalorder %v4054_v6, 0  ;;  %vm4059_vm12 = vcmp.eq.s32.totalorder %v4054_v6, 2  ;;  %v8100_v13 = vpop.eup %5227  ;;  %v2792_v35 = vpop.permute.xlu1 %2791 }
 0x3ed   :  { %v2745_v45 = vadd.f32 %v2729_v52, %v2713_v10  ;;  %v4058_v38 = vsel %vm4056_vm6, %v7760_v48, %v4057_v49  ;;  %v4061_v27 = vsel %vm4059_vm12, %v4060_v16, %v7772_v50  ;;  %vm8847_vm11 = vnez %v8763_v22  ;;  %v8851_v48 = vld [vmem:[#allocation3_spill] sm:$0xff]  ;;  %v8855_v52 = vld [vmem:[#allocation74_spill] sm:$0xff] }
 0x3ee   :  { %v4153_v40 = vsel %vm8847_vm11, 0, %v7726_v55  ;;  %v2808_v25 = vadd.f32 %v2788_v12, %v2760_v4  ;;  %v8848_v47 = vand.u32 2147483647, %v7670_v5  ;;  %v4561_v11 = vsel %vm4478_vm8, %v4560_v44, %v8054_v26  ;;  %4603 = vst [vmem:[%s8219_s5 + $0x40] sm:$0xff] %v4587_v9  ;;  %v8852_v44 = vld [vmem:[#allocation72_spill] sm:$0xff] }
 0x3ef   :  { %vm3950_vm15 = vweird.f32 %v8851_v48  ;;  %vm3952_vm4 = vcmp.lt.s32.totalorder %v3951_v2, 2  ;;  %v2730_v22 = vmul.f32 %v8086_v39, %v8086_v39  ;;  %vm4055_vm1 = vcmp.lt.s32.totalorder %v4054_v6, 2  ;;  %v8859_v48 = vld [vmem:[#allocation76_spill] sm:$0xff] }
 0x3f0   :  { %vm8109_vm14 = vcmp.le.f32.partialorder %v8848_v47, 0.7853982  ;;  %v3959_v55 = vsel %vm3952_vm4, %v3955_v23, %v3958_v41  ;;  %v2830_v50 = vmul.f32 -30.0, %v8047_v14  ;;  %v2846_v12 = vmul.f32 100.0, %v2808_v25  ;;  %v8856_v41 = vld [vmem:[#allocation53_spill] sm:$0xff] }
 0x3f1   :  { %v4062_v20 = vsel %vm4055_vm1, %v4058_v38, %v4061_v27  ;;  %v4157_v26 = vand.u32 3, %v4153_v40  ;;  %v2714_v51 = vmul.f32 %v8852_v44, %v8852_v44  ;;  %v2761_v3 = vadd.f32 %v2745_v45, %v8853_v1  ;;  %v2794_v40 = vpop.permute.xlu0 %2793 }
 0x3f2   :  { %v4160_v2 = vxor.u32 2147483648, %v7878_v60  ;;  %v4163_v61 = vxor.u32 2147483648, %v7857_v62  ;;  %v2862_v19 = vsub.f32 %v2830_v50, %v2846_v12  ;;  %v2731_v28 = vmul.f32 %v8088_v0, %v8088_v0  ;;  %v5230_v14 = vpop.eup %5229 }
 0x3f3   :  { %v3960_v34 = vsel %vm3950_vm15, nan, %v3959_v55  ;;  %vm4053_vm0 = vweird.f32 %v8854_v29  ;;  %v2746_v32 = vadd.f32 %v2730_v22, %v2714_v51  ;;  %v2809_v6 = vadd.f32 %v2790_v42, %v2761_v3  ;;  %v8860_v55 = vld [vmem:[#allocation33_spill] sm:$0xff]  ;;  %v8863_v51 = vld [vmem:[#allocation43_spill] sm:$0xff]  ;;  %v2796_v29 = vpop.permute.xlu1 %2795 }
 0x3f4   :  { %v4588_v58 = vmul.f32 %v5230_v14, %v3960_v34  ;;  %v4063_v54 = vsel %vm4053_vm0, nan, %v4062_v20  ;;  %v2889_v36 = vmul.f32 1.442695, %v2862_v19  ;;  %v2715_v49 = vmul.f32 %v8855_v52, %v8855_v52  ;;  %v8861_v20 = vld [vmem:[#allocation7_spill] sm:$0xff] }
 0x3f5   :  { %v2831_v16 = vmul.f32 -30.0, %v8073_v18  ;;  %vm4159_vm3 = vcmp.eq.s32.totalorder %v4157_v26, 0  ;;  %vm4162_vm7 = vcmp.eq.s32.totalorder %v4157_v26, 2  ;;  %v2847_v63 = vmul.f32 100.0, %v2809_v6 }
 0x3f6   :  { %v5232_v8 = vpop.eup %5231  ;;  %4604 = vst [vmem:[%s8219_s5 + $0x48] sm:$0xff] %v4588_v58  ;;  %v4161_v10 = vsel %vm4159_vm3, %v7857_v62, %v4160_v2  ;;  %v4164_v57 = vsel %vm4162_vm7, %v4163_v61, %v7878_v60  ;;  %5233 = vpow2.f32 %v2889_v36  ;;  %v2747_v4 = vadd.f32 %v2731_v28, %v2715_v49 }
 0x3f7   :  { %v4589_v33 = vmul.f32 %v5232_v8, %v4063_v54  ;;  %v4256_v18 = vsel %vm7779_vm9, 0, %v7795_v30  ;;  %v2863_v23 = vsub.f32 %v2831_v16, %v2847_v63  ;;  %v2762_v9 = vadd.f32 %v2746_v32, %v8856_v41  ;;  %v8864_v54 = vld [vmem:[#allocation2_spill] sm:$0xff] }
 0x3f8   :  { %v8857_v45 = vsub.s32 4, %v7740_v15  ;;  %v8157_v62 = vsel %vm4478_vm8, %v4562_v56, %v7838_v21  ;;  %v4564_v24 = vsel %vm8109_vm14, %v7670_v5, %v4561_v11  ;;  %v2732_v30 = vmul.f32 %v8123_v31, %v8123_v31  ;;  %v8858_v21 = vld [vmem:[#allocation52_spill] sm:$0xff] }
 0x3f9   :  { %4605 = vst [vmem:[%s8219_s5 + $0x50] sm:$0xff] %v4589_v33  ;;  %vm4158_vm9 = vcmp.lt.s32.totalorder %v4157_v26, 2  ;;  %v2891_v60 = vmul.f32 1.442695, %v2863_v23  ;;  %v2810_v27 = vadd.f32 %v2792_v35, %v2762_v9  ;;  %v2716_v56 = vmul.f32 %v8858_v21, %v8858_v21 }
 0x3fa   :  { %v4460_v38 = vsel %vm4375_vm10, %v8857_v45, %v7740_v15  ;;  %v2832_v15 = vmul.f32 -30.0, %v8086_v39  ;;  %v4165_v25 = vsel %vm4158_vm9, %v4161_v10, %v4164_v57  ;;  %v4260_v47 = vand.u32 3, %v4256_v18 }
 0x3fb   :  { %v2763_v11 = vadd.f32 %v2747_v4, %v8859_v48  ;;  %v4263_v22 = vxor.u32 2147483648, %v7901_v37  ;;  %v4266_v50 = vxor.u32 2147483648, %v8860_v55  ;;  %5235 = vpow2.f32 %v2891_v60  ;;  %v8866_v60 = vld [vmem:[#allocation35_spill] sm:$0xff] }
 0x3fc   :  { %v2848_v12 = vmul.f32 100.0, %v2810_v27  ;;  %5237 = vcosq.f32 %v4564_v24  ;;  %v2748_v42 = vadd.f32 %v2732_v30, %v2716_v56  ;;  %v4359_v26 = vsel %vm7870_vm13, 0, %v8861_v20 }
 0x3fd   :  { %v2811_v44 = vadd.f32 %v2794_v40, %v2763_v11  ;;  %5239 = vsinq.f32 %v4564_v24  ;;  %vm4156_vm10 = vweird.f32 %v8863_v51  ;;  %v2833_v1 = vmul.f32 -30.0, %v8088_v0 }
 0x3fe   :  { %v2864_v3 = vsub.f32 %v2832_v15, %v2848_v12  ;;  %v4166_v2 = vsel %vm4156_vm10, nan, %v4165_v25  ;;  %vm4262_vm8 = vcmp.eq.s32.totalorder %v4260_v47, 0  ;;  %vm4265_vm5 = vcmp.eq.s32.totalorder %v4260_v47, 2 }
 0x3ff   :  { %v2849_v61 = vmul.f32 100.0, %v2811_v44  ;;  %v4264_v19 = vsel %vm4262_vm8, %v8860_v55, %v4263_v22  ;;  %v4267_v28 = vsel %vm4265_vm5, %v4266_v50, %v7901_v37  ;;  %v4363_v14 = vand.u32 3, %v4359_v26 }
 0x400   :  { %v2893_v34 = vmul.f32 1.442695, %v2864_v3  ;;  %v5234_v32 = vpop.eup %5233  ;;  %vm4261_vm13 = vcmp.lt.s32.totalorder %v4260_v47, 2  ;;  %v4462_v6 = vsel %vm7991_vm2, 0, %v4460_v38  ;;  %v2764_v0 = vadd.f32 %v2748_v42, %v8864_v54 }
 0x401   :  { %v2865_v58 = vsub.f32 %v2833_v1, %v2849_v61  ;;  %v4590_v36 = vmul.f32 %v5234_v32, %v4166_v2  ;;  %v4366_v52 = vxor.u32 2147483648, %v8052_v43  ;;  %v4369_v49 = vxor.u32 2147483648, %v7961_v17 }
 0x402   :  { %5241 = vpow2.f32 %v2893_v34  ;;  %v2834_v16 = vmul.f32 -30.0, %v8123_v31  ;;  %v4268_v37 = vsel %vm4261_vm13, %v4264_v19, %v4267_v28  ;;  %v2812_v8 = vadd.f32 %v2796_v29, %v2764_v0 }
 0x403   :  { %v2895_v63 = vmul.f32 1.442695, %v2865_v58  ;;  %4606 = vst [vmem:[%s8219_s5 + $0x58] sm:$0xff] %v4590_v36  ;;  %vm4259_vm2 = vweird.f32 %v8865_v7  ;;  %vm4365_vm6 = vcmp.eq.s32.totalorder %v4363_v14, 0  ;;  %vm4368_vm12 = vcmp.eq.s32.totalorder %v4363_v14, 2 }
 0x404   :  { %v4466_v10 = vand.u32 3, %v4462_v6  ;;  %v4469_v57 = vxor.u32 2147483648, %v8100_v13  ;;  %v4472_v4 = vxor.u32 2147483648, %v8090_v59  ;;  %v2850_v35 = vmul.f32 100.0, %v2812_v8 }
 0x405   :  { %5243 = vpow2.f32 %v2895_v63  ;;  %v5236_v33 = vpop.eup %5235  ;;  %v4269_v31 = vsel %vm4259_vm2, nan, %v4268_v37  ;;  %v4367_v18 = vsel %vm4365_vm6, %v7961_v17, %v4366_v52  ;;  %v4370_v23 = vsel %vm4368_vm12, %v4369_v49, %v8052_v43 }
 0x406   :  { %v5238_v41 = vpop.eup %5237  ;;  %v4591_v9 = vmul.f32 %v5236_v33, %v4269_v31  ;;  %v4565_v45 = vsel %vm8109_vm14, 0, %v8157_v62  ;;  %v2866_v38 = vsub.f32 %v2834_v16, %v2850_v35  ;;  %vm4364_vm11 = vcmp.lt.s32.totalorder %v4363_v14, 2 }
 0x407   :  { %v5240_v24 = vpop.eup %5239  ;;  %vm4468_vm15 = vcmp.eq.s32.totalorder %v4466_v10, 0  ;;  %vm4471_vm4 = vcmp.eq.s32.totalorder %v4466_v10, 2  ;;  %v4371_v30 = vsel %vm4364_vm11, %v4367_v18, %v4370_v23  ;;  %vm4362_vm1 = vweird.f32 %v8866_v60 }
 0x408   :  { %4607 = vst [vmem:[%s8219_s5 + $0x60] sm:$0xff] %v4591_v9  ;;  %v4470_v17 = vsel %vm4468_vm15, %v8090_v59, %v4469_v57  ;;  %v4473_v43 = vsel %vm4471_vm4, %v4472_v4, %v8100_v13  ;;  %v2897_v15 = vmul.f32 1.442695, %v2866_v38  ;;  %v4569_v27 = vand.u32 3, %v4565_v45 }
 0x409   :  { %vm4467_vm0 = vcmp.lt.s32.totalorder %v4466_v10, 2  ;;  %v4572_v53 = vxor.u32 2147483648, %v5240_v24  ;;  %v4575_v62 = vxor.u32 2147483648, %v5238_v41  ;;  %v4372_v25 = vsel %vm4362_vm1, nan, %v4371_v30 }
 0x40a   :  { %5245 = vpow2.f32 %v2897_v15  ;;  %v4474_v21 = vsel %vm4467_vm0, %v4470_v17, %v4473_v43  ;;  %vm4465_vm14 = vweird.f32 %v7527_v46  ;;  %vm4571_vm3 = vcmp.eq.s32.totalorder %v4569_v27, 0 }
 0x40b   :  { %vm4574_vm7 = vcmp.eq.s32.totalorder %v4569_v27, 2  ;;  %v4475_v59 = vsel %vm4465_vm14, nan, %v4474_v21  ;;  %v4573_v13 = vsel %vm4571_vm3, %v5238_v41, %v4572_v53  ;;  %vm4570_vm9 = vcmp.lt.s32.totalorder %v4569_v27, 2 }
 0x40c   :  { %v5242_v40 = vpop.eup %5241  ;;  %v4576_v48 = vsel %vm4574_vm7, %v4575_v62, %v5240_v24  ;;  %vm4568_vm10 = vweird.f32 %v7670_v5 }
 0x40d   :  { %v4592_v56 = vmul.f32 %v5242_v40, %v4372_v25  ;;  %v4577_v22 = vsel %vm4570_vm9, %v4573_v13, %v4576_v48 }
 0x40e   :  { %v4578_v55 = vsel %vm4568_vm10, nan, %v4577_v22 }
 0x40f   :  { %v5244_v47 = vpop.eup %5243  ;;  %4608 = vst [vmem:[%s8219_s5 + $0x68] sm:$0xff] %v4592_v56 }
 0x410   :  { %v4593_v11 = vmul.f32 %v5244_v47, %v4475_v59 }
 0x412   :  { %4609 = vst [vmem:[%s8219_s5 + $0x70] sm:$0xff] %v4593_v11 }
 0x414   :  { %v5246_v46 = vpop.eup %5245 }
 0x415   :  { %v4594_v50 = vmul.f32 %v5246_v46, %v4578_v55 }
 0x417   :  { %4610 = vst [vmem:[%s8219_s5 + $0x78] sm:$0xff] %v4594_v50 }

</bundles_post_ra>
